<compile_context>
chip_gen: v5e
topology: v5e:2x2
jax: 0.10.0
libtpu: 0.0.40
codegen_flags: <defaults>
</compile_context>

<pallas_src>
import jax
import jax.numpy as jnp
from jax.experimental import pallas as pl
from jax.experimental.pallas import tpu as pltpu

# ---- model dimensions (small, consistent with the PyTorch module) ----
B, S, L, C = 2, 8, 32, 1          # n_samples, n_segments, n_len_seg, n_channel
K, STRIDE = 16, 2                 # Net1D kernel_size / stride
F = 64                            # cnn.filter_list[-1] == out_channels
H = 64                            # LSTM hidden size == out_channels
D = 2 * H                         # bidirectional feature size
NC = 3                            # n_classes
T_OUT = (L - K) // STRIDE + 1     # conv output length (9)


# ---------------------------------------------------------------------------
# Fused kernel: CNN -> BiLSTM -> temporal attention -> dense  (whole batch)
# ---------------------------------------------------------------------------
def deep_spiro_kernel(xs_ref, mask_ref,
                      w_eff_ref, b_conv_ref,
                      wih_ref, bih_ref, whh_ref,
                      w1_ref, b1_ref, v_ref, wd_ref, bd_ref,
                      out_ref, xcat_sc):
    xs = xs_ref[...]            # (S*B, L)  s-major rows: row = s*B + b
    mask01 = mask_ref[...]      # (B, S)    float {0,1} prefix mask

    # ---- 1. CNN stand-in + mean over time, pre-folded into w_eff -> one matmul ----
    feats = jnp.dot(xs, w_eff_ref[...],
                    preferred_element_type=jnp.float32) + b_conv_ref[...]     # (S*B, F)

    # ---- 2. BiLSTM: hoisted input projection (both directions, all steps) ----
    xproj = jnp.dot(feats, wih_ref[...],
                    preferred_element_type=jnp.float32) + bih_ref[...]        # (S*B, 8H)

    zeros_h = jnp.zeros((B, H), jnp.float32)
    h_f, c_f = zeros_h, zeros_h
    h_b, c_b = zeros_h, zeros_h
    # Fully unrolled (S=8 static); fwd & bwd share one block-diagonal matmul per step.
    for k in range(S):
        tf = k
        tb = S - 1 - k
        m_f = mask01[:, tf:tf + 1]                                  # (B, 1)
        m_b = mask01[:, tb:tb + 1]
        xp = jnp.concatenate(
            [xproj[tf * B:(tf + 1) * B, 0:4 * H],                   # fwd gates @ step tf
             xproj[tb * B:(tb + 1) * B, 4 * H:8 * H]], axis=-1)     # bwd gates @ step tb
        h_cat = jnp.concatenate([h_f, h_b], axis=-1)                # (B, 2H)
        gates = xp + jnp.dot(h_cat, whh_ref[...],
                             preferred_element_type=jnp.float32)    # (B, 8H)
        ifo_f = jax.nn.sigmoid(gates[:, 0:3 * H])
        g_f = jnp.tanh(gates[:, 3 * H:4 * H])
        ifo_b = jax.nn.sigmoid(gates[:, 4 * H:7 * H])
        g_b = jnp.tanh(gates[:, 7 * H:8 * H])
        c_f_new = ifo_f[:, H:2 * H] * c_f + ifo_f[:, 0:H] * g_f
        h_f_new = ifo_f[:, 2 * H:3 * H] * jnp.tanh(c_f_new)
        c_b_new = ifo_b[:, H:2 * H] * c_b + ifo_b[:, 0:H] * g_b
        h_b_new = ifo_b[:, 2 * H:3 * H] * jnp.tanh(c_b_new)
        out_f = m_f * h_f_new
        out_b = m_b * h_b_new
        # Mask-gated update == pack_padded_sequence semantics (state frozen, output 0).
        h_f = out_f + (1.0 - m_f) * h_f
        c_f = m_f * c_f_new + (1.0 - m_f) * c_f
        h_b = out_b + (1.0 - m_b) * h_b
        c_b = m_b * c_b_new + (1.0 - m_b) * c_b
        # Store outputs into the VMEM scratch (b-major rows): bounded live ranges.
        for b in range(B):
            xcat_sc[b * S + tf:b * S + tf + 1, 0:H] = out_f[b:b + 1, :]
            xcat_sc[b * S + tb:b * S + tb + 1, H:2 * H] = out_b[b:b + 1, :]

    # ---- 3. Temporal attention (linear1 -> swish -> folded bilinear*w2 -> softmax) ----
    xcat = xcat_sc[...]                                             # (B*S, D) b-major
    a = jnp.dot(xcat, w1_ref[...], preferred_element_type=jnp.float32) + b1_ref[...]
    a = a * jax.nn.sigmoid(a)                                       # Swish
    scores = jnp.dot(a, v_ref[...], preferred_element_type=jnp.float32)      # (B*S, 1)
    ctx_rows = []
    for b in range(B):
        attn_b = jax.nn.softmax(scores[b * S:(b + 1) * S, :], axis=0)        # (S, 1)
        # Context = MXU contraction over the sequence axis (as in flash-attn bwd).
        ctx_b = jax.lax.dot_general(
            attn_b, xcat[b * S:(b + 1) * S, :],
            (((0,), (0,)), ((), ())), preferred_element_type=jnp.float32)    # (1, D)
        ctx_rows.append(ctx_b)
    ctx = jnp.concatenate(ctx_rows, axis=0)                         # (B, D)

    # ---- final dense: single write of the whole batch ----
    out_ref[...] = jnp.dot(ctx, wd_ref[...],
                           preferred_element_type=jnp.float32) + bd_ref[...]  # (B, NC)


# ---------------------------------------------------------------------------
# Parameter init (deterministic, synthetic). Gate order is (i, f, o, g).
# All algebraic folds (conv taps+mean, bilinear@linear2, block-diag Whh) happen here.
# ---------------------------------------------------------------------------
def init_params(key):
    ks = jax.random.split(key, 13)

    def u(k, shape, scale):
        return jax.random.uniform(k, shape, jnp.float32, -scale, scale)

    sc = 1.0 / (K ** 0.5)
    sl = 1.0 / (H ** 0.5)
    xav_dd = (6.0 / (D + D)) ** 0.5
    xav_d1 = (6.0 / (D + 1)) ** 0.5
    sd = 1.0 / (D ** 0.5)

    # Conv weight, then fold sliding-window taps + mean:  feats = x @ (A @ w_conv) + b
    w_conv = u(ks[0], (K, F), sc)
    A = jnp.zeros((L, K), jnp.float32)
    eye_over_t = jnp.eye(K, dtype=jnp.float32) / T_OUT
    for t in range(T_OUT):
        A = A.at[t * STRIDE:t * STRIDE + K, :].add(eye_over_t)
    w_eff = jnp.dot(A, w_conv)                                       # (L, F)

    wih_f = u(ks[2], (F, 4 * H), sl)
    wih_b = u(ks[5], (F, 4 * H), sl)
    b_f = u(ks[4], (1, 4 * H), sl)       # combined b_ih + b_hh (equivalent to torch's sum)
    b_b = u(ks[7], (1, 4 * H), sl)
    whh_f = u(ks[3], (H, 4 * H), sl)
    whh_b = u(ks[6], (H, 4 * H), sl)
    # Block-diagonal recurrence weight: [h_f | h_b] @ whh_blk == [h_f@whh_f | h_b@whh_b]
    whh_blk = jnp.zeros((2 * H, 8 * H), jnp.float32)
    whh_blk = whh_blk.at[:H, :4 * H].set(whh_f)
    whh_blk = whh_blk.at[H:, 4 * H:].set(whh_b)

    wb = u(ks[9], (D, D), xav_dd)        # TemporalAttention.bilinear_weight
    w2T = u(ks[10], (D, 1), xav_d1)      # TemporalAttention.linear2 (no bias)

    return dict(
        w_eff=w_eff, b_conv=u(ks[1], (1, F), sc),
        wih_cat=jnp.concatenate([wih_f, wih_b], axis=1),             # (F, 8H)
        b_cat=jnp.concatenate([b_f, b_b], axis=1),                   # (1, 8H)
        whh_blk=whh_blk,                                             # (2H, 8H)
        w1T=u(ks[8], (D, D), xav_dd), b1=jnp.zeros((1, D), jnp.float32),
        v=jnp.dot(wb, w2T),                                          # (D, 1) folded scorer
        wdT=u(ks[11], (D, NC), sd), bd=u(ks[12], (1, NC), sd),
    )


# ---------------------------------------------------------------------------
# Forward: one fused pallas_call, whole batch in a single grid step.
# ---------------------------------------------------------------------------
def deep_spiro_forward(x, mask, params):
    # x: (B, S, L, C) with C == 1 ; mask: (B, S) float {0,1} prefix mask
    # Wrapper-side layout plumbing: s-major rows (segment outer, sample inner) so
    # every per-step LSTM slice in the kernel is a contiguous row block.
    xs = jnp.transpose(x[..., 0], (1, 0, 2)).reshape(S * B, L)       # (S*B, L)
    maskf = mask.astype(jnp.float32)                                  # (B, S)

    const2 = lambda i: (0, 0)
    out = pl.pallas_call(
        deep_spiro_kernel,
        out_shape=jax.ShapeDtypeStruct((B, NC), jnp.float32),
        grid=(1,),
        in_specs=[
            pl.BlockSpec((S * B, L), const2),
            pl.BlockSpec((B, S), const2),
            pl.BlockSpec((L, F), const2),
            pl.BlockSpec((1, F), const2),
            pl.BlockSpec((F, 8 * H), const2),
            pl.BlockSpec((1, 8 * H), const2),
            pl.BlockSpec((2 * H, 8 * H), const2),
            pl.BlockSpec((D, D), const2),
            pl.BlockSpec((1, D), const2),
            pl.BlockSpec((D, 1), const2),
            pl.BlockSpec((D, NC), const2),
            pl.BlockSpec((1, NC), const2),
        ],
        out_specs=pl.BlockSpec((B, NC), const2),
        scratch_shapes=[pltpu.VMEM((B * S, D), jnp.float32)],
        compiler_params=pltpu.CompilerParams(
            dimension_semantics=("arbitrary",)),
    )(xs, maskf,
      params["w_eff"], params["b_conv"],
      params["wih_cat"], params["b_cat"], params["whh_blk"],
      params["w1T"], params["b1"], params["v"], params["wdT"], params["bd"])
    return out                                                       # (B, n_classes)


if __name__ == "__main__":
    key = jax.random.PRNGKey(0)
    k_x, k_p = jax.random.split(key)

    x = jax.random.normal(k_x, (B, S, L, C), jnp.float32)
    lengths = jnp.array([8, 5], jnp.int32)
    mask = (jnp.arange(S)[None, :] < lengths[:, None]).astype(jnp.float32)   # (B, S)

    params = init_params(k_p)

    fwd = jax.jit(deep_spiro_forward)
    out = fwd(x, mask, params)
    jax.block_until_ready(out)
    assert out.shape == (B, NC)
    print("KERNEL_OK")
</pallas_src>

<mosaic_0001>
module attributes {stable_mosaic.version = 11 : i64} {
  func.func @deep_spiro_kernel(%arg0: i32, %arg1: memref<16x32xf32, #tpu.memory_space<vmem>>, %arg2: memref<2x8xf32, #tpu.memory_space<vmem>>, %arg3: memref<32x64xf32, #tpu.memory_space<vmem>>, %arg4: memref<1x64xf32, #tpu.memory_space<vmem>>, %arg5: memref<64x512xf32, #tpu.memory_space<vmem>>, %arg6: memref<1x512xf32, #tpu.memory_space<vmem>>, %arg7: memref<128x512xf32, #tpu.memory_space<vmem>>, %arg8: memref<128x128xf32, #tpu.memory_space<vmem>>, %arg9: memref<1x128xf32, #tpu.memory_space<vmem>>, %arg10: memref<128x1xf32, #tpu.memory_space<vmem>>, %arg11: memref<128x3xf32, #tpu.memory_space<vmem>>, %arg12: memref<1x3xf32, #tpu.memory_space<vmem>>, %arg13: memref<2x3xf32, #tpu.memory_space<vmem>>, %arg14: memref<16x128xf32, #tpu.memory_space<vmem>>) attributes {dimension_semantics = [#tpu.dimension_semantics<arbitrary>], iteration_bounds = array<i64: 1>, scalar_prefetch = 0 : i64, scratch_operands = 1 : i64, tpu.core_type = #tpu.core_type<tc>, window_params = [{pipeline_mode = #tpu.pipeline_mode<synchronous>, transform_indices = @transform_0, window_bounds = array<i64: 16, 32>}, {pipeline_mode = #tpu.pipeline_mode<synchronous>, transform_indices = @transform_1, window_bounds = array<i64: 2, 8>}, {pipeline_mode = #tpu.pipeline_mode<synchronous>, transform_indices = @transform_2, window_bounds = array<i64: 32, 64>}, {pipeline_mode = #tpu.pipeline_mode<synchronous>, transform_indices = @transform_3, window_bounds = array<i64: 1, 64>}, {pipeline_mode = #tpu.pipeline_mode<synchronous>, transform_indices = @transform_4, window_bounds = array<i64: 64, 512>}, {pipeline_mode = #tpu.pipeline_mode<synchronous>, transform_indices = @transform_5, window_bounds = array<i64: 1, 512>}, {pipeline_mode = #tpu.pipeline_mode<synchronous>, transform_indices = @transform_6, window_bounds = array<i64: 128, 512>}, {pipeline_mode = #tpu.pipeline_mode<synchronous>, transform_indices = @transform_7, window_bounds = array<i64: 128, 128>}, {pipeline_mode = #tpu.pipeline_mode<synchronous>, transform_indices = @transform_8, window_bounds = array<i64: 1, 128>}, {pipeline_mode = #tpu.pipeline_mode<synchronous>, transform_indices = @transform_9, window_bounds = array<i64: 128, 1>}, {pipeline_mode = #tpu.pipeline_mode<synchronous>, transform_indices = @transform_10, window_bounds = array<i64: 128, 3>}, {pipeline_mode = #tpu.pipeline_mode<synchronous>, transform_indices = @transform_11, window_bounds = array<i64: 1, 3>}, {pipeline_mode = #tpu.pipeline_mode<synchronous>, transform_indices = @transform_12, window_bounds = array<i64: 2, 3>}]} {
    %c0 = arith.constant 0 : index
    %c0_0 = arith.constant 0 : index
    %0 = vector.load %arg1[%c0, %c0_0] : memref<16x32xf32, #tpu.memory_space<vmem>>, vector<16x32xf32>
    %c0_1 = arith.constant 0 : index
    %c0_2 = arith.constant 0 : index
    %1 = vector.load %arg2[%c0_1, %c0_2] : memref<2x8xf32, #tpu.memory_space<vmem>>, vector<2x8xf32>
    %c0_3 = arith.constant 0 : index
    %c0_4 = arith.constant 0 : index
    %2 = vector.load %arg3[%c0_3, %c0_4] : memref<32x64xf32, #tpu.memory_space<vmem>>, vector<32x64xf32>
    %cst = arith.constant dense<0.000000e+00> : vector<16x64xf32>
    %3 = tpu.matmul %0, %2, %cst {dimension_numbers = #tpu.dot_dimension_numbers<[1], [0], [0], [1], [0, 0, 1, 1], [], []>} : vector<16x32xf32>, vector<32x64xf32>, vector<16x64xf32> -> vector<16x64xf32>
    %c0_5 = arith.constant 0 : index
    %c0_6 = arith.constant 0 : index
    %4 = vector.load %arg4[%c0_5, %c0_6] : memref<1x64xf32, #tpu.memory_space<vmem>>, vector<1x64xf32>
    %5 = vector.broadcast %4 : vector<1x64xf32> to vector<16x64xf32>
    %6 = arith.addf %3, %5 : vector<16x64xf32>
    %c0_7 = arith.constant 0 : index
    %c0_8 = arith.constant 0 : index
    %7 = vector.load %arg5[%c0_7, %c0_8] : memref<64x512xf32, #tpu.memory_space<vmem>>, vector<64x512xf32>
    %cst_9 = arith.constant dense<0.000000e+00> : vector<16x512xf32>
    %8 = tpu.matmul %6, %7, %cst_9 {dimension_numbers = #tpu.dot_dimension_numbers<[1], [0], [0], [1], [0, 0, 1, 1], [], []>} : vector<16x64xf32>, vector<64x512xf32>, vector<16x512xf32> -> vector<16x512xf32>
    %c0_10 = arith.constant 0 : index
    %c0_11 = arith.constant 0 : index
    %9 = vector.load %arg6[%c0_10, %c0_11] : memref<1x512xf32, #tpu.memory_space<vmem>>, vector<1x512xf32>
    %10 = vector.broadcast %9 : vector<1x512xf32> to vector<16x512xf32>
    %11 = arith.addf %8, %10 : vector<16x512xf32>
    %cst_12 = arith.constant 0.000000e+00 : f32
    %12 = vector.broadcast %cst_12 : f32 to vector<2x64xf32>
    %13 = vector.extract_strided_slice %1 {offsets = [0, 0], sizes = [2, 1], strides = [1, 1]} : vector<2x8xf32> to vector<2x1xf32>
    %14 = vector.extract_strided_slice %1 {offsets = [0, 7], sizes = [2, 1], strides = [1, 1]} : vector<2x8xf32> to vector<2x1xf32>
    %15 = vector.extract_strided_slice %11 {offsets = [0, 0], sizes = [2, 256], strides = [1, 1]} : vector<16x512xf32> to vector<2x256xf32>
    %16 = vector.extract_strided_slice %11 {offsets = [14, 256], sizes = [2, 256], strides = [1, 1]} : vector<16x512xf32> to vector<2x256xf32>
    %17 = tpu.concatenate %15, %16 in 1 : vector<2x256xf32>, vector<2x256xf32> -> vector<2x512xf32>
    %18 = tpu.concatenate %12, %12 in 1 : vector<2x64xf32>, vector<2x64xf32> -> vector<2x128xf32>
    %c0_13 = arith.constant 0 : index
    %c0_14 = arith.constant 0 : index
    %19 = vector.load %arg7[%c0_13, %c0_14] : memref<128x512xf32, #tpu.memory_space<vmem>>, vector<128x512xf32>
    %cst_15 = arith.constant dense<0.000000e+00> : vector<2x512xf32>
    %20 = tpu.matmul %18, %19, %cst_15 {dimension_numbers = #tpu.dot_dimension_numbers<[1], [0], [0], [1], [0, 0, 1, 1], [], []>} : vector<2x128xf32>, vector<128x512xf32>, vector<2x512xf32> -> vector<2x512xf32>
    %21 = arith.addf %17, %20 : vector<2x512xf32>
    %22 = vector.extract_strided_slice %21 {offsets = [0, 0], sizes = [2, 192], strides = [1, 1]} : vector<2x512xf32> to vector<2x192xf32>
    %23 = arith.negf %22 : vector<2x192xf32>
    %24 = math.exp %23 : vector<2x192xf32>
    %cst_16 = arith.constant 1.000000e+00 : f32
    %25 = vector.broadcast %cst_16 : f32 to vector<2x192xf32>
    %26 = arith.addf %25, %24 : vector<2x192xf32>
    %27 = arith.divf %25, %26 : vector<2x192xf32>
    %28 = vector.extract_strided_slice %21 {offsets = [0, 192], sizes = [2, 64], strides = [1, 1]} : vector<2x512xf32> to vector<2x64xf32>
    %29 = math.tanh %28 : vector<2x64xf32>
    %30 = vector.extract_strided_slice %21 {offsets = [0, 256], sizes = [2, 192], strides = [1, 1]} : vector<2x512xf32> to vector<2x192xf32>
    %31 = arith.negf %30 : vector<2x192xf32>
    %32 = math.exp %31 : vector<2x192xf32>
    %cst_17 = arith.constant 1.000000e+00 : f32
    %33 = vector.broadcast %cst_17 : f32 to vector<2x192xf32>
    %34 = arith.addf %33, %32 : vector<2x192xf32>
    %35 = arith.divf %33, %34 : vector<2x192xf32>
    %36 = vector.extract_strided_slice %21 {offsets = [0, 448], sizes = [2, 64], strides = [1, 1]} : vector<2x512xf32> to vector<2x64xf32>
    %37 = math.tanh %36 : vector<2x64xf32>
    %38 = vector.extract_strided_slice %27 {offsets = [0, 64], sizes = [2, 64], strides = [1, 1]} : vector<2x192xf32> to vector<2x64xf32>
    %39 = arith.mulf %38, %12 : vector<2x64xf32>
    %40 = vector.extract_strided_slice %27 {offsets = [0, 0], sizes = [2, 64], strides = [1, 1]} : vector<2x192xf32> to vector<2x64xf32>
    %41 = arith.mulf %40, %29 : vector<2x64xf32>
    %42 = arith.addf %39, %41 : vector<2x64xf32>
    %43 = vector.extract_strided_slice %27 {offsets = [0, 128], sizes = [2, 64], strides = [1, 1]} : vector<2x192xf32> to vector<2x64xf32>
    %44 = math.tanh %42 : vector<2x64xf32>
    %45 = arith.mulf %43, %44 : vector<2x64xf32>
    %46 = vector.extract_strided_slice %35 {offsets = [0, 64], sizes = [2, 64], strides = [1, 1]} : vector<2x192xf32> to vector<2x64xf32>
    %47 = arith.mulf %46, %12 : vector<2x64xf32>
    %48 = vector.extract_strided_slice %35 {offsets = [0, 0], sizes = [2, 64], strides = [1, 1]} : vector<2x192xf32> to vector<2x64xf32>
    %49 = arith.mulf %48, %37 : vector<2x64xf32>
    %50 = arith.addf %47, %49 : vector<2x64xf32>
    %51 = vector.extract_strided_slice %35 {offsets = [0, 128], sizes = [2, 64], strides = [1, 1]} : vector<2x192xf32> to vector<2x64xf32>
    %52 = math.tanh %50 : vector<2x64xf32>
    %53 = arith.mulf %51, %52 : vector<2x64xf32>
    %54 = vector.broadcast %13 : vector<2x1xf32> to vector<2x64xf32>
    %55 = arith.mulf %54, %45 : vector<2x64xf32>
    %56 = vector.broadcast %14 : vector<2x1xf32> to vector<2x64xf32>
    %57 = arith.mulf %56, %53 : vector<2x64xf32>
    %cst_18 = arith.constant 1.000000e+00 : f32
    %58 = vector.broadcast %cst_18 : f32 to vector<2x1xf32>
    %59 = arith.subf %58, %13 : vector<2x1xf32>
    %60 = vector.broadcast %59 : vector<2x1xf32> to vector<2x64xf32>
    %61 = arith.mulf %60, %12 : vector<2x64xf32>
    %62 = arith.addf %55, %61 : vector<2x64xf32>
    %63 = vector.broadcast %13 : vector<2x1xf32> to vector<2x64xf32>
    %64 = arith.mulf %63, %42 : vector<2x64xf32>
    %cst_19 = arith.constant 1.000000e+00 : f32
    %65 = vector.broadcast %cst_19 : f32 to vector<2x1xf32>
    %66 = arith.subf %65, %13 : vector<2x1xf32>
    %67 = vector.broadcast %66 : vector<2x1xf32> to vector<2x64xf32>
    %68 = arith.mulf %67, %12 : vector<2x64xf32>
    %69 = arith.addf %64, %68 : vector<2x64xf32>
    %cst_20 = arith.constant 1.000000e+00 : f32
    %70 = vector.broadcast %cst_20 : f32 to vector<2x1xf32>
    %71 = arith.subf %70, %14 : vector<2x1xf32>
    %72 = vector.broadcast %71 : vector<2x1xf32> to vector<2x64xf32>
    %73 = arith.mulf %72, %12 : vector<2x64xf32>
    %74 = arith.addf %57, %73 : vector<2x64xf32>
    %75 = vector.broadcast %14 : vector<2x1xf32> to vector<2x64xf32>
    %76 = arith.mulf %75, %50 : vector<2x64xf32>
    %cst_21 = arith.constant 1.000000e+00 : f32
    %77 = vector.broadcast %cst_21 : f32 to vector<2x1xf32>
    %78 = arith.subf %77, %14 : vector<2x1xf32>
    %79 = vector.broadcast %78 : vector<2x1xf32> to vector<2x64xf32>
    %80 = arith.mulf %79, %12 : vector<2x64xf32>
    %81 = arith.addf %76, %80 : vector<2x64xf32>
    %82 = vector.extract_strided_slice %55 {offsets = [0, 0], sizes = [1, 64], strides = [1, 1]} : vector<2x64xf32> to vector<1x64xf32>
    %c0_22 = arith.constant 0 : index
    %c0_23 = arith.constant 0 : index
    %83 = vector.load %arg14[%c0_22, %c0_23] : memref<16x128xf32, #tpu.memory_space<vmem>>, vector<1x64xf32>
    tpu.vector_store %arg14[%c0_22, %c0_23], %82 {strides = array<i32>} : memref<16x128xf32, #tpu.memory_space<vmem>>, vector<1x64xf32>,
    %84 = vector.extract_strided_slice %57 {offsets = [0, 0], sizes = [1, 64], strides = [1, 1]} : vector<2x64xf32> to vector<1x64xf32>
    %c7 = arith.constant 7 : index
    %c64 = arith.constant 64 : index
    %85 = vector.load %arg14[%c7, %c64] : memref<16x128xf32, #tpu.memory_space<vmem>>, vector<1x64xf32>
    tpu.vector_store %arg14[%c7, %c64], %84 {strides = array<i32>} : memref<16x128xf32, #tpu.memory_space<vmem>>, vector<1x64xf32>,
    %86 = vector.extract_strided_slice %55 {offsets = [1, 0], sizes = [1, 64], strides = [1, 1]} : vector<2x64xf32> to vector<1x64xf32>
    %c8 = arith.constant 8 : index
    %c0_24 = arith.constant 0 : index
    %87 = vector.load %arg14[%c8, %c0_24] : memref<16x128xf32, #tpu.memory_space<vmem>>, vector<1x64xf32>
    tpu.vector_store %arg14[%c8, %c0_24], %86 {strides = array<i32>} : memref<16x128xf32, #tpu.memory_space<vmem>>, vector<1x64xf32>,
    %88 = vector.extract_strided_slice %57 {offsets = [1, 0], sizes = [1, 64], strides = [1, 1]} : vector<2x64xf32> to vector<1x64xf32>
    %c15 = arith.constant 15 : index
    %c64_25 = arith.constant 64 : index
    %89 = vector.load %arg14[%c15, %c64_25] : memref<16x128xf32, #tpu.memory_space<vmem>>, vector<1x64xf32>
    tpu.vector_store %arg14[%c15, %c64_25], %88 {strides = array<i32>} : memref<16x128xf32, #tpu.memory_space<vmem>>, vector<1x64xf32>,
    %90 = vector.extract_strided_slice %1 {offsets = [0, 1], sizes = [2, 1], strides = [1, 1]} : vector<2x8xf32> to vector<2x1xf32>
    %91 = vector.extract_strided_slice %1 {offsets = [0, 6], sizes = [2, 1], strides = [1, 1]} : vector<2x8xf32> to vector<2x1xf32>
    %92 = vector.extract_strided_slice %11 {offsets = [2, 0], sizes = [2, 256], strides = [1, 1]} : vector<16x512xf32> to vector<2x256xf32>
    %93 = vector.extract_strided_slice %11 {offsets = [12, 256], sizes = [2, 256], strides = [1, 1]} : vector<16x512xf32> to vector<2x256xf32>
    %94 = tpu.concatenate %92, %93 in 1 : vector<2x256xf32>, vector<2x256xf32> -> vector<2x512xf32>
    %95 = tpu.concatenate %62, %74 in 1 : vector<2x64xf32>, vector<2x64xf32> -> vector<2x128xf32>
    %c0_26 = arith.constant 0 : index
    %c0_27 = arith.constant 0 : index
    %96 = vector.load %arg7[%c0_26, %c0_27] : memref<128x512xf32, #tpu.memory_space<vmem>>, vector<128x512xf32>
    %cst_28 = arith.constant dense<0.000000e+00> : vector<2x512xf32>
    %97 = tpu.matmul %95, %96, %cst_28 {dimension_numbers = #tpu.dot_dimension_numbers<[1], [0], [0], [1], [0, 0, 1, 1], [], []>} : vector<2x128xf32>, vector<128x512xf32>, vector<2x512xf32> -> vector<2x512xf32>
    %98 = arith.addf %94, %97 : vector<2x512xf32>
    %99 = vector.extract_strided_slice %98 {offsets = [0, 0], sizes = [2, 192], strides = [1, 1]} : vector<2x512xf32> to vector<2x192xf32>
    %100 = arith.negf %99 : vector<2x192xf32>
    %101 = math.exp %100 : vector<2x192xf32>
    %cst_29 = arith.constant 1.000000e+00 : f32
    %102 = vector.broadcast %cst_29 : f32 to vector<2x192xf32>
    %103 = arith.addf %102, %101 : vector<2x192xf32>
    %104 = arith.divf %102, %103 : vector<2x192xf32>
    %105 = vector.extract_strided_slice %98 {offsets = [0, 192], sizes = [2, 64], strides = [1, 1]} : vector<2x512xf32> to vector<2x64xf32>
    %106 = math.tanh %105 : vector<2x64xf32>
    %107 = vector.extract_strided_slice %98 {offsets = [0, 256], sizes = [2, 192], strides = [1, 1]} : vector<2x512xf32> to vector<2x192xf32>
    %108 = arith.negf %107 : vector<2x192xf32>
    %109 = math.exp %108 : vector<2x192xf32>
    %cst_30 = arith.constant 1.000000e+00 : f32
    %110 = vector.broadcast %cst_30 : f32 to vector<2x192xf32>
    %111 = arith.addf %110, %109 : vector<2x192xf32>
    %112 = arith.divf %110, %111 : vector<2x192xf32>
    %113 = vector.extract_strided_slice %98 {offsets = [0, 448], sizes = [2, 64], strides = [1, 1]} : vector<2x512xf32> to vector<2x64xf32>
    %114 = math.tanh %113 : vector<2x64xf32>
    %115 = vector.extract_strided_slice %104 {offsets = [0, 64], sizes = [2, 64], strides = [1, 1]} : vector<2x192xf32> to vector<2x64xf32>
    %116 = arith.mulf %115, %69 : vector<2x64xf32>
    %117 = vector.extract_strided_slice %104 {offsets = [0, 0], sizes = [2, 64], strides = [1, 1]} : vector<2x192xf32> to vector<2x64xf32>
    %118 = arith.mulf %117, %106 : vector<2x64xf32>
    %119 = arith.addf %116, %118 : vector<2x64xf32>
    %120 = vector.extract_strided_slice %104 {offsets = [0, 128], sizes = [2, 64], strides = [1, 1]} : vector<2x192xf32> to vector<2x64xf32>
    %121 = math.tanh %119 : vector<2x64xf32>
    %122 = arith.mulf %120, %121 : vector<2x64xf32>
    %123 = vector.extract_strided_slice %112 {offsets = [0, 64], sizes = [2, 64], strides = [1, 1]} : vector<2x192xf32> to vector<2x64xf32>
    %124 = arith.mulf %123, %81 : vector<2x64xf32>
    %125 = vector.extract_strided_slice %112 {offsets = [0, 0], sizes = [2, 64], strides = [1, 1]} : vector<2x192xf32> to vector<2x64xf32>
    %126 = arith.mulf %125, %114 : vector<2x64xf32>
    %127 = arith.addf %124, %126 : vector<2x64xf32>
    %128 = vector.extract_strided_slice %112 {offsets = [0, 128], sizes = [2, 64], strides = [1, 1]} : vector<2x192xf32> to vector<2x64xf32>
    %129 = math.tanh %127 : vector<2x64xf32>
    %130 = arith.mulf %128, %129 : vector<2x64xf32>
    %131 = vector.broadcast %90 : vector<2x1xf32> to vector<2x64xf32>
    %132 = arith.mulf %131, %122 : vector<2x64xf32>
    %133 = vector.broadcast %91 : vector<2x1xf32> to vector<2x64xf32>
    %134 = arith.mulf %133, %130 : vector<2x64xf32>
    %cst_31 = arith.constant 1.000000e+00 : f32
    %135 = vector.broadcast %cst_31 : f32 to vector<2x1xf32>
    %136 = arith.subf %135, %90 : vector<2x1xf32>
    %137 = vector.broadcast %136 : vector<2x1xf32> to vector<2x64xf32>
    %138 = arith.mulf %137, %62 : vector<2x64xf32>
    %139 = arith.addf %132, %138 : vector<2x64xf32>
    %140 = vector.broadcast %90 : vector<2x1xf32> to vector<2x64xf32>
    %141 = arith.mulf %140, %119 : vector<2x64xf32>
    %cst_32 = arith.constant 1.000000e+00 : f32
    %142 = vector.broadcast %cst_32 : f32 to vector<2x1xf32>
    %143 = arith.subf %142, %90 : vector<2x1xf32>
    %144 = vector.broadcast %143 : vector<2x1xf32> to vector<2x64xf32>
    %145 = arith.mulf %144, %69 : vector<2x64xf32>
    %146 = arith.addf %141, %145 : vector<2x64xf32>
    %cst_33 = arith.constant 1.000000e+00 : f32
    %147 = vector.broadcast %cst_33 : f32 to vector<2x1xf32>
    %148 = arith.subf %147, %91 : vector<2x1xf32>
    %149 = vector.broadcast %148 : vector<2x1xf32> to vector<2x64xf32>
    %150 = arith.mulf %149, %74 : vector<2x64xf32>
    %151 = arith.addf %134, %150 : vector<2x64xf32>
    %152 = vector.broadcast %91 : vector<2x1xf32> to vector<2x64xf32>
    %153 = arith.mulf %152, %127 : vector<2x64xf32>
    %cst_34 = arith.constant 1.000000e+00 : f32
    %154 = vector.broadcast %cst_34 : f32 to vector<2x1xf32>
    %155 = arith.subf %154, %91 : vector<2x1xf32>
    %156 = vector.broadcast %155 : vector<2x1xf32> to vector<2x64xf32>
    %157 = arith.mulf %156, %81 : vector<2x64xf32>
    %158 = arith.addf %153, %157 : vector<2x64xf32>
    %159 = vector.extract_strided_slice %132 {offsets = [0, 0], sizes = [1, 64], strides = [1, 1]} : vector<2x64xf32> to vector<1x64xf32>
    %c1 = arith.constant 1 : index
    %c0_35 = arith.constant 0 : index
    %160 = vector.load %arg14[%c1, %c0_35] : memref<16x128xf32, #tpu.memory_space<vmem>>, vector<1x64xf32>
    tpu.vector_store %arg14[%c1, %c0_35], %159 {strides = array<i32>} : memref<16x128xf32, #tpu.memory_space<vmem>>, vector<1x64xf32>,
    %161 = vector.extract_strided_slice %134 {offsets = [0, 0], sizes = [1, 64], strides = [1, 1]} : vector<2x64xf32> to vector<1x64xf32>
    %c6 = arith.constant 6 : index
    %c64_36 = arith.constant 64 : index
    %162 = vector.load %arg14[%c6, %c64_36] : memref<16x128xf32, #tpu.memory_space<vmem>>, vector<1x64xf32>
    tpu.vector_store %arg14[%c6, %c64_36], %161 {strides = array<i32>} : memref<16x128xf32, #tpu.memory_space<vmem>>, vector<1x64xf32>,
    %163 = vector.extract_strided_slice %132 {offsets = [1, 0], sizes = [1, 64], strides = [1, 1]} : vector<2x64xf32> to vector<1x64xf32>
    %c9 = arith.constant 9 : index
    %c0_37 = arith.constant 0 : index
    %164 = vector.load %arg14[%c9, %c0_37] : memref<16x128xf32, #tpu.memory_space<vmem>>, vector<1x64xf32>
    tpu.vector_store %arg14[%c9, %c0_37], %163 {strides = array<i32>} : memref<16x128xf32, #tpu.memory_space<vmem>>, vector<1x64xf32>,
    %165 = vector.extract_strided_slice %134 {offsets = [1, 0], sizes = [1, 64], strides = [1, 1]} : vector<2x64xf32> to vector<1x64xf32>
    %c14 = arith.constant 14 : index
    %c64_38 = arith.constant 64 : index
    %166 = vector.load %arg14[%c14, %c64_38] : memref<16x128xf32, #tpu.memory_space<vmem>>, vector<1x64xf32>
    tpu.vector_store %arg14[%c14, %c64_38], %165 {strides = array<i32>} : memref<16x128xf32, #tpu.memory_space<vmem>>, vector<1x64xf32>,
    %167 = vector.extract_strided_slice %1 {offsets = [0, 2], sizes = [2, 1], strides = [1, 1]} : vector<2x8xf32> to vector<2x1xf32>
    %168 = vector.extract_strided_slice %1 {offsets = [0, 5], sizes = [2, 1], strides = [1, 1]} : vector<2x8xf32> to vector<2x1xf32>
    %169 = vector.extract_strided_slice %11 {offsets = [4, 0], sizes = [2, 256], strides = [1, 1]} : vector<16x512xf32> to vector<2x256xf32>
    %170 = vector.extract_strided_slice %11 {offsets = [10, 256], sizes = [2, 256], strides = [1, 1]} : vector<16x512xf32> to vector<2x256xf32>
    %171 = tpu.concatenate %169, %170 in 1 : vector<2x256xf32>, vector<2x256xf32> -> vector<2x512xf32>
    %172 = tpu.concatenate %139, %151 in 1 : vector<2x64xf32>, vector<2x64xf32> -> vector<2x128xf32>
    %c0_39 = arith.constant 0 : index
    %c0_40 = arith.constant 0 : index
    %173 = vector.load %arg7[%c0_39, %c0_40] : memref<128x512xf32, #tpu.memory_space<vmem>>, vector<128x512xf32>
    %cst_41 = arith.constant dense<0.000000e+00> : vector<2x512xf32>
    %174 = tpu.matmul %172, %173, %cst_41 {dimension_numbers = #tpu.dot_dimension_numbers<[1], [0], [0], [1], [0, 0, 1, 1], [], []>} : vector<2x128xf32>, vector<128x512xf32>, vector<2x512xf32> -> vector<2x512xf32>
    %175 = arith.addf %171, %174 : vector<2x512xf32>
    %176 = vector.extract_strided_slice %175 {offsets = [0, 0], sizes = [2, 192], strides = [1, 1]} : vector<2x512xf32> to vector<2x192xf32>
    %177 = arith.negf %176 : vector<2x192xf32>
    %178 = math.exp %177 : vector<2x192xf32>
    %cst_42 = arith.constant 1.000000e+00 : f32
    %179 = vector.broadcast %cst_42 : f32 to vector<2x192xf32>
    %180 = arith.addf %179, %178 : vector<2x192xf32>
    %181 = arith.divf %179, %180 : vector<2x192xf32>
    %182 = vector.extract_strided_slice %175 {offsets = [0, 192], sizes = [2, 64], strides = [1, 1]} : vector<2x512xf32> to vector<2x64xf32>
    %183 = math.tanh %182 : vector<2x64xf32>
    %184 = vector.extract_strided_slice %175 {offsets = [0, 256], sizes = [2, 192], strides = [1, 1]} : vector<2x512xf32> to vector<2x192xf32>
    %185 = arith.negf %184 : vector<2x192xf32>
    %186 = math.exp %185 : vector<2x192xf32>
    %cst_43 = arith.constant 1.000000e+00 : f32
    %187 = vector.broadcast %cst_43 : f32 to vector<2x192xf32>
    %188 = arith.addf %187, %186 : vector<2x192xf32>
    %189 = arith.divf %187, %188 : vector<2x192xf32>
    %190 = vector.extract_strided_slice %175 {offsets = [0, 448], sizes = [2, 64], strides = [1, 1]} : vector<2x512xf32> to vector<2x64xf32>
    %191 = math.tanh %190 : vector<2x64xf32>
    %192 = vector.extract_strided_slice %181 {offsets = [0, 64], sizes = [2, 64], strides = [1, 1]} : vector<2x192xf32> to vector<2x64xf32>
    %193 = arith.mulf %192, %146 : vector<2x64xf32>
    %194 = vector.extract_strided_slice %181 {offsets = [0, 0], sizes = [2, 64], strides = [1, 1]} : vector<2x192xf32> to vector<2x64xf32>
    %195 = arith.mulf %194, %183 : vector<2x64xf32>
    %196 = arith.addf %193, %195 : vector<2x64xf32>
    %197 = vector.extract_strided_slice %181 {offsets = [0, 128], sizes = [2, 64], strides = [1, 1]} : vector<2x192xf32> to vector<2x64xf32>
    %198 = math.tanh %196 : vector<2x64xf32>
    %199 = arith.mulf %197, %198 : vector<2x64xf32>
    %200 = vector.extract_strided_slice %189 {offsets = [0, 64], sizes = [2, 64], strides = [1, 1]} : vector<2x192xf32> to vector<2x64xf32>
    %201 = arith.mulf %200, %158 : vector<2x64xf32>
    %202 = vector.extract_strided_slice %189 {offsets = [0, 0], sizes = [2, 64], strides = [1, 1]} : vector<2x192xf32> to vector<2x64xf32>
    %203 = arith.mulf %202, %191 : vector<2x64xf32>
    %204 = arith.addf %201, %203 : vector<2x64xf32>
    %205 = vector.extract_strided_slice %189 {offsets = [0, 128], sizes = [2, 64], strides = [1, 1]} : vector<2x192xf32> to vector<2x64xf32>
    %206 = math.tanh %204 : vector<2x64xf32>
    %207 = arith.mulf %205, %206 : vector<2x64xf32>
    %208 = vector.broadcast %167 : vector<2x1xf32> to vector<2x64xf32>
    %209 = arith.mulf %208, %199 : vector<2x64xf32>
    %210 = vector.broadcast %168 : vector<2x1xf32> to vector<2x64xf32>
    %211 = arith.mulf %210, %207 : vector<2x64xf32>
    %cst_44 = arith.constant 1.000000e+00 : f32
    %212 = vector.broadcast %cst_44 : f32 to vector<2x1xf32>
    %213 = arith.subf %212, %167 : vector<2x1xf32>
    %214 = vector.broadcast %213 : vector<2x1xf32> to vector<2x64xf32>
    %215 = arith.mulf %214, %139 : vector<2x64xf32>
    %216 = arith.addf %209, %215 : vector<2x64xf32>
    %217 = vector.broadcast %167 : vector<2x1xf32> to vector<2x64xf32>
    %218 = arith.mulf %217, %196 : vector<2x64xf32>
    %cst_45 = arith.constant 1.000000e+00 : f32
    %219 = vector.broadcast %cst_45 : f32 to vector<2x1xf32>
    %220 = arith.subf %219, %167 : vector<2x1xf32>
    %221 = vector.broadcast %220 : vector<2x1xf32> to vector<2x64xf32>
    %222 = arith.mulf %221, %146 : vector<2x64xf32>
    %223 = arith.addf %218, %222 : vector<2x64xf32>
    %cst_46 = arith.constant 1.000000e+00 : f32
    %224 = vector.broadcast %cst_46 : f32 to vector<2x1xf32>
    %225 = arith.subf %224, %168 : vector<2x1xf32>
    %226 = vector.broadcast %225 : vector<2x1xf32> to vector<2x64xf32>
    %227 = arith.mulf %226, %151 : vector<2x64xf32>
    %228 = arith.addf %211, %227 : vector<2x64xf32>
    %229 = vector.broadcast %168 : vector<2x1xf32> to vector<2x64xf32>
    %230 = arith.mulf %229, %204 : vector<2x64xf32>
    %cst_47 = arith.constant 1.000000e+00 : f32
    %231 = vector.broadcast %cst_47 : f32 to vector<2x1xf32>
    %232 = arith.subf %231, %168 : vector<2x1xf32>
    %233 = vector.broadcast %232 : vector<2x1xf32> to vector<2x64xf32>
    %234 = arith.mulf %233, %158 : vector<2x64xf32>
    %235 = arith.addf %230, %234 : vector<2x64xf32>
    %236 = vector.extract_strided_slice %209 {offsets = [0, 0], sizes = [1, 64], strides = [1, 1]} : vector<2x64xf32> to vector<1x64xf32>
    %c2 = arith.constant 2 : index
    %c0_48 = arith.constant 0 : index
    %237 = vector.load %arg14[%c2, %c0_48] : memref<16x128xf32, #tpu.memory_space<vmem>>, vector<1x64xf32>
    tpu.vector_store %arg14[%c2, %c0_48], %236 {strides = array<i32>} : memref<16x128xf32, #tpu.memory_space<vmem>>, vector<1x64xf32>,
    %238 = vector.extract_strided_slice %211 {offsets = [0, 0], sizes = [1, 64], strides = [1, 1]} : vector<2x64xf32> to vector<1x64xf32>
    %c5 = arith.constant 5 : index
    %c64_49 = arith.constant 64 : index
    %239 = vector.load %arg14[%c5, %c64_49] : memref<16x128xf32, #tpu.memory_space<vmem>>, vector<1x64xf32>
    tpu.vector_store %arg14[%c5, %c64_49], %238 {strides = array<i32>} : memref<16x128xf32, #tpu.memory_space<vmem>>, vector<1x64xf32>,
    %240 = vector.extract_strided_slice %209 {offsets = [1, 0], sizes = [1, 64], strides = [1, 1]} : vector<2x64xf32> to vector<1x64xf32>
    %c10 = arith.constant 10 : index
    %c0_50 = arith.constant 0 : index
    %241 = vector.load %arg14[%c10, %c0_50] : memref<16x128xf32, #tpu.memory_space<vmem>>, vector<1x64xf32>
    tpu.vector_store %arg14[%c10, %c0_50], %240 {strides = array<i32>} : memref<16x128xf32, #tpu.memory_space<vmem>>, vector<1x64xf32>,
    %242 = vector.extract_strided_slice %211 {offsets = [1, 0], sizes = [1, 64], strides = [1, 1]} : vector<2x64xf32> to vector<1x64xf32>
    %c13 = arith.constant 13 : index
    %c64_51 = arith.constant 64 : index
    %243 = vector.load %arg14[%c13, %c64_51] : memref<16x128xf32, #tpu.memory_space<vmem>>, vector<1x64xf32>
    tpu.vector_store %arg14[%c13, %c64_51], %242 {strides = array<i32>} : memref<16x128xf32, #tpu.memory_space<vmem>>, vector<1x64xf32>,
    %244 = vector.extract_strided_slice %1 {offsets = [0, 3], sizes = [2, 1], strides = [1, 1]} : vector<2x8xf32> to vector<2x1xf32>
    %245 = vector.extract_strided_slice %1 {offsets = [0, 4], sizes = [2, 1], strides = [1, 1]} : vector<2x8xf32> to vector<2x1xf32>
    %246 = vector.extract_strided_slice %11 {offsets = [6, 0], sizes = [2, 256], strides = [1, 1]} : vector<16x512xf32> to vector<2x256xf32>
    %247 = vector.extract_strided_slice %11 {offsets = [8, 256], sizes = [2, 256], strides = [1, 1]} : vector<16x512xf32> to vector<2x256xf32>
    %248 = tpu.concatenate %246, %247 in 1 : vector<2x256xf32>, vector<2x256xf32> -> vector<2x512xf32>
    %249 = tpu.concatenate %216, %228 in 1 : vector<2x64xf32>, vector<2x64xf32> -> vector<2x128xf32>
    %c0_52 = arith.constant 0 : index
    %c0_53 = arith.constant 0 : index
    %250 = vector.load %arg7[%c0_52, %c0_53] : memref<128x512xf32, #tpu.memory_space<vmem>>, vector<128x512xf32>
    %cst_54 = arith.constant dense<0.000000e+00> : vector<2x512xf32>
    %251 = tpu.matmul %249, %250, %cst_54 {dimension_numbers = #tpu.dot_dimension_numbers<[1], [0], [0], [1], [0, 0, 1, 1], [], []>} : vector<2x128xf32>, vector<128x512xf32>, vector<2x512xf32> -> vector<2x512xf32>
    %252 = arith.addf %248, %251 : vector<2x512xf32>
    %253 = vector.extract_strided_slice %252 {offsets = [0, 0], sizes = [2, 192], strides = [1, 1]} : vector<2x512xf32> to vector<2x192xf32>
    %254 = arith.negf %253 : vector<2x192xf32>
    %255 = math.exp %254 : vector<2x192xf32>
    %cst_55 = arith.constant 1.000000e+00 : f32
    %256 = vector.broadcast %cst_55 : f32 to vector<2x192xf32>
    %257 = arith.addf %256, %255 : vector<2x192xf32>
    %258 = arith.divf %256, %257 : vector<2x192xf32>
    %259 = vector.extract_strided_slice %252 {offsets = [0, 192], sizes = [2, 64], strides = [1, 1]} : vector<2x512xf32> to vector<2x64xf32>
    %260 = math.tanh %259 : vector<2x64xf32>
    %261 = vector.extract_strided_slice %252 {offsets = [0, 256], sizes = [2, 192], strides = [1, 1]} : vector<2x512xf32> to vector<2x192xf32>
    %262 = arith.negf %261 : vector<2x192xf32>
    %263 = math.exp %262 : vector<2x192xf32>
    %cst_56 = arith.constant 1.000000e+00 : f32
    %264 = vector.broadcast %cst_56 : f32 to vector<2x192xf32>
    %265 = arith.addf %264, %263 : vector<2x192xf32>
    %266 = arith.divf %264, %265 : vector<2x192xf32>
    %267 = vector.extract_strided_slice %252 {offsets = [0, 448], sizes = [2, 64], strides = [1, 1]} : vector<2x512xf32> to vector<2x64xf32>
    %268 = math.tanh %267 : vector<2x64xf32>
    %269 = vector.extract_strided_slice %258 {offsets = [0, 64], sizes = [2, 64], strides = [1, 1]} : vector<2x192xf32> to vector<2x64xf32>
    %270 = arith.mulf %269, %223 : vector<2x64xf32>
    %271 = vector.extract_strided_slice %258 {offsets = [0, 0], sizes = [2, 64], strides = [1, 1]} : vector<2x192xf32> to vector<2x64xf32>
    %272 = arith.mulf %271, %260 : vector<2x64xf32>
    %273 = arith.addf %270, %272 : vector<2x64xf32>
    %274 = vector.extract_strided_slice %258 {offsets = [0, 128], sizes = [2, 64], strides = [1, 1]} : vector<2x192xf32> to vector<2x64xf32>
    %275 = math.tanh %273 : vector<2x64xf32>
    %276 = arith.mulf %274, %275 : vector<2x64xf32>
    %277 = vector.extract_strided_slice %266 {offsets = [0, 64], sizes = [2, 64], strides = [1, 1]} : vector<2x192xf32> to vector<2x64xf32>
    %278 = arith.mulf %277, %235 : vector<2x64xf32>
    %279 = vector.extract_strided_slice %266 {offsets = [0, 0], sizes = [2, 64], strides = [1, 1]} : vector<2x192xf32> to vector<2x64xf32>
    %280 = arith.mulf %279, %268 : vector<2x64xf32>
    %281 = arith.addf %278, %280 : vector<2x64xf32>
    %282 = vector.extract_strided_slice %266 {offsets = [0, 128], sizes = [2, 64], strides = [1, 1]} : vector<2x192xf32> to vector<2x64xf32>
    %283 = math.tanh %281 : vector<2x64xf32>
    %284 = arith.mulf %282, %283 : vector<2x64xf32>
    %285 = vector.broadcast %244 : vector<2x1xf32> to vector<2x64xf32>
    %286 = arith.mulf %285, %276 : vector<2x64xf32>
    %287 = vector.broadcast %245 : vector<2x1xf32> to vector<2x64xf32>
    %288 = arith.mulf %287, %284 : vector<2x64xf32>
    %cst_57 = arith.constant 1.000000e+00 : f32
    %289 = vector.broadcast %cst_57 : f32 to vector<2x1xf32>
    %290 = arith.subf %289, %244 : vector<2x1xf32>
    %291 = vector.broadcast %290 : vector<2x1xf32> to vector<2x64xf32>
    %292 = arith.mulf %291, %216 : vector<2x64xf32>
    %293 = arith.addf %286, %292 : vector<2x64xf32>
    %294 = vector.broadcast %244 : vector<2x1xf32> to vector<2x64xf32>
    %295 = arith.mulf %294, %273 : vector<2x64xf32>
    %cst_58 = arith.constant 1.000000e+00 : f32
    %296 = vector.broadcast %cst_58 : f32 to vector<2x1xf32>
    %297 = arith.subf %296, %244 : vector<2x1xf32>
    %298 = vector.broadcast %297 : vector<2x1xf32> to vector<2x64xf32>
    %299 = arith.mulf %298, %223 : vector<2x64xf32>
    %300 = arith.addf %295, %299 : vector<2x64xf32>
    %cst_59 = arith.constant 1.000000e+00 : f32
    %301 = vector.broadcast %cst_59 : f32 to vector<2x1xf32>
    %302 = arith.subf %301, %245 : vector<2x1xf32>
    %303 = vector.broadcast %302 : vector<2x1xf32> to vector<2x64xf32>
    %304 = arith.mulf %303, %228 : vector<2x64xf32>
    %305 = arith.addf %288, %304 : vector<2x64xf32>
    %306 = vector.broadcast %245 : vector<2x1xf32> to vector<2x64xf32>
    %307 = arith.mulf %306, %281 : vector<2x64xf32>
    %cst_60 = arith.constant 1.000000e+00 : f32
    %308 = vector.broadcast %cst_60 : f32 to vector<2x1xf32>
    %309 = arith.subf %308, %245 : vector<2x1xf32>
    %310 = vector.broadcast %309 : vector<2x1xf32> to vector<2x64xf32>
    %311 = arith.mulf %310, %235 : vector<2x64xf32>
    %312 = arith.addf %307, %311 : vector<2x64xf32>
    %313 = vector.extract_strided_slice %286 {offsets = [0, 0], sizes = [1, 64], strides = [1, 1]} : vector<2x64xf32> to vector<1x64xf32>
    %c3 = arith.constant 3 : index
    %c0_61 = arith.constant 0 : index
    %314 = vector.load %arg14[%c3, %c0_61] : memref<16x128xf32, #tpu.memory_space<vmem>>, vector<1x64xf32>
    tpu.vector_store %arg14[%c3, %c0_61], %313 {strides = array<i32>} : memref<16x128xf32, #tpu.memory_space<vmem>>, vector<1x64xf32>,
    %315 = vector.extract_strided_slice %288 {offsets = [0, 0], sizes = [1, 64], strides = [1, 1]} : vector<2x64xf32> to vector<1x64xf32>
    %c4 = arith.constant 4 : index
    %c64_62 = arith.constant 64 : index
    %316 = vector.load %arg14[%c4, %c64_62] : memref<16x128xf32, #tpu.memory_space<vmem>>, vector<1x64xf32>
    tpu.vector_store %arg14[%c4, %c64_62], %315 {strides = array<i32>} : memref<16x128xf32, #tpu.memory_space<vmem>>, vector<1x64xf32>,
    %317 = vector.extract_strided_slice %286 {offsets = [1, 0], sizes = [1, 64], strides = [1, 1]} : vector<2x64xf32> to vector<1x64xf32>
    %c11 = arith.constant 11 : index
    %c0_63 = arith.constant 0 : index
    %318 = vector.load %arg14[%c11, %c0_63] : memref<16x128xf32, #tpu.memory_space<vmem>>, vector<1x64xf32>
    tpu.vector_store %arg14[%c11, %c0_63], %317 {strides = array<i32>} : memref<16x128xf32, #tpu.memory_space<vmem>>, vector<1x64xf32>,
    %319 = vector.extract_strided_slice %288 {offsets = [1, 0], sizes = [1, 64], strides = [1, 1]} : vector<2x64xf32> to vector<1x64xf32>
    %c12 = arith.constant 12 : index
    %c64_64 = arith.constant 64 : index
    %320 = vector.load %arg14[%c12, %c64_64] : memref<16x128xf32, #tpu.memory_space<vmem>>, vector<1x64xf32>
    tpu.vector_store %arg14[%c12, %c64_64], %319 {strides = array<i32>} : memref<16x128xf32, #tpu.memory_space<vmem>>, vector<1x64xf32>,
    %321 = vector.extract_strided_slice %1 {offsets = [0, 4], sizes = [2, 1], strides = [1, 1]} : vector<2x8xf32> to vector<2x1xf32>
    %322 = vector.extract_strided_slice %1 {offsets = [0, 3], sizes = [2, 1], strides = [1, 1]} : vector<2x8xf32> to vector<2x1xf32>
    %323 = vector.extract_strided_slice %11 {offsets = [8, 0], sizes = [2, 256], strides = [1, 1]} : vector<16x512xf32> to vector<2x256xf32>
    %324 = vector.extract_strided_slice %11 {offsets = [6, 256], sizes = [2, 256], strides = [1, 1]} : vector<16x512xf32> to vector<2x256xf32>
    %325 = tpu.concatenate %323, %324 in 1 : vector<2x256xf32>, vector<2x256xf32> -> vector<2x512xf32>
    %326 = tpu.concatenate %293, %305 in 1 : vector<2x64xf32>, vector<2x64xf32> -> vector<2x128xf32>
    %c0_65 = arith.constant 0 : index
    %c0_66 = arith.constant 0 : index
    %327 = vector.load %arg7[%c0_65, %c0_66] : memref<128x512xf32, #tpu.memory_space<vmem>>, vector<128x512xf32>
    %cst_67 = arith.constant dense<0.000000e+00> : vector<2x512xf32>
    %328 = tpu.matmul %326, %327, %cst_67 {dimension_numbers = #tpu.dot_dimension_numbers<[1], [0], [0], [1], [0, 0, 1, 1], [], []>} : vector<2x128xf32>, vector<128x512xf32>, vector<2x512xf32> -> vector<2x512xf32>
    %329 = arith.addf %325, %328 : vector<2x512xf32>
    %330 = vector.extract_strided_slice %329 {offsets = [0, 0], sizes = [2, 192], strides = [1, 1]} : vector<2x512xf32> to vector<2x192xf32>
    %331 = arith.negf %330 : vector<2x192xf32>
    %332 = math.exp %331 : vector<2x192xf32>
    %cst_68 = arith.constant 1.000000e+00 : f32
    %333 = vector.broadcast %cst_68 : f32 to vector<2x192xf32>
    %334 = arith.addf %333, %332 : vector<2x192xf32>
    %335 = arith.divf %333, %334 : vector<2x192xf32>
    %336 = vector.extract_strided_slice %329 {offsets = [0, 192], sizes = [2, 64], strides = [1, 1]} : vector<2x512xf32> to vector<2x64xf32>
    %337 = math.tanh %336 : vector<2x64xf32>
    %338 = vector.extract_strided_slice %329 {offsets = [0, 256], sizes = [2, 192], strides = [1, 1]} : vector<2x512xf32> to vector<2x192xf32>
    %339 = arith.negf %338 : vector<2x192xf32>
    %340 = math.exp %339 : vector<2x192xf32>
    %cst_69 = arith.constant 1.000000e+00 : f32
    %341 = vector.broadcast %cst_69 : f32 to vector<2x192xf32>
    %342 = arith.addf %341, %340 : vector<2x192xf32>
    %343 = arith.divf %341, %342 : vector<2x192xf32>
    %344 = vector.extract_strided_slice %329 {offsets = [0, 448], sizes = [2, 64], strides = [1, 1]} : vector<2x512xf32> to vector<2x64xf32>
    %345 = math.tanh %344 : vector<2x64xf32>
    %346 = vector.extract_strided_slice %335 {offsets = [0, 64], sizes = [2, 64], strides = [1, 1]} : vector<2x192xf32> to vector<2x64xf32>
    %347 = arith.mulf %346, %300 : vector<2x64xf32>
    %348 = vector.extract_strided_slice %335 {offsets = [0, 0], sizes = [2, 64], strides = [1, 1]} : vector<2x192xf32> to vector<2x64xf32>
    %349 = arith.mulf %348, %337 : vector<2x64xf32>
    %350 = arith.addf %347, %349 : vector<2x64xf32>
    %351 = vector.extract_strided_slice %335 {offsets = [0, 128], sizes = [2, 64], strides = [1, 1]} : vector<2x192xf32> to vector<2x64xf32>
    %352 = math.tanh %350 : vector<2x64xf32>
    %353 = arith.mulf %351, %352 : vector<2x64xf32>
    %354 = vector.extract_strided_slice %343 {offsets = [0, 64], sizes = [2, 64], strides = [1, 1]} : vector<2x192xf32> to vector<2x64xf32>
    %355 = arith.mulf %354, %312 : vector<2x64xf32>
    %356 = vector.extract_strided_slice %343 {offsets = [0, 0], sizes = [2, 64], strides = [1, 1]} : vector<2x192xf32> to vector<2x64xf32>
    %357 = arith.mulf %356, %345 : vector<2x64xf32>
    %358 = arith.addf %355, %357 : vector<2x64xf32>
    %359 = vector.extract_strided_slice %343 {offsets = [0, 128], sizes = [2, 64], strides = [1, 1]} : vector<2x192xf32> to vector<2x64xf32>
    %360 = math.tanh %358 : vector<2x64xf32>
    %361 = arith.mulf %359, %360 : vector<2x64xf32>
    %362 = vector.broadcast %321 : vector<2x1xf32> to vector<2x64xf32>
    %363 = arith.mulf %362, %353 : vector<2x64xf32>
    %364 = vector.broadcast %322 : vector<2x1xf32> to vector<2x64xf32>
    %365 = arith.mulf %364, %361 : vector<2x64xf32>
    %cst_70 = arith.constant 1.000000e+00 : f32
    %366 = vector.broadcast %cst_70 : f32 to vector<2x1xf32>
    %367 = arith.subf %366, %321 : vector<2x1xf32>
    %368 = vector.broadcast %367 : vector<2x1xf32> to vector<2x64xf32>
    %369 = arith.mulf %368, %293 : vector<2x64xf32>
    %370 = arith.addf %363, %369 : vector<2x64xf32>
    %371 = vector.broadcast %321 : vector<2x1xf32> to vector<2x64xf32>
    %372 = arith.mulf %371, %350 : vector<2x64xf32>
    %cst_71 = arith.constant 1.000000e+00 : f32
    %373 = vector.broadcast %cst_71 : f32 to vector<2x1xf32>
    %374 = arith.subf %373, %321 : vector<2x1xf32>
    %375 = vector.broadcast %374 : vector<2x1xf32> to vector<2x64xf32>
    %376 = arith.mulf %375, %300 : vector<2x64xf32>
    %377 = arith.addf %372, %376 : vector<2x64xf32>
    %cst_72 = arith.constant 1.000000e+00 : f32
    %378 = vector.broadcast %cst_72 : f32 to vector<2x1xf32>
    %379 = arith.subf %378, %322 : vector<2x1xf32>
    %380 = vector.broadcast %379 : vector<2x1xf32> to vector<2x64xf32>
    %381 = arith.mulf %380, %305 : vector<2x64xf32>
    %382 = arith.addf %365, %381 : vector<2x64xf32>
    %383 = vector.broadcast %322 : vector<2x1xf32> to vector<2x64xf32>
    %384 = arith.mulf %383, %358 : vector<2x64xf32>
    %cst_73 = arith.constant 1.000000e+00 : f32
    %385 = vector.broadcast %cst_73 : f32 to vector<2x1xf32>
    %386 = arith.subf %385, %322 : vector<2x1xf32>
    %387 = vector.broadcast %386 : vector<2x1xf32> to vector<2x64xf32>
    %388 = arith.mulf %387, %312 : vector<2x64xf32>
    %389 = arith.addf %384, %388 : vector<2x64xf32>
    %390 = vector.extract_strided_slice %363 {offsets = [0, 0], sizes = [1, 64], strides = [1, 1]} : vector<2x64xf32> to vector<1x64xf32>
    %c4_74 = arith.constant 4 : index
    %c0_75 = arith.constant 0 : index
    %391 = vector.load %arg14[%c4_74, %c0_75] : memref<16x128xf32, #tpu.memory_space<vmem>>, vector<1x64xf32>
    tpu.vector_store %arg14[%c4_74, %c0_75], %390 {strides = array<i32>} : memref<16x128xf32, #tpu.memory_space<vmem>>, vector<1x64xf32>,
    %392 = vector.extract_strided_slice %365 {offsets = [0, 0], sizes = [1, 64], strides = [1, 1]} : vector<2x64xf32> to vector<1x64xf32>
    %c3_76 = arith.constant 3 : index
    %c64_77 = arith.constant 64 : index
    %393 = vector.load %arg14[%c3_76, %c64_77] : memref<16x128xf32, #tpu.memory_space<vmem>>, vector<1x64xf32>
    tpu.vector_store %arg14[%c3_76, %c64_77], %392 {strides = array<i32>} : memref<16x128xf32, #tpu.memory_space<vmem>>, vector<1x64xf32>,
    %394 = vector.extract_strided_slice %363 {offsets = [1, 0], sizes = [1, 64], strides = [1, 1]} : vector<2x64xf32> to vector<1x64xf32>
    %c12_78 = arith.constant 12 : index
    %c0_79 = arith.constant 0 : index
    %395 = vector.load %arg14[%c12_78, %c0_79] : memref<16x128xf32, #tpu.memory_space<vmem>>, vector<1x64xf32>
    tpu.vector_store %arg14[%c12_78, %c0_79], %394 {strides = array<i32>} : memref<16x128xf32, #tpu.memory_space<vmem>>, vector<1x64xf32>,
    %396 = vector.extract_strided_slice %365 {offsets = [1, 0], sizes = [1, 64], strides = [1, 1]} : vector<2x64xf32> to vector<1x64xf32>
    %c11_80 = arith.constant 11 : index
    %c64_81 = arith.constant 64 : index
    %397 = vector.load %arg14[%c11_80, %c64_81] : memref<16x128xf32, #tpu.memory_space<vmem>>, vector<1x64xf32>
    tpu.vector_store %arg14[%c11_80, %c64_81], %396 {strides = array<i32>} : memref<16x128xf32, #tpu.memory_space<vmem>>, vector<1x64xf32>,
    %398 = vector.extract_strided_slice %1 {offsets = [0, 5], sizes = [2, 1], strides = [1, 1]} : vector<2x8xf32> to vector<2x1xf32>
    %399 = vector.extract_strided_slice %1 {offsets = [0, 2], sizes = [2, 1], strides = [1, 1]} : vector<2x8xf32> to vector<2x1xf32>
    %400 = vector.extract_strided_slice %11 {offsets = [10, 0], sizes = [2, 256], strides = [1, 1]} : vector<16x512xf32> to vector<2x256xf32>
    %401 = vector.extract_strided_slice %11 {offsets = [4, 256], sizes = [2, 256], strides = [1, 1]} : vector<16x512xf32> to vector<2x256xf32>
    %402 = tpu.concatenate %400, %401 in 1 : vector<2x256xf32>, vector<2x256xf32> -> vector<2x512xf32>
    %403 = tpu.concatenate %370, %382 in 1 : vector<2x64xf32>, vector<2x64xf32> -> vector<2x128xf32>
    %c0_82 = arith.constant 0 : index
    %c0_83 = arith.constant 0 : index
    %404 = vector.load %arg7[%c0_82, %c0_83] : memref<128x512xf32, #tpu.memory_space<vmem>>, vector<128x512xf32>
    %cst_84 = arith.constant dense<0.000000e+00> : vector<2x512xf32>
    %405 = tpu.matmul %403, %404, %cst_84 {dimension_numbers = #tpu.dot_dimension_numbers<[1], [0], [0], [1], [0, 0, 1, 1], [], []>} : vector<2x128xf32>, vector<128x512xf32>, vector<2x512xf32> -> vector<2x512xf32>
    %406 = arith.addf %402, %405 : vector<2x512xf32>
    %407 = vector.extract_strided_slice %406 {offsets = [0, 0], sizes = [2, 192], strides = [1, 1]} : vector<2x512xf32> to vector<2x192xf32>
    %408 = arith.negf %407 : vector<2x192xf32>
    %409 = math.exp %408 : vector<2x192xf32>
    %cst_85 = arith.constant 1.000000e+00 : f32
    %410 = vector.broadcast %cst_85 : f32 to vector<2x192xf32>
    %411 = arith.addf %410, %409 : vector<2x192xf32>
    %412 = arith.divf %410, %411 : vector<2x192xf32>
    %413 = vector.extract_strided_slice %406 {offsets = [0, 192], sizes = [2, 64], strides = [1, 1]} : vector<2x512xf32> to vector<2x64xf32>
    %414 = math.tanh %413 : vector<2x64xf32>
    %415 = vector.extract_strided_slice %406 {offsets = [0, 256], sizes = [2, 192], strides = [1, 1]} : vector<2x512xf32> to vector<2x192xf32>
    %416 = arith.negf %415 : vector<2x192xf32>
    %417 = math.exp %416 : vector<2x192xf32>
    %cst_86 = arith.constant 1.000000e+00 : f32
    %418 = vector.broadcast %cst_86 : f32 to vector<2x192xf32>
    %419 = arith.addf %418, %417 : vector<2x192xf32>
    %420 = arith.divf %418, %419 : vector<2x192xf32>
    %421 = vector.extract_strided_slice %406 {offsets = [0, 448], sizes = [2, 64], strides = [1, 1]} : vector<2x512xf32> to vector<2x64xf32>
    %422 = math.tanh %421 : vector<2x64xf32>
    %423 = vector.extract_strided_slice %412 {offsets = [0, 64], sizes = [2, 64], strides = [1, 1]} : vector<2x192xf32> to vector<2x64xf32>
    %424 = arith.mulf %423, %377 : vector<2x64xf32>
    %425 = vector.extract_strided_slice %412 {offsets = [0, 0], sizes = [2, 64], strides = [1, 1]} : vector<2x192xf32> to vector<2x64xf32>
    %426 = arith.mulf %425, %414 : vector<2x64xf32>
    %427 = arith.addf %424, %426 : vector<2x64xf32>
    %428 = vector.extract_strided_slice %412 {offsets = [0, 128], sizes = [2, 64], strides = [1, 1]} : vector<2x192xf32> to vector<2x64xf32>
    %429 = math.tanh %427 : vector<2x64xf32>
    %430 = arith.mulf %428, %429 : vector<2x64xf32>
    %431 = vector.extract_strided_slice %420 {offsets = [0, 64], sizes = [2, 64], strides = [1, 1]} : vector<2x192xf32> to vector<2x64xf32>
    %432 = arith.mulf %431, %389 : vector<2x64xf32>
    %433 = vector.extract_strided_slice %420 {offsets = [0, 0], sizes = [2, 64], strides = [1, 1]} : vector<2x192xf32> to vector<2x64xf32>
    %434 = arith.mulf %433, %422 : vector<2x64xf32>
    %435 = arith.addf %432, %434 : vector<2x64xf32>
    %436 = vector.extract_strided_slice %420 {offsets = [0, 128], sizes = [2, 64], strides = [1, 1]} : vector<2x192xf32> to vector<2x64xf32>
    %437 = math.tanh %435 : vector<2x64xf32>
    %438 = arith.mulf %436, %437 : vector<2x64xf32>
    %439 = vector.broadcast %398 : vector<2x1xf32> to vector<2x64xf32>
    %440 = arith.mulf %439, %430 : vector<2x64xf32>
    %441 = vector.broadcast %399 : vector<2x1xf32> to vector<2x64xf32>
    %442 = arith.mulf %441, %438 : vector<2x64xf32>
    %cst_87 = arith.constant 1.000000e+00 : f32
    %443 = vector.broadcast %cst_87 : f32 to vector<2x1xf32>
    %444 = arith.subf %443, %398 : vector<2x1xf32>
    %445 = vector.broadcast %444 : vector<2x1xf32> to vector<2x64xf32>
    %446 = arith.mulf %445, %370 : vector<2x64xf32>
    %447 = arith.addf %440, %446 : vector<2x64xf32>
    %448 = vector.broadcast %398 : vector<2x1xf32> to vector<2x64xf32>
    %449 = arith.mulf %448, %427 : vector<2x64xf32>
    %cst_88 = arith.constant 1.000000e+00 : f32
    %450 = vector.broadcast %cst_88 : f32 to vector<2x1xf32>
    %451 = arith.subf %450, %398 : vector<2x1xf32>
    %452 = vector.broadcast %451 : vector<2x1xf32> to vector<2x64xf32>
    %453 = arith.mulf %452, %377 : vector<2x64xf32>
    %454 = arith.addf %449, %453 : vector<2x64xf32>
    %cst_89 = arith.constant 1.000000e+00 : f32
    %455 = vector.broadcast %cst_89 : f32 to vector<2x1xf32>
    %456 = arith.subf %455, %399 : vector<2x1xf32>
    %457 = vector.broadcast %456 : vector<2x1xf32> to vector<2x64xf32>
    %458 = arith.mulf %457, %382 : vector<2x64xf32>
    %459 = arith.addf %442, %458 : vector<2x64xf32>
    %460 = vector.broadcast %399 : vector<2x1xf32> to vector<2x64xf32>
    %461 = arith.mulf %460, %435 : vector<2x64xf32>
    %cst_90 = arith.constant 1.000000e+00 : f32
    %462 = vector.broadcast %cst_90 : f32 to vector<2x1xf32>
    %463 = arith.subf %462, %399 : vector<2x1xf32>
    %464 = vector.broadcast %463 : vector<2x1xf32> to vector<2x64xf32>
    %465 = arith.mulf %464, %389 : vector<2x64xf32>
    %466 = arith.addf %461, %465 : vector<2x64xf32>
    %467 = vector.extract_strided_slice %440 {offsets = [0, 0], sizes = [1, 64], strides = [1, 1]} : vector<2x64xf32> to vector<1x64xf32>
    %c5_91 = arith.constant 5 : index
    %c0_92 = arith.constant 0 : index
    %468 = vector.load %arg14[%c5_91, %c0_92] : memref<16x128xf32, #tpu.memory_space<vmem>>, vector<1x64xf32>
    tpu.vector_store %arg14[%c5_91, %c0_92], %467 {strides = array<i32>} : memref<16x128xf32, #tpu.memory_space<vmem>>, vector<1x64xf32>,
    %469 = vector.extract_strided_slice %442 {offsets = [0, 0], sizes = [1, 64], strides = [1, 1]} : vector<2x64xf32> to vector<1x64xf32>
    %c2_93 = arith.constant 2 : index
    %c64_94 = arith.constant 64 : index
    %470 = vector.load %arg14[%c2_93, %c64_94] : memref<16x128xf32, #tpu.memory_space<vmem>>, vector<1x64xf32>
    tpu.vector_store %arg14[%c2_93, %c64_94], %469 {strides = array<i32>} : memref<16x128xf32, #tpu.memory_space<vmem>>, vector<1x64xf32>,
    %471 = vector.extract_strided_slice %440 {offsets = [1, 0], sizes = [1, 64], strides = [1, 1]} : vector<2x64xf32> to vector<1x64xf32>
    %c13_95 = arith.constant 13 : index
    %c0_96 = arith.constant 0 : index
    %472 = vector.load %arg14[%c13_95, %c0_96] : memref<16x128xf32, #tpu.memory_space<vmem>>, vector<1x64xf32>
    tpu.vector_store %arg14[%c13_95, %c0_96], %471 {strides = array<i32>} : memref<16x128xf32, #tpu.memory_space<vmem>>, vector<1x64xf32>,
    %473 = vector.extract_strided_slice %442 {offsets = [1, 0], sizes = [1, 64], strides = [1, 1]} : vector<2x64xf32> to vector<1x64xf32>
    %c10_97 = arith.constant 10 : index
    %c64_98 = arith.constant 64 : index
    %474 = vector.load %arg14[%c10_97, %c64_98] : memref<16x128xf32, #tpu.memory_space<vmem>>, vector<1x64xf32>
    tpu.vector_store %arg14[%c10_97, %c64_98], %473 {strides = array<i32>} : memref<16x128xf32, #tpu.memory_space<vmem>>, vector<1x64xf32>,
    %475 = vector.extract_strided_slice %1 {offsets = [0, 6], sizes = [2, 1], strides = [1, 1]} : vector<2x8xf32> to vector<2x1xf32>
    %476 = vector.extract_strided_slice %1 {offsets = [0, 1], sizes = [2, 1], strides = [1, 1]} : vector<2x8xf32> to vector<2x1xf32>
    %477 = vector.extract_strided_slice %11 {offsets = [12, 0], sizes = [2, 256], strides = [1, 1]} : vector<16x512xf32> to vector<2x256xf32>
    %478 = vector.extract_strided_slice %11 {offsets = [2, 256], sizes = [2, 256], strides = [1, 1]} : vector<16x512xf32> to vector<2x256xf32>
    %479 = tpu.concatenate %477, %478 in 1 : vector<2x256xf32>, vector<2x256xf32> -> vector<2x512xf32>
    %480 = tpu.concatenate %447, %459 in 1 : vector<2x64xf32>, vector<2x64xf32> -> vector<2x128xf32>
    %c0_99 = arith.constant 0 : index
    %c0_100 = arith.constant 0 : index
    %481 = vector.load %arg7[%c0_99, %c0_100] : memref<128x512xf32, #tpu.memory_space<vmem>>, vector<128x512xf32>
    %cst_101 = arith.constant dense<0.000000e+00> : vector<2x512xf32>
    %482 = tpu.matmul %480, %481, %cst_101 {dimension_numbers = #tpu.dot_dimension_numbers<[1], [0], [0], [1], [0, 0, 1, 1], [], []>} : vector<2x128xf32>, vector<128x512xf32>, vector<2x512xf32> -> vector<2x512xf32>
    %483 = arith.addf %479, %482 : vector<2x512xf32>
    %484 = vector.extract_strided_slice %483 {offsets = [0, 0], sizes = [2, 192], strides = [1, 1]} : vector<2x512xf32> to vector<2x192xf32>
    %485 = arith.negf %484 : vector<2x192xf32>
    %486 = math.exp %485 : vector<2x192xf32>
    %cst_102 = arith.constant 1.000000e+00 : f32
    %487 = vector.broadcast %cst_102 : f32 to vector<2x192xf32>
    %488 = arith.addf %487, %486 : vector<2x192xf32>
    %489 = arith.divf %487, %488 : vector<2x192xf32>
    %490 = vector.extract_strided_slice %483 {offsets = [0, 192], sizes = [2, 64], strides = [1, 1]} : vector<2x512xf32> to vector<2x64xf32>
    %491 = math.tanh %490 : vector<2x64xf32>
    %492 = vector.extract_strided_slice %483 {offsets = [0, 256], sizes = [2, 192], strides = [1, 1]} : vector<2x512xf32> to vector<2x192xf32>
    %493 = arith.negf %492 : vector<2x192xf32>
    %494 = math.exp %493 : vector<2x192xf32>
    %cst_103 = arith.constant 1.000000e+00 : f32
    %495 = vector.broadcast %cst_103 : f32 to vector<2x192xf32>
    %496 = arith.addf %495, %494 : vector<2x192xf32>
    %497 = arith.divf %495, %496 : vector<2x192xf32>
    %498 = vector.extract_strided_slice %483 {offsets = [0, 448], sizes = [2, 64], strides = [1, 1]} : vector<2x512xf32> to vector<2x64xf32>
    %499 = math.tanh %498 : vector<2x64xf32>
    %500 = vector.extract_strided_slice %489 {offsets = [0, 64], sizes = [2, 64], strides = [1, 1]} : vector<2x192xf32> to vector<2x64xf32>
    %501 = arith.mulf %500, %454 : vector<2x64xf32>
    %502 = vector.extract_strided_slice %489 {offsets = [0, 0], sizes = [2, 64], strides = [1, 1]} : vector<2x192xf32> to vector<2x64xf32>
    %503 = arith.mulf %502, %491 : vector<2x64xf32>
    %504 = arith.addf %501, %503 : vector<2x64xf32>
    %505 = vector.extract_strided_slice %489 {offsets = [0, 128], sizes = [2, 64], strides = [1, 1]} : vector<2x192xf32> to vector<2x64xf32>
    %506 = math.tanh %504 : vector<2x64xf32>
    %507 = arith.mulf %505, %506 : vector<2x64xf32>
    %508 = vector.extract_strided_slice %497 {offsets = [0, 64], sizes = [2, 64], strides = [1, 1]} : vector<2x192xf32> to vector<2x64xf32>
    %509 = arith.mulf %508, %466 : vector<2x64xf32>
    %510 = vector.extract_strided_slice %497 {offsets = [0, 0], sizes = [2, 64], strides = [1, 1]} : vector<2x192xf32> to vector<2x64xf32>
    %511 = arith.mulf %510, %499 : vector<2x64xf32>
    %512 = arith.addf %509, %511 : vector<2x64xf32>
    %513 = vector.extract_strided_slice %497 {offsets = [0, 128], sizes = [2, 64], strides = [1, 1]} : vector<2x192xf32> to vector<2x64xf32>
    %514 = math.tanh %512 : vector<2x64xf32>
    %515 = arith.mulf %513, %514 : vector<2x64xf32>
    %516 = vector.broadcast %475 : vector<2x1xf32> to vector<2x64xf32>
    %517 = arith.mulf %516, %507 : vector<2x64xf32>
    %518 = vector.broadcast %476 : vector<2x1xf32> to vector<2x64xf32>
    %519 = arith.mulf %518, %515 : vector<2x64xf32>
    %cst_104 = arith.constant 1.000000e+00 : f32
    %520 = vector.broadcast %cst_104 : f32 to vector<2x1xf32>
    %521 = arith.subf %520, %475 : vector<2x1xf32>
    %522 = vector.broadcast %521 : vector<2x1xf32> to vector<2x64xf32>
    %523 = arith.mulf %522, %447 : vector<2x64xf32>
    %524 = arith.addf %517, %523 : vector<2x64xf32>
    %525 = vector.broadcast %475 : vector<2x1xf32> to vector<2x64xf32>
    %526 = arith.mulf %525, %504 : vector<2x64xf32>
    %cst_105 = arith.constant 1.000000e+00 : f32
    %527 = vector.broadcast %cst_105 : f32 to vector<2x1xf32>
    %528 = arith.subf %527, %475 : vector<2x1xf32>
    %529 = vector.broadcast %528 : vector<2x1xf32> to vector<2x64xf32>
    %530 = arith.mulf %529, %454 : vector<2x64xf32>
    %531 = arith.addf %526, %530 : vector<2x64xf32>
    %cst_106 = arith.constant 1.000000e+00 : f32
    %532 = vector.broadcast %cst_106 : f32 to vector<2x1xf32>
    %533 = arith.subf %532, %476 : vector<2x1xf32>
    %534 = vector.broadcast %533 : vector<2x1xf32> to vector<2x64xf32>
    %535 = arith.mulf %534, %459 : vector<2x64xf32>
    %536 = arith.addf %519, %535 : vector<2x64xf32>
    %537 = vector.broadcast %476 : vector<2x1xf32> to vector<2x64xf32>
    %538 = arith.mulf %537, %512 : vector<2x64xf32>
    %cst_107 = arith.constant 1.000000e+00 : f32
    %539 = vector.broadcast %cst_107 : f32 to vector<2x1xf32>
    %540 = arith.subf %539, %476 : vector<2x1xf32>
    %541 = vector.broadcast %540 : vector<2x1xf32> to vector<2x64xf32>
    %542 = arith.mulf %541, %466 : vector<2x64xf32>
    %543 = arith.addf %538, %542 : vector<2x64xf32>
    %544 = vector.extract_strided_slice %517 {offsets = [0, 0], sizes = [1, 64], strides = [1, 1]} : vector<2x64xf32> to vector<1x64xf32>
    %c6_108 = arith.constant 6 : index
    %c0_109 = arith.constant 0 : index
    %545 = vector.load %arg14[%c6_108, %c0_109] : memref<16x128xf32, #tpu.memory_space<vmem>>, vector<1x64xf32>
    tpu.vector_store %arg14[%c6_108, %c0_109], %544 {strides = array<i32>} : memref<16x128xf32, #tpu.memory_space<vmem>>, vector<1x64xf32>,
    %546 = vector.extract_strided_slice %519 {offsets = [0, 0], sizes = [1, 64], strides = [1, 1]} : vector<2x64xf32> to vector<1x64xf32>
    %c1_110 = arith.constant 1 : index
    %c64_111 = arith.constant 64 : index
    %547 = vector.load %arg14[%c1_110, %c64_111] : memref<16x128xf32, #tpu.memory_space<vmem>>, vector<1x64xf32>
    tpu.vector_store %arg14[%c1_110, %c64_111], %546 {strides = array<i32>} : memref<16x128xf32, #tpu.memory_space<vmem>>, vector<1x64xf32>,
    %548 = vector.extract_strided_slice %517 {offsets = [1, 0], sizes = [1, 64], strides = [1, 1]} : vector<2x64xf32> to vector<1x64xf32>
    %c14_112 = arith.constant 14 : index
    %c0_113 = arith.constant 0 : index
    %549 = vector.load %arg14[%c14_112, %c0_113] : memref<16x128xf32, #tpu.memory_space<vmem>>, vector<1x64xf32>
    tpu.vector_store %arg14[%c14_112, %c0_113], %548 {strides = array<i32>} : memref<16x128xf32, #tpu.memory_space<vmem>>, vector<1x64xf32>,
    %550 = vector.extract_strided_slice %519 {offsets = [1, 0], sizes = [1, 64], strides = [1, 1]} : vector<2x64xf32> to vector<1x64xf32>
    %c9_114 = arith.constant 9 : index
    %c64_115 = arith.constant 64 : index
    %551 = vector.load %arg14[%c9_114, %c64_115] : memref<16x128xf32, #tpu.memory_space<vmem>>, vector<1x64xf32>
    tpu.vector_store %arg14[%c9_114, %c64_115], %550 {strides = array<i32>} : memref<16x128xf32, #tpu.memory_space<vmem>>, vector<1x64xf32>,
    %552 = vector.extract_strided_slice %1 {offsets = [0, 7], sizes = [2, 1], strides = [1, 1]} : vector<2x8xf32> to vector<2x1xf32>
    %553 = vector.extract_strided_slice %1 {offsets = [0, 0], sizes = [2, 1], strides = [1, 1]} : vector<2x8xf32> to vector<2x1xf32>
    %554 = vector.extract_strided_slice %11 {offsets = [14, 0], sizes = [2, 256], strides = [1, 1]} : vector<16x512xf32> to vector<2x256xf32>
    %555 = vector.extract_strided_slice %11 {offsets = [0, 256], sizes = [2, 256], strides = [1, 1]} : vector<16x512xf32> to vector<2x256xf32>
    %556 = tpu.concatenate %554, %555 in 1 : vector<2x256xf32>, vector<2x256xf32> -> vector<2x512xf32>
    %557 = tpu.concatenate %524, %536 in 1 : vector<2x64xf32>, vector<2x64xf32> -> vector<2x128xf32>
    %c0_116 = arith.constant 0 : index
    %c0_117 = arith.constant 0 : index
    %558 = vector.load %arg7[%c0_116, %c0_117] : memref<128x512xf32, #tpu.memory_space<vmem>>, vector<128x512xf32>
    %cst_118 = arith.constant dense<0.000000e+00> : vector<2x512xf32>
    %559 = tpu.matmul %557, %558, %cst_118 {dimension_numbers = #tpu.dot_dimension_numbers<[1], [0], [0], [1], [0, 0, 1, 1], [], []>} : vector<2x128xf32>, vector<128x512xf32>, vector<2x512xf32> -> vector<2x512xf32>
    %560 = arith.addf %556, %559 : vector<2x512xf32>
    %561 = vector.extract_strided_slice %560 {offsets = [0, 0], sizes = [2, 192], strides = [1, 1]} : vector<2x512xf32> to vector<2x192xf32>
    %562 = arith.negf %561 : vector<2x192xf32>
    %563 = math.exp %562 : vector<2x192xf32>
    %cst_119 = arith.constant 1.000000e+00 : f32
    %564 = vector.broadcast %cst_119 : f32 to vector<2x192xf32>
    %565 = arith.addf %564, %563 : vector<2x192xf32>
    %566 = arith.divf %564, %565 : vector<2x192xf32>
    %567 = vector.extract_strided_slice %560 {offsets = [0, 192], sizes = [2, 64], strides = [1, 1]} : vector<2x512xf32> to vector<2x64xf32>
    %568 = math.tanh %567 : vector<2x64xf32>
    %569 = vector.extract_strided_slice %560 {offsets = [0, 256], sizes = [2, 192], strides = [1, 1]} : vector<2x512xf32> to vector<2x192xf32>
    %570 = arith.negf %569 : vector<2x192xf32>
    %571 = math.exp %570 : vector<2x192xf32>
    %cst_120 = arith.constant 1.000000e+00 : f32
    %572 = vector.broadcast %cst_120 : f32 to vector<2x192xf32>
    %573 = arith.addf %572, %571 : vector<2x192xf32>
    %574 = arith.divf %572, %573 : vector<2x192xf32>
    %575 = vector.extract_strided_slice %560 {offsets = [0, 448], sizes = [2, 64], strides = [1, 1]} : vector<2x512xf32> to vector<2x64xf32>
    %576 = math.tanh %575 : vector<2x64xf32>
    %577 = vector.extract_strided_slice %566 {offsets = [0, 64], sizes = [2, 64], strides = [1, 1]} : vector<2x192xf32> to vector<2x64xf32>
    %578 = arith.mulf %577, %531 : vector<2x64xf32>
    %579 = vector.extract_strided_slice %566 {offsets = [0, 0], sizes = [2, 64], strides = [1, 1]} : vector<2x192xf32> to vector<2x64xf32>
    %580 = arith.mulf %579, %568 : vector<2x64xf32>
    %581 = arith.addf %578, %580 : vector<2x64xf32>
    %582 = vector.extract_strided_slice %566 {offsets = [0, 128], sizes = [2, 64], strides = [1, 1]} : vector<2x192xf32> to vector<2x64xf32>
    %583 = math.tanh %581 : vector<2x64xf32>
    %584 = arith.mulf %582, %583 : vector<2x64xf32>
    %585 = vector.extract_strided_slice %574 {offsets = [0, 64], sizes = [2, 64], strides = [1, 1]} : vector<2x192xf32> to vector<2x64xf32>
    %586 = arith.mulf %585, %543 : vector<2x64xf32>
    %587 = vector.extract_strided_slice %574 {offsets = [0, 0], sizes = [2, 64], strides = [1, 1]} : vector<2x192xf32> to vector<2x64xf32>
    %588 = arith.mulf %587, %576 : vector<2x64xf32>
    %589 = arith.addf %586, %588 : vector<2x64xf32>
    %590 = vector.extract_strided_slice %574 {offsets = [0, 128], sizes = [2, 64], strides = [1, 1]} : vector<2x192xf32> to vector<2x64xf32>
    %591 = math.tanh %589 : vector<2x64xf32>
    %592 = arith.mulf %590, %591 : vector<2x64xf32>
    %593 = vector.broadcast %552 : vector<2x1xf32> to vector<2x64xf32>
    %594 = arith.mulf %593, %584 : vector<2x64xf32>
    %595 = vector.broadcast %553 : vector<2x1xf32> to vector<2x64xf32>
    %596 = arith.mulf %595, %592 : vector<2x64xf32>
    %597 = vector.extract_strided_slice %594 {offsets = [0, 0], sizes = [1, 64], strides = [1, 1]} : vector<2x64xf32> to vector<1x64xf32>
    %c7_121 = arith.constant 7 : index
    %c0_122 = arith.constant 0 : index
    %598 = vector.load %arg14[%c7_121, %c0_122] : memref<16x128xf32, #tpu.memory_space<vmem>>, vector<1x64xf32>
    tpu.vector_store %arg14[%c7_121, %c0_122], %597 {strides = array<i32>} : memref<16x128xf32, #tpu.memory_space<vmem>>, vector<1x64xf32>,
    %599 = vector.extract_strided_slice %596 {offsets = [0, 0], sizes = [1, 64], strides = [1, 1]} : vector<2x64xf32> to vector<1x64xf32>
    %c0_123 = arith.constant 0 : index
    %c64_124 = arith.constant 64 : index
    %600 = vector.load %arg14[%c0_123, %c64_124] : memref<16x128xf32, #tpu.memory_space<vmem>>, vector<1x64xf32>
    tpu.vector_store %arg14[%c0_123, %c64_124], %599 {strides = array<i32>} : memref<16x128xf32, #tpu.memory_space<vmem>>, vector<1x64xf32>,
    %601 = vector.extract_strided_slice %594 {offsets = [1, 0], sizes = [1, 64], strides = [1, 1]} : vector<2x64xf32> to vector<1x64xf32>
    %c15_125 = arith.constant 15 : index
    %c0_126 = arith.constant 0 : index
    %602 = vector.load %arg14[%c15_125, %c0_126] : memref<16x128xf32, #tpu.memory_space<vmem>>, vector<1x64xf32>
    tpu.vector_store %arg14[%c15_125, %c0_126], %601 {strides = array<i32>} : memref<16x128xf32, #tpu.memory_space<vmem>>, vector<1x64xf32>,
    %603 = vector.extract_strided_slice %596 {offsets = [1, 0], sizes = [1, 64], strides = [1, 1]} : vector<2x64xf32> to vector<1x64xf32>
    %c8_127 = arith.constant 8 : index
    %c64_128 = arith.constant 64 : index
    %604 = vector.load %arg14[%c8_127, %c64_128] : memref<16x128xf32, #tpu.memory_space<vmem>>, vector<1x64xf32>
    tpu.vector_store %arg14[%c8_127, %c64_128], %603 {strides = array<i32>} : memref<16x128xf32, #tpu.memory_space<vmem>>, vector<1x64xf32>,
    %c0_129 = arith.constant 0 : index
    %c0_130 = arith.constant 0 : index
    %605 = vector.load %arg14[%c0_129, %c0_130] : memref<16x128xf32, #tpu.memory_space<vmem>>, vector<16x128xf32>
    %c0_131 = arith.constant 0 : index
    %c0_132 = arith.constant 0 : index
    %606 = vector.load %arg8[%c0_131, %c0_132] : memref<128x128xf32, #tpu.memory_space<vmem>>, vector<128x128xf32>
    %cst_133 = arith.constant dense<0.000000e+00> : vector<16x128xf32>
    %607 = tpu.matmul %605, %606, %cst_133 {dimension_numbers = #tpu.dot_dimension_numbers<[1], [0], [0], [1], [0, 0, 1, 1], [], []>} : vector<16x128xf32>, vector<128x128xf32>, vector<16x128xf32> -> vector<16x128xf32>
    %c0_134 = arith.constant 0 : index
    %c0_135 = arith.constant 0 : index
    %608 = vector.load %arg9[%c0_134, %c0_135] : memref<1x128xf32, #tpu.memory_space<vmem>>, vector<1x128xf32>
    %609 = vector.broadcast %608 : vector<1x128xf32> to vector<16x128xf32>
    %610 = arith.addf %607, %609 : vector<16x128xf32>
    %611 = arith.negf %610 : vector<16x128xf32>
    %612 = math.exp %611 : vector<16x128xf32>
    %cst_136 = arith.constant 1.000000e+00 : f32
    %613 = vector.broadcast %cst_136 : f32 to vector<16x128xf32>
    %614 = arith.addf %613, %612 : vector<16x128xf32>
    %615 = arith.divf %613, %614 : vector<16x128xf32>
    %616 = arith.mulf %610, %615 : vector<16x128xf32>
    %c0_137 = arith.constant 0 : index
    %c0_138 = arith.constant 0 : index
    %617 = vector.load %arg10[%c0_137, %c0_138] : memref<128x1xf32, #tpu.memory_space<vmem>>, vector<128x1xf32>
    %cst_139 = arith.constant dense<0.000000e+00> : vector<16x1xf32>
    %618 = tpu.matmul %616, %617, %cst_139 {dimension_numbers = #tpu.dot_dimension_numbers<[1], [0], [0], [1], [0, 0, 1, 1], [], []>} : vector<16x128xf32>, vector<128x1xf32>, vector<16x1xf32> -> vector<16x1xf32>
    %619 = vector.extract_strided_slice %618 {offsets = [0, 0], sizes = [8, 1], strides = [1, 1]} : vector<16x1xf32> to vector<8x1xf32>
    %cst_140 = arith.constant dense<0xFF800000> : vector<1xf32>
    %620 = vector.multi_reduction <maximumf>, %619, %cst_140 [0] : vector<8x1xf32> to vector<1xf32>
    %cst_141 = arith.constant 0xFF800000 : f32
    %621 = vector.broadcast %cst_141 : f32 to vector<1xf32>
    %622 = arith.maximumf %621, %620 : vector<1xf32>
    %623 = vector.shape_cast %622 : vector<1xf32> to vector<1x1xf32>
    %624 = vector.broadcast %623 : vector<1x1xf32> to vector<8x1xf32>
    %625 = arith.subf %619, %624 : vector<8x1xf32>
    %626 = math.exp %625 : vector<8x1xf32>
    %cst_142 = arith.constant dense<0.000000e+00> : vector<1xf32>
    %627 = vector.multi_reduction <add>, %626, %cst_142 [0] : vector<8x1xf32> to vector<1xf32>
    %628 = vector.shape_cast %627 : vector<1xf32> to vector<1x1xf32>
    %629 = vector.broadcast %628 : vector<1x1xf32> to vector<8x1xf32>
    %630 = arith.divf %626, %629 : vector<8x1xf32>
    %631 = vector.extract_strided_slice %605 {offsets = [0, 0], sizes = [8, 128], strides = [1, 1]} : vector<16x128xf32> to vector<8x128xf32>
    %cst_143 = arith.constant dense<0.000000e+00> : vector<1x128xf32>
    %632 = tpu.matmul %630, %631, %cst_143 {dimension_numbers = #tpu.dot_dimension_numbers<[0], [0], [1], [1], [0, 1, 1, 1], [], []>} : vector<8x1xf32>, vector<8x128xf32>, vector<1x128xf32> -> vector<1x128xf32>
    %633 = vector.extract_strided_slice %618 {offsets = [8, 0], sizes = [8, 1], strides = [1, 1]} : vector<16x1xf32> to vector<8x1xf32>
    %cst_144 = arith.constant dense<0xFF800000> : vector<1xf32>
    %634 = vector.multi_reduction <maximumf>, %633, %cst_144 [0] : vector<8x1xf32> to vector<1xf32>
    %cst_145 = arith.constant 0xFF800000 : f32
    %635 = vector.broadcast %cst_145 : f32 to vector<1xf32>
    %636 = arith.maximumf %635, %634 : vector<1xf32>
    %637 = vector.shape_cast %636 : vector<1xf32> to vector<1x1xf32>
    %638 = vector.broadcast %637 : vector<1x1xf32> to vector<8x1xf32>
    %639 = arith.subf %633, %638 : vector<8x1xf32>
    %640 = math.exp %639 : vector<8x1xf32>
    %cst_146 = arith.constant dense<0.000000e+00> : vector<1xf32>
    %641 = vector.multi_reduction <add>, %640, %cst_146 [0] : vector<8x1xf32> to vector<1xf32>
    %642 = vector.shape_cast %641 : vector<1xf32> to vector<1x1xf32>
    %643 = vector.broadcast %642 : vector<1x1xf32> to vector<8x1xf32>
    %644 = arith.divf %640, %643 : vector<8x1xf32>
    %645 = vector.extract_strided_slice %605 {offsets = [8, 0], sizes = [8, 128], strides = [1, 1]} : vector<16x128xf32> to vector<8x128xf32>
    %cst_147 = arith.constant dense<0.000000e+00> : vector<1x128xf32>
    %646 = tpu.matmul %644, %645, %cst_147 {dimension_numbers = #tpu.dot_dimension_numbers<[0], [0], [1], [1], [0, 1, 1, 1], [], []>} : vector<8x1xf32>, vector<8x128xf32>, vector<1x128xf32> -> vector<1x128xf32>
    %647 = tpu.concatenate %632, %646 in 0 : vector<1x128xf32>, vector<1x128xf32> -> vector<2x128xf32>
    %c0_148 = arith.constant 0 : index
    %c0_149 = arith.constant 0 : index
    %648 = vector.load %arg11[%c0_148, %c0_149] : memref<128x3xf32, #tpu.memory_space<vmem>>, vector<128x3xf32>
    %cst_150 = arith.constant dense<0.000000e+00> : vector<2x3xf32>
    %649 = tpu.matmul %647, %648, %cst_150 {dimension_numbers = #tpu.dot_dimension_numbers<[1], [0], [0], [1], [0, 0, 1, 1], [], []>} : vector<2x128xf32>, vector<128x3xf32>, vector<2x3xf32> -> vector<2x3xf32>
    %c0_151 = arith.constant 0 : index
    %c0_152 = arith.constant 0 : index
    %650 = vector.load %arg12[%c0_151, %c0_152] : memref<1x3xf32, #tpu.memory_space<vmem>>, vector<1x3xf32>
    %651 = vector.broadcast %650 : vector<1x3xf32> to vector<2x3xf32>
    %652 = arith.addf %649, %651 : vector<2x3xf32>
    %c0_153 = arith.constant 0 : index
    %c0_154 = arith.constant 0 : index
    %653 = vector.load %arg13[%c0_153, %c0_154] : memref<2x3xf32, #tpu.memory_space<vmem>>, vector<2x3xf32>
    tpu.vector_store %arg13[%c0_153, %c0_154], %652 {strides = array<i32>} : memref<2x3xf32, #tpu.memory_space<vmem>>, vector<2x3xf32>,
    return
  }
  func.func @transform_0(%arg0: i32) -> (i32, i32) {
    %c0_i32 = arith.constant 0 : i32
    %c0_i32_0 = arith.constant 0 : i32
    %c0_i32_1 = arith.constant 0 : i32
    return %c0_i32, %c0_i32_0 : i32, i32
  }
  func.func @transform_1(%arg0: i32) -> (i32, i32) {
    %c0_i32 = arith.constant 0 : i32
    %c0_i32_0 = arith.constant 0 : i32
    %c0_i32_1 = arith.constant 0 : i32
    return %c0_i32, %c0_i32_0 : i32, i32
  }
  func.func @transform_2(%arg0: i32) -> (i32, i32) {
    %c0_i32 = arith.constant 0 : i32
    %c0_i32_0 = arith.constant 0 : i32
    %c0_i32_1 = arith.constant 0 : i32
    return %c0_i32, %c0_i32_0 : i32, i32
  }
  func.func @transform_3(%arg0: i32) -> (i32, i32) {
    %c0_i32 = arith.constant 0 : i32
    %c0_i32_0 = arith.constant 0 : i32
    %c0_i32_1 = arith.constant 0 : i32
    return %c0_i32, %c0_i32_0 : i32, i32
  }
  func.func @transform_4(%arg0: i32) -> (i32, i32) {
    %c0_i32 = arith.constant 0 : i32
    %c0_i32_0 = arith.constant 0 : i32
    %c0_i32_1 = arith.constant 0 : i32
    return %c0_i32, %c0_i32_0 : i32, i32
  }
  func.func @transform_5(%arg0: i32) -> (i32, i32) {
    %c0_i32 = arith.constant 0 : i32
    %c0_i32_0 = arith.constant 0 : i32
    %c0_i32_1 = arith.constant 0 : i32
    return %c0_i32, %c0_i32_0 : i32, i32
  }
  func.func @transform_6(%arg0: i32) -> (i32, i32) {
    %c0_i32 = arith.constant 0 : i32
    %c0_i32_0 = arith.constant 0 : i32
    %c0_i32_1 = arith.constant 0 : i32
    return %c0_i32, %c0_i32_0 : i32, i32
  }
  func.func @transform_7(%arg0: i32) -> (i32, i32) {
    %c0_i32 = arith.constant 0 : i32
    %c0_i32_0 = arith.constant 0 : i32
    %c0_i32_1 = arith.constant 0 : i32
    return %c0_i32, %c0_i32_0 : i32, i32
  }
  func.func @transform_8(%arg0: i32) -> (i32, i32) {
    %c0_i32 = arith.constant 0 : i32
    %c0_i32_0 = arith.constant 0 : i32
    %c0_i32_1 = arith.constant 0 : i32
    return %c0_i32, %c0_i32_0 : i32, i32
  }
  func.func @transform_9(%arg0: i32) -> (i32, i32) {
    %c0_i32 = arith.constant 0 : i32
    %c0_i32_0 = arith.constant 0 : i32
    %c0_i32_1 = arith.constant 0 : i32
    return %c0_i32, %c0_i32_0 : i32, i32
  }
  func.func @transform_10(%arg0: i32) -> (i32, i32) {
    %c0_i32 = arith.constant 0 : i32
    %c0_i32_0 = arith.constant 0 : i32
    %c0_i32_1 = arith.constant 0 : i32
    return %c0_i32, %c0_i32_0 : i32, i32
  }
  func.func @transform_11(%arg0: i32) -> (i32, i32) {
    %c0_i32 = arith.constant 0 : i32
    %c0_i32_0 = arith.constant 0 : i32
    %c0_i32_1 = arith.constant 0 : i32
    return %c0_i32, %c0_i32_0 : i32, i32
  }
  func.func @transform_12(%arg0: i32) -> (i32, i32) {
    %c0_i32 = arith.constant 0 : i32
    %c0_i32_0 = arith.constant 0 : i32
    %c0_i32_1 = arith.constant 0 : i32
    return %c0_i32, %c0_i32_0 : i32, i32
  }
}

</mosaic_0001>

<bundles_post_ra>
// kernel: deep_spiro_forward.1
= control target key start
LH: loop header
LB: loop body
LE: loop exit
PB: predicated region body
PF: predicated region fallthrough
CT: control target
= control target key end

     0   :  { %17 = vsyncpa [#allocation4], 0  ;;  %s5667_s0 = inlined_call_operand.vmem [shape: f32[16,32], index: 0, kind: input, shape index: {}]   ;;  %s5668_s1 = inlined_call_operand.hbm [shape: f32[2,8], index: 1, kind: input, shape index: {}]   ;;  %s5669_s2 = inlined_call_operand.vmem [shape: f32[32,64], index: 2, kind: input, shape index: {}]   ;;  %s5670_s3 = inlined_call_operand.hbm [shape: f32[1,64], index: 3, kind: input, shape index: {}]   ;;  %s5671_s4 = inlined_call_operand.vmem [shape: f32[64,512], index: 4, kind: input, shape index: {}]   ;;  %s5672_s5 = inlined_call_operand.vmem [shape: f32[1,512], index: 5, kind: input, shape index: {}]   ;;  %s5673_s6 = inlined_call_operand.hbm [shape: f32[128,512], index: 6, kind: input, shape index: {}]   ;;  %s5674_s7 = inlined_call_operand.hbm [shape: f32[128,128], index: 7, kind: input, shape index: {}]   ;;  %s5675_s8 = inlined_call_operand.hbm [shape: f32[1,128], index: 8, kind: input, shape index: {}]   ;;  %s5676_s9 = inlined_call_operand.vmem [shape: f32[128,1], index: 9, kind: input, shape index: {}]   ;;  %s5677_s10 = inlined_call_operand.vmem [shape: f32[128,3], index: 10, kind: input, shape index: {}]   ;;  %s5678_s11 = inlined_call_operand.hbm [shape: f32[1,3], index: 11, kind: input, shape index: {}]   ;;  %s5679_s12 = inlined_call_operand.hbm [shape: f32[2,3], index: 12, kind: output, shape index: {}]  }
   0x1   :  { %18 = vsyncpa [#allocation7], 0 }
   0x2   :  { %19 = vsyncpa [#allocation10], 0 }
   0x3   :  { %20 = vsyncpa [#allocation13], 0  ;;  %s42_s23 = sshll.u32 %s5670_s3, 4  ;;  %s43_s23 = int_to_ptr.hbm [resolvable:$true] %s42_s23 }
   0x4   :  { %21 = vsyncpa [#allocation5], 0  ;;  %s3746_s24 = smov [#allocation6]   ;;  %s69_s28 = sshll.u32 %s5674_s7, 4  ;;  %s70_s28 = int_to_ptr.hbm [resolvable:$true] %s69_s28 }
   0x5   :  { %s44_s25 = sshll.u32 %s3746_s24, 4  ;;  %s3747_s29 = smov [#allocation9]   ;;  %s45_s25 = int_to_ptr.vmem [resolvable:$true] %s44_s25 }
   0x6   :  { %47 = dma.hbm_to_vmem [thread:$0]  %s43_s23, 16, %s45_s25, [#allocation7]  }
   0x7   :  { %s71_s30 = sshll.u32 %s3747_s29, 4  ;;  %s3748_s13 = smov 128   ;;  %s72_s30 = int_to_ptr.vmem [resolvable:$true] %s71_s30 }
   0x8   :  { %s3749_s14 = smov 8   ;;  %s29_s3 = sshll.u32 %s5668_s1, 4  ;;  %s30_s3 = int_to_ptr.hbm [resolvable:$true] %s29_s3 }
   0x9   :  { %77 = dma.hbm_to_vmem [thread:$0]  %s70_s28, 2048, %s72_s30, [#allocation10], %s3748_s13, %s3748_s13, %s3749_s14  }
   0xa   :  { %s3750_s17 = smov [#allocation3]   ;;  %s56_s7 = sshll.u32 %s5673_s6, 4  ;;  %s57_s7 = int_to_ptr.hbm [resolvable:$true] %s56_s7 }
   0xb   :  { %s31_s18 = sshll.u32 %s3750_s17, 4  ;;  %s3751_s21 = smov [#allocation8]   ;;  %s32_s18 = int_to_ptr.vmem [resolvable:$true] %s31_s18 }
   0xc   :  { %34 = dma.hbm_to_vmem [thread:$0]  %s30_s3, 32, %s32_s18, [#allocation4]  }
   0xd   :  { %s58_s22 = sshll.u32 %s3751_s21, 4  ;;  %s3752_s23 = smov 512   ;;  %s59_s22 = int_to_ptr.vmem [resolvable:$true] %s58_s22 }
   0xe   :  { %s3753_s24 = smov 32   ;;  %s83_s1 = sshll.u32 %s5675_s8, 4  ;;  %s84_s1 = int_to_ptr.hbm [resolvable:$true] %s83_s1 }
   0xf   :  { %64 = dma.hbm_to_vmem [thread:$0]  %s57_s7, 8192, %s59_s22, [#allocation7], %s3752_s23, %s3752_s23, %s3753_s24  }
  0x10   :  { %s3754_s27 = smov [#allocation11]   ;;  %s98_s6 = sshll.u32 %s5678_s11, 4  ;;  %s99_s6 = int_to_ptr.hbm [resolvable:$true] %s98_s6 }
  0x11   :  { %s85_s28 = sshll.u32 %s3754_s27, 4  ;;  %s3755_s13 = smov [#allocation12]   ;;  %s86_s28 = int_to_ptr.vmem [resolvable:$true] %s85_s28 }
  0x12   :  { %88 = dma.hbm_to_vmem [thread:$0]  %s84_s1, 16, %s86_s28, [#allocation10]  }
  0x13   :  { %s100_s14 = sshll.u32 %s3755_s13, 4  ;;  %s101_s14 = int_to_ptr.vmem [resolvable:$true] %s100_s14 }
  0x14   :  { %103 = dma.hbm_to_vmem [thread:$0]  %s99_s6, 16, %s101_s14, [#allocation13]  }
  0x15   :  { %3736 = dma.done.wait [#allocation4], 32  }
  0x16   :  { %3737 = vsyncadd [#allocation4], 4294967264 }
  0x17   :  { %3738 = dma.done.wait [#allocation7], 8208  }
  0x18   :  { %3739 = vsyncadd [#allocation7], 4294959088 }
  0x19   :  { %3740 = dma.done.wait [#allocation10], 2064  }
  0x1a   :  { %3741 = vsyncadd [#allocation10], 4294965232 }
  0x1b   :  { %3742 = dma.done.wait [#allocation13], 16  }
  0x1c   :  { %3743 = vsyncadd [#allocation13], 4294967280  ;;  %v134_v0 = vld [vmem:[%s5669_s2 + $0x18] sm:$0xff]  ;;  %v133_v1 = vld [vmem:[%s5669_s2 + $0x10] sm:$0xff]  ;;  %vm139_vm0 = vcmask 261120   ;;  %vm211_vm1 = vcmask 523264  }
  0x1d   :  { %158 = vmatpush.msra.mxu0 %v134_v0  ;;  %v132_v2 = vld [vmem:[%s5669_s2 + $0x8] sm:$0xff]  ;;  %v199_v4 = vld [vmem:[%s5671_s4 + $0xf0] sm:$0xff]  ;;  %v131_v8 = vld [vmem:[%s5669_s2] sm:$0xff]  ;;  %s3766_s18 = smov [#allocation14]   ;;  %s3260_s21 = sshll.u32 %s5679_s12, 4  ;;  %s3261_s21 = int_to_ptr.hbm [resolvable:$true] %s3260_s21 }
  0x1e   :  { %v198_v3 = vld [vmem:[%s5671_s4 + $0xe8] sm:$0xff]  ;;  %v3865_v5 = vld [vmem:[#allocation8 + $0x1e0] sm:$0xff]  ;;  %272 = vmatpush.msra.mxu3 %v199_v4  ;;  %v128_v11 = vld [vmem:[%s5667_s0] sm:$0xff]  ;;  %s3258_s19 = sshll.u32 %s3766_s18, 4  ;;  %s3259_s19 = int_to_ptr.vmem [resolvable:$true] %s3258_s19 }
  0x1f   :  { %159 = vmatpush.msra.mxu0 %v133_v1  ;;  %249 = vmatpush.msra.mxu2 %v198_v3  ;;  %v194_v6 = vld [vmem:[%s5671_s4 + $0xc8] sm:$0xff]  ;;  %v195_v7 = vld [vmem:[%s5671_s4 + $0xd0] sm:$0xff]  ;;  %v197_v13 = vld [vmem:[%s5671_s4 + $0xe0] sm:$0xff] }
  0x20   :  { %380 = vmatpush.msra.mxu1 %v3865_v5  ;;  %v3877_v9 = vld [vmem:[#allocation8 + $0x1c0] sm:$0xff]  ;;  %v190_v10 = vld [vmem:[%s5671_s4 + $0xa8] sm:$0xff]  ;;  %273 = vmatpush.msra.mxu3 %v195_v7  ;;  %v193_v17 = vld [vmem:[%s5671_s4 + $0xc0] sm:$0xff] }
  0x21   :  { %160 = vmatpush.msra.mxu0 %v132_v2  ;;  %250 = vmatpush.msra.mxu2 %v194_v6  ;;  %v191_v12 = vld [vmem:[%s5671_s4 + $0xb0] sm:$0xff]  ;;  %v186_v15 = vld [vmem:[%s5671_s4 + $0x88] sm:$0xff]  ;;  %v189_v21 = vld [vmem:[%s5671_s4 + $0xa0] sm:$0xff] }
  0x22   :  { %381 = vmatpush.msra.mxu1 %v3877_v9  ;;  %v3892_v14 = vld [vmem:[#allocation8 + $0x1a0] sm:$0xff]  ;;  %274 = vmatpush.msra.mxu3 %v191_v12  ;;  %v182_v19 = vld [vmem:[%s5671_s4 + $0x68] sm:$0xff]  ;;  %v185_v25 = vld [vmem:[%s5671_s4 + $0x80] sm:$0xff]  ;;  %v3756_v12 = vmov 0.0  }
  0x23   :  { %161 = vmatpush.msra.mxu0 %v131_v8  ;;  %251 = vmatpush.msra.mxu2 %v190_v10  ;;  %v187_v16 = vld [vmem:[%s5671_s4 + $0x90] sm:$0xff]  ;;  %v178_v23 = vld [vmem:[%s5671_s4 + $0x48] sm:$0xff]  ;;  %v181_v29 = vld [vmem:[%s5671_s4 + $0x60] sm:$0xff] }
  0x24   :  { %3273 = vmatmul.msk.f32.vlgmr.msra.gmra.mxu0 %vm139_vm0, %v128_v11  ;;  %v3904_v18 = vld [vmem:[#allocation8 + $0x180] sm:$0xff]  ;;  %382 = vmatpush.msra.mxu1 %v3892_v14  ;;  %v129_v27 = vld [vmem:[%s5667_s0 + $0x8] sm:$0xff]  ;;  %v177_v33 = vld [vmem:[%s5671_s4 + $0x40] sm:$0xff] }
  0x25   :  { %226 = vmatpush.msrb.mxu0 %v197_v13  ;;  %v183_v20 = vld [vmem:[%s5671_s4 + $0x70] sm:$0xff]  ;;  %252 = vmatpush.msra.mxu2 %v186_v15  ;;  %v174_v28 = vld [vmem:[%s5671_s4 + $0x28] sm:$0xff]  ;;  %v3958_v36 = vld [vmem:[#allocation8 + $0x1e8] sm:$0xff] }
  0x26   :  { %275 = vmatpush.msra.mxu3 %v187_v16  ;;  %v3916_v22 = vld [vmem:[#allocation8 + $0x160] sm:$0xff]  ;;  %383 = vmatpush.msra.mxu1 %v3904_v18  ;;  %v170_v32 = vld [vmem:[%s5671_s4 + $0x8] sm:$0xff]  ;;  %v173_v37 = vld [vmem:[%s5671_s4 + $0x20] sm:$0xff] }
  0x27   :  { %227 = vmatpush.msrb.mxu0 %v193_v17  ;;  %v179_v24 = vld [vmem:[%s5671_s4 + $0x50] sm:$0xff]  ;;  %253 = vmatpush.msra.mxu2 %v182_v19  ;;  %v3964_v38 = vld [vmem:[#allocation8 + $0x1f0] sm:$0xff]  ;;  %v3971_v41 = vld [vmem:[#allocation8 + $0x1c8] sm:$0xff] }
  0x28   :  { %276 = vmatpush.msra.mxu3 %v183_v20  ;;  %v3928_v26 = vld [vmem:[#allocation8 + $0x140] sm:$0xff]  ;;  %384 = vmatpush.msra.mxu1 %v3916_v22  ;;  %v169_v39 = vld [vmem:[%s5671_s4] sm:$0xff] }
  0x29   :  { %228 = vmatpush.msrb.mxu0 %v189_v21  ;;  %254 = vmatpush.msra.mxu2 %v178_v23  ;;  %v175_v30 = vld [vmem:[%s5671_s4 + $0x30] sm:$0xff]  ;;  %v200_v42 = vld [vmem:[%s5671_s4 + $0xf8] sm:$0xff]  ;;  %v3978_v43 = vld [vmem:[#allocation8 + $0x1d0] sm:$0xff] }
  0x2a   :  { %277 = vmatpush.msra.mxu3 %v179_v24  ;;  %385 = vmatpush.msra.mxu1 %v3928_v26  ;;  %v3944_v31 = vld [vmem:[#allocation8 + $0x120] sm:$0xff]  ;;  %v3985_v45 = vld [vmem:[#allocation8 + $0x1a8] sm:$0xff]  ;;  %v3987_v46 = vld [vmem:[#allocation8 + $0x1b0] sm:$0xff] }
  0x2b   :  { %229 = vmatpush.msrb.mxu0 %v185_v25  ;;  %255 = vmatpush.msra.mxu2 %v174_v28  ;;  %v171_v34 = vld [vmem:[%s5671_s4 + $0x10] sm:$0xff]  ;;  %v196_v47 = vld [vmem:[%s5671_s4 + $0xd8] sm:$0xff]  ;;  %v3998_v50 = vld [vmem:[#allocation8 + $0x190] sm:$0xff] }
  0x2c   :  { %3274 = vmatmul.msk.f32.gmra.mxu0 %vm139_vm0, %v129_v27  ;;  %278 = vmatpush.msra.mxu3 %v175_v30  ;;  %v3956_v35 = vld [vmem:[#allocation8 + $0x100] sm:$0xff]  ;;  %v3996_v49 = vld [vmem:[#allocation8 + $0x188] sm:$0xff]  ;;  %v4010_v54 = vld [vmem:[#allocation8 + $0x170] sm:$0xff] }
  0x2d   :  { %230 = vmatpush.msrb.mxu0 %v181_v29  ;;  %386 = vmatpush.msra.mxu1 %v3944_v31  ;;  %v3969_v40 = vld [vmem:[#allocation8 + $0xe0] sm:$0xff]  ;;  %v4008_v53 = vld [vmem:[#allocation8 + $0x168] sm:$0xff]  ;;  %v4022_v58 = vld [vmem:[#allocation8 + $0x150] sm:$0xff] }
  0x2e   :  { %256 = vmatpush.msra.mxu2 %v170_v32  ;;  %279 = vmatpush.msra.mxu3 %v171_v34  ;;  %v3981_v44 = vld [vmem:[#allocation8 + $0xc0] sm:$0xff]  ;;  %v4020_v57 = vld [vmem:[#allocation8 + $0x148] sm:$0xff]  ;;  %v4039_v63 = vld [vmem:[#allocation8 + $0x130] sm:$0xff] }
  0x2f   :  { %231 = vmatpush.msrb.mxu0 %v177_v33  ;;  %387 = vmatpush.msra.mxu1 %v3956_v35  ;;  %v3993_v48 = vld [vmem:[#allocation8 + $0xa0] sm:$0xff]  ;;  %v4037_v62 = vld [vmem:[#allocation8 + $0x128] sm:$0xff]  ;;  %v4051_v3 = vld [vmem:[#allocation8 + $0x110] sm:$0xff] }
  0x30   :  { %400 = vmatpush.msrb.mxu2 %v3958_v36  ;;  %420 = vmatpush.msrb.mxu3 %v3964_v38  ;;  %v192_v51 = vld [vmem:[%s5671_s4 + $0xb8] sm:$0xff]  ;;  %v4063_v8 = vld [vmem:[#allocation8 + $0xf0] sm:$0xff]  ;;  %v4129_v27 = vld [vmem:[#allocation8 + $0x1d8] sm:$0xff] }
  0x31   :  { %232 = vmatpush.msrb.mxu0 %v173_v37  ;;  %388 = vmatpush.msra.mxu1 %v3969_v40  ;;  %v4005_v52 = vld [vmem:[#allocation8 + $0x80] sm:$0xff]  ;;  %v4049_v2 = vld [vmem:[#allocation8 + $0x108] sm:$0xff]  ;;  %v4069_v11 = vld [vmem:[#allocation8 + $0xd0] sm:$0xff] }
  0x32   :  { %401 = vmatpush.msrb.mxu2 %v3971_v41  ;;  %421 = vmatpush.msrb.mxu3 %v3978_v43  ;;  %v188_v55 = vld [vmem:[%s5671_s4 + $0x98] sm:$0xff]  ;;  %v4078_v15 = vld [vmem:[#allocation8 + $0xb0] sm:$0xff]  ;;  %v4133_v28 = vld [vmem:[#allocation8 + $0x1b8] sm:$0xff] }
  0x33   :  { %233 = vmatpush.msrb.mxu0 %v169_v39  ;;  %389 = vmatpush.msra.mxu1 %v3981_v44  ;;  %v4017_v56 = vld [vmem:[#allocation8 + $0x60] sm:$0xff]  ;;  %v4061_v7 = vld [vmem:[#allocation8 + $0xe8] sm:$0xff]  ;;  %v4083_v17 = vld [vmem:[#allocation8 + $0x90] sm:$0xff] }
  0x34   :  { %402 = vmatpush.msrb.mxu2 %v3985_v45  ;;  %422 = vmatpush.msrb.mxu3 %v3987_v46  ;;  %v184_v59 = vld [vmem:[%s5671_s4 + $0x78] sm:$0xff]  ;;  %v4092_v19 = vld [vmem:[#allocation8 + $0x70] sm:$0xff]  ;;  %v4139_v29 = vld [vmem:[#allocation8 + $0x198] sm:$0xff] }
  0x35   :  { %295 = vmatpush.msra.mxu0 %v200_v42  ;;  %390 = vmatpush.msra.mxu1 %v3993_v48  ;;  %v180_v60 = vld [vmem:[%s5671_s4 + $0x58] sm:$0xff]  ;;  %v4097_v21 = vld [vmem:[#allocation8 + $0x50] sm:$0xff]  ;;  %v4145_v32 = vld [vmem:[#allocation8 + $0x178] sm:$0xff] }
  0x36   :  { %403 = vmatpush.msrb.mxu2 %v3996_v49  ;;  %423 = vmatpush.msrb.mxu3 %v3998_v50  ;;  %v4035_v61 = vld [vmem:[#allocation8 + $0x40] sm:$0xff]  ;;  %v4067_v10 = vld [vmem:[#allocation8 + $0xc8] sm:$0xff]  ;;  %v4111_v24 = vld [vmem:[#allocation8 + $0x10] sm:$0xff] }
  0x37   :  { %296 = vmatpush.msra.mxu0 %v196_v47  ;;  %391 = vmatpush.msra.mxu1 %v4005_v52  ;;  %v176_v0 = vld [vmem:[%s5671_s4 + $0x38] sm:$0xff]  ;;  %v359_v33 = vld [vmem:[#allocation8 + $0x158] sm:$0xff] }
  0x38   :  { %404 = vmatpush.msrb.mxu2 %v4008_v53  ;;  %424 = vmatpush.msrb.mxu3 %v4010_v54  ;;  %v4047_v1 = vld [vmem:[#allocation8 + $0x20] sm:$0xff]  ;;  %v4076_v13 = vld [vmem:[#allocation8 + $0xa8] sm:$0xff]  ;;  %v355_v34 = vld [vmem:[#allocation8 + $0x138] sm:$0xff] }
  0x39   :  { %297 = vmatpush.msra.mxu0 %v192_v51  ;;  %392 = vmatpush.msra.mxu1 %v4017_v56  ;;  %v172_v4 = vld [vmem:[%s5671_s4 + $0x18] sm:$0xff]  ;;  %v343_v37 = vld [vmem:[#allocation8 + $0xd8] sm:$0xff] }
  0x3a   :  { %405 = vmatpush.msrb.mxu2 %v4020_v57  ;;  %425 = vmatpush.msrb.mxu3 %v4022_v58  ;;  %v4059_v6 = vld [vmem:[#allocation8] sm:$0xff]  ;;  %v4081_v16 = vld [vmem:[#allocation8 + $0x88] sm:$0xff]  ;;  %v335_v39 = vld [vmem:[#allocation8 + $0x98] sm:$0xff] }
  0x3b   :  { %298 = vmatpush.msra.mxu0 %v188_v55  ;;  %393 = vmatpush.msra.mxu1 %v4035_v61  ;;  %v4095_v20 = vld [vmem:[#allocation8 + $0x48] sm:$0xff]  ;;  %v323_v42 = vld [vmem:[#allocation8 + $0x38] sm:$0xff] }
  0x3c   :  { %406 = vmatpush.msrb.mxu2 %v4037_v62  ;;  %426 = vmatpush.msrb.mxu3 %v4039_v63  ;;  %v4108_v23 = vld [vmem:[#allocation8 + $0x8] sm:$0xff] }
  0x3d   :  { %299 = vmatpush.msra.mxu0 %v184_v59  ;;  %394 = vmatpush.msra.mxu1 %v4047_v1 }
  0x3e   :  { %407 = vmatpush.msrb.mxu2 %v4049_v2  ;;  %427 = vmatpush.msrb.mxu3 %v4051_v3 }
  0x3f   :  { %300 = vmatpush.msra.mxu0 %v180_v60  ;;  %395 = vmatpush.msra.mxu1 %v4059_v6 }
  0x40   :  { %408 = vmatpush.msrb.mxu2 %v4061_v7  ;;  %428 = vmatpush.msrb.mxu3 %v4063_v8 }
  0x41   :  { %301 = vmatpush.msra.mxu0 %v176_v0  ;;  %396 = vmatmul.f32.vlgmr.msra.gmra.mxu1 %v3756_v12 }
  0x42   :  { %409 = vmatpush.msrb.mxu2 %v4067_v10  ;;  %690 = vmatpush.msrb.mxu1 %v3865_v5  ;;  %v4090_v5 = vld [vmem:[#allocation8 + $0x68] sm:$0xff] }
  0x43   :  { %302 = vmatpush.msra.mxu0 %v172_v4  ;;  %429 = vmatpush.msrb.mxu3 %v4069_v11 }
  0x44   :  { %410 = vmatpush.msrb.mxu2 %v4076_v13  ;;  %691 = vmatpush.msrb.mxu1 %v3877_v9  ;;  %v4101_v9 = vld [vmem:[#allocation8 + $0x28] sm:$0xff] }
  0x45   :  { %430 = vmatpush.msrb.mxu3 %v4078_v15 }
  0x46   :  { %411 = vmatpush.msrb.mxu2 %v4081_v16  ;;  %692 = vmatpush.msrb.mxu1 %v3892_v14  ;;  %v4104_v14 = vld [vmem:[#allocation8 + $0x30] sm:$0xff] }
  0x47   :  { %431 = vmatpush.msrb.mxu3 %v4083_v17 }
  0x48   :  { %412 = vmatpush.msrb.mxu2 %v4090_v5  ;;  %693 = vmatpush.msrb.mxu1 %v3904_v18  ;;  %v3356_v18 = vld [vmem:[#allocation6] ss:$0 sm:$0xff] }
  0x49   :  { %432 = vmatpush.msrb.mxu3 %v4092_v19 }
  0x4a   :  { %413 = vmatpush.msrb.mxu2 %v4095_v20  ;;  %694 = vmatpush.msrb.mxu1 %v3916_v22 }
  0x4b   :  { %433 = vmatpush.msrb.mxu3 %v4097_v21 }
  0x4c   :  { %414 = vmatpush.msrb.mxu2 %v4101_v9  ;;  %695 = vmatpush.msrb.mxu1 %v3928_v26  ;;  %v4124_v26 = vld [vmem:[#allocation8 + $0x1f8] sm:$0xff] }
  0x4d   :  { %434 = vmatpush.msrb.mxu3 %v4104_v14 }
  0x4e   :  { %415 = vmatpush.msrb.mxu2 %v4108_v23  ;;  %696 = vmatpush.msrb.mxu1 %v3944_v31 }
  0x4f   :  { %435 = vmatpush.msrb.mxu3 %v4111_v24 }
  0x50   :  { %697 = vmatpush.msrb.mxu1 %v3956_v35  ;;  %v351_v35 = vld [vmem:[#allocation8 + $0x118] sm:$0xff] }
  0x52   :  { %698 = vmatpush.msrb.mxu1 %v3969_v40  ;;  %v331_v40 = vld [vmem:[#allocation8 + $0x78] sm:$0xff] }
  0x54   :  { %699 = vmatpush.msrb.mxu1 %v3981_v44 }
  0x56   :  { %700 = vmatpush.msrb.mxu1 %v3993_v48 }
  0x58   :  { %701 = vmatpush.msrb.mxu1 %v4005_v52 }
  0x5a   :  { %702 = vmatpush.msrb.mxu1 %v4017_v56 }
  0x5c   :  { %703 = vmatpush.msrb.mxu1 %v4035_v61 }
  0x5e   :  { %704 = vmatpush.msrb.mxu1 %v4047_v1 }
  0x60   :  { %705 = vmatpush.msrb.mxu1 %v4059_v6 }
  0xa1   :  { %v163_v22 = vpop.f32.mrf.mxu0 }
  0xa2   :  { %v164_v25 = vadd.f32 %v3356_v18, %v163_v22 }
  0xa4   :  { %3275 = vmatmul.msk.f32.vlgmr.msrb.gmra.mxu0 %vm211_vm1, %v164_v25  ;;  %3277 = vmatmul.msk.f32.vlgmr.msra.gmra.mxu2 %vm211_vm1, %v164_v25 }
  0xa5   :  { %3279 = vmatmul.msk.f32.vlgmr.msra.gmra.mxu3 %vm211_vm1, %v164_v25  ;;  %440 = vmatpush.msrb.mxu0 %v4124_v26 }
  0xa6   :  { %710 = vmatpush.msra.mxu2 %v3958_v36  ;;  %730 = vmatpush.msra.mxu3 %v3964_v38  ;;  %v347_v36 = vld [vmem:[#allocation8 + $0xf8] sm:$0xff] }
  0xa7   :  { %441 = vmatpush.msrb.mxu0 %v4129_v27  ;;  %v339_v38 = vld [vmem:[#allocation8 + $0xb8] sm:$0xff] }
  0xa8   :  { %711 = vmatpush.msra.mxu2 %v3971_v41  ;;  %731 = vmatpush.msra.mxu3 %v3978_v43  ;;  %v327_v41 = vld [vmem:[#allocation8 + $0x58] sm:$0xff] }
  0xa9   :  { %v166_v30 = vpop.f32.mrf.mxu0  ;;  %442 = vmatpush.msrb.mxu0 %v4133_v28  ;;  %v319_v43 = vld [vmem:[#allocation8 + $0x18] sm:$0xff] }
  0xaa   :  { %v167_v31 = vadd.f32 %v3356_v18, %v166_v30  ;;  %712 = vmatpush.msra.mxu2 %v3985_v45  ;;  %732 = vmatpush.msra.mxu3 %v3987_v46  ;;  %v201_v45 = vld [vmem:[%s5672_s5] sm:$0xf]  ;;  %s3757_s5 = smov 64  }
  0xab   :  { %443 = vmatpush.msrb.mxu0 %v4139_v29  ;;  %v205_v46 = vperm.slane %v201_v45, 2  ;;  %v203_v48 = vperm.slane %v201_v45, 0 }
  0xac   :  { %3276 = vmatmul.msk.f32.gmra.mxu0 %vm211_vm1, %v167_v31  ;;  %3278 = vmatmul.msk.f32.gmra.mxu2 %vm211_vm1, %v167_v31 }
  0xad   :  { %3280 = vmatmul.msk.f32.gmra.mxu3 %vm211_vm1, %v167_v31  ;;  %444 = vmatpush.msrb.mxu0 %v4145_v32 }
  0xae   :  { %713 = vmatpush.msra.mxu2 %v3996_v49  ;;  %733 = vmatpush.msra.mxu3 %v3998_v50 }
  0xaf   :  { %445 = vmatpush.msrb.mxu0 %v359_v33 }
  0xb0   :  { %714 = vmatpush.msra.mxu2 %v4008_v53  ;;  %734 = vmatpush.msra.mxu3 %v4010_v54  ;;  %v204_v53 = vperm.slane %v201_v45, 1  ;;  %v206_v54 = vperm.slane %v201_v45, 3 }
  0xb1   :  { %446 = vmatpush.msrb.mxu0 %v355_v34 }
  0xb2   :  { %715 = vmatpush.msra.mxu2 %v4020_v57  ;;  %735 = vmatpush.msra.mxu3 %v4022_v58 }
  0xb3   :  { %447 = vmatpush.msrb.mxu0 %v351_v35 }
  0xb4   :  { %3281 = vmatmul.msk.f32.vlgmr.msra.gmra.mxu0 %vm211_vm1, %v164_v25  ;;  %416 = vmatmul.f32.vlgmr.msrb.gmra.mxu2 %v3756_v12 }
  0xb5   :  { %436 = vmatmul.f32.vlgmr.msrb.gmra.mxu3 %v3756_v12  ;;  %448 = vmatpush.msrb.mxu0 %v347_v36 }
  0xb6   :  { %716 = vmatpush.msra.mxu2 %v4037_v62  ;;  %736 = vmatpush.msra.mxu3 %v4039_v63 }
  0xb7   :  { %449 = vmatpush.msrb.mxu0 %v343_v37 }
  0xb8   :  { %717 = vmatpush.msra.mxu2 %v4049_v2  ;;  %737 = vmatpush.msra.mxu3 %v4051_v3 }
  0xb9   :  { %450 = vmatpush.msrb.mxu0 %v339_v38 }
  0xba   :  { %718 = vmatpush.msra.mxu2 %v4061_v7  ;;  %738 = vmatpush.msra.mxu3 %v4063_v8 }
  0xbb   :  { %451 = vmatpush.msrb.mxu0 %v335_v39 }
  0xbc   :  { %3282 = vmatmul.msk.f32.gmra.mxu0 %vm211_vm1, %v167_v31  ;;  %719 = vmatpush.msra.mxu2 %v4067_v10 }
  0xbd   :  { %452 = vmatpush.msrb.mxu0 %v331_v40  ;;  %739 = vmatpush.msra.mxu3 %v4069_v11 }
  0xbe   :  { %720 = vmatpush.msra.mxu2 %v4076_v13 }
  0xbf   :  { %453 = vmatpush.msrb.mxu0 %v327_v41  ;;  %740 = vmatpush.msra.mxu3 %v4078_v15  ;;  %v397_v15 = vpop.f32.mrf.mxu1 }
  0xc0   :  { %721 = vmatpush.msra.mxu2 %v4081_v16 }
  0xc1   :  { %454 = vmatpush.msrb.mxu0 %v323_v42  ;;  %741 = vmatpush.msra.mxu3 %v4083_v17 }
  0xc2   :  { %722 = vmatpush.msra.mxu2 %v4090_v5 }
  0xc3   :  { %455 = vmatpush.msrb.mxu0 %v319_v43  ;;  %742 = vmatpush.msra.mxu3 %v4092_v19 }
  0xc4   :  { %456 = vmatmul.f32.vlgmr.msrb.gmra.mxu0 %v3756_v12  ;;  %723 = vmatpush.msra.mxu2 %v4095_v20 }
  0xc5   :  { %750 = vmatpush.msra.mxu0 %v4124_v26  ;;  %743 = vmatpush.msra.mxu3 %v4097_v21 }
  0xc6   :  { %724 = vmatpush.msra.mxu2 %v4101_v9 }
  0xc7   :  { %751 = vmatpush.msra.mxu0 %v4129_v27  ;;  %744 = vmatpush.msra.mxu3 %v4104_v14  ;;  %v4225_v14 = vld [vmem:[#allocation3] sm:$0x3] }
  0xc8   :  { %725 = vmatpush.msra.mxu2 %v4108_v23  ;;  %v3758_v23 = vmov 7  }
  0xc9   :  { %752 = vmatpush.msra.mxu0 %v4133_v28  ;;  %745 = vmatpush.msra.mxu3 %v4111_v24  ;;  %v4228_v24 = vsub.f32 1.0, %v4225_v14 }
  0xca   :  { %3341 = vset.pattern.permute.xlu0 %v3758_v23  ;;  %3340 = vset.pattern.permute.xlu2 %v3758_v23 }
  0xcb   :  { %753 = vmatpush.msra.mxu0 %v4139_v29  ;;  %5762 = vst [vmem:[#allocation28_spill] sm:$0xff] %v4228_v24 }
  0xcd   :  { %754 = vmatpush.msra.mxu0 %v4145_v32 }
  0xcf   :  { %755 = vmatpush.msra.mxu0 %v359_v33 }
  0xd1   :  { %756 = vmatpush.msra.mxu0 %v355_v34 }
  0xd3   :  { %757 = vmatpush.msra.mxu0 %v351_v35 }
  0xd5   :  { %758 = vmatpush.msra.mxu0 %v347_v36 }
  0xd7   :  { %759 = vmatpush.msra.mxu0 %v343_v37 }
  0xd9   :  { %760 = vmatpush.msra.mxu0 %v339_v38 }
  0xdb   :  { %761 = vmatpush.msra.mxu0 %v335_v39 }
  0xdd   :  { %762 = vmatpush.msra.mxu0 %v331_v40 }
  0xdf   :  { %763 = vmatpush.msra.mxu0 %v327_v41 }
  0xe1   :  { %764 = vmatpush.msra.mxu0 %v323_v42 }
  0xe3   :  { %765 = vmatpush.msra.mxu0 %v319_v43 }
 0x121   :  { %v235_v44 = vpop.f32.mrf.mxu0 }
 0x122   :  { %v4222_v12 = vadd.f32 %v235_v44, %v203_v48 }
 0x124   :  { %5761 = vst [vmem:[#allocation27_spill] sm:$0xff] %v4222_v12  ;;  %v460_v16 = vadd.f32 %v397_v15, %v4222_v12 }
 0x126   :  { %v3283_v17 = vmul.f32 -1.442695, %v460_v16 }
 0x127   :  { %v258_v47 = vpop.f32.mrf.mxu2 }
 0x128   :  { %v281_v49 = vpop.f32.mrf.mxu3  ;;  %v4209_v1 = vadd.f32 %v258_v47, %v204_v53 }
 0x129   :  { %v4193_v50 = vadd.f32 %v281_v49, %v205_v46  ;;  %v238_v51 = vpop.f32.mrf.mxu0 }
 0x12a   :  { %v4195_v52 = vadd.f32 %v238_v51, %v203_v48  ;;  %5759 = vst [vmem:[#allocation25_spill] sm:$0xff] %v4209_v1 }
 0x12b   :  { %5754 = vst [vmem:[#allocation20_spill] sm:$0xff] %v4193_v50 }
 0x12c   :  { %5755 = vst [vmem:[#allocation21_spill] sm:$0xff] %v4195_v52  ;;  %v4499_v52 = vld [vmem:[#allocation8 + $0x60] sm:$0xff] }
 0x12d   :  { %5776 = vst [vmem:[#allocation40_spill] sm:$0xff] %v4499_v52 }
 0x12f   :  { %v261_v55 = vpop.f32.mrf.mxu2 }
 0x130   :  { %v4197_v56 = vadd.f32 %v261_v55, %v204_v53  ;;  %v284_v6 = vpop.f32.mrf.mxu3 }
 0x131   :  { %v304_v57 = vpop.f32.mrf.mxu0  ;;  %v4217_v7 = vadd.f32 %v284_v6, %v205_v46  ;;  %v3759_v46 = vmov 0  }
 0x132   :  { %5756 = vst [vmem:[#allocation22_spill] sm:$0xff] %v4197_v56  ;;  %v4199_v58 = vadd.f32 %v304_v57, %v206_v54  ;;  %3343 = vset.pattern.permute.xlu1 %v3759_v46  ;;  %v4503_v56 = vld [vmem:[#allocation8 + $0x68] sm:$0xff] }
 0x133   :  { %5760 = vst [vmem:[#allocation26_spill] sm:$0xff] %v4217_v7  ;;  %v5682_v10 = vrot.slane %v4217_v7, 6 }
 0x134   :  { %5757 = vst [vmem:[#allocation23_spill] sm:$0xff] %v4199_v58  ;;  %v4505_v58 = vld [vmem:[#allocation8 + $0x70] sm:$0xff] }
 0x137   :  { %v417_v0 = vpop.f32.mrf.mxu2 }
 0x138   :  { %v4212_v2 = vadd.f32 %v417_v0, %v4209_v1  ;;  %v437_v8 = vpop.f32.mrf.mxu3 }
 0x139   :  { %v307_v59 = vpop.f32.mrf.mxu0  ;;  %v462_v11 = vadd.f32 %v437_v8, %v5682_v10 }
 0x13a   :  { %v4201_v60 = vadd.f32 %v307_v59, %v206_v54 }
 0x13b   :  { %v3285_v13 = vmul.f32 -1.442695, %v462_v11 }
 0x13c   :  { %5758 = vst [vmem:[#allocation24_spill] sm:$0xff] %v4201_v60  ;;  %v5683_v61 = vrot.slane %v4201_v60, 6 }
 0x141   :  { %v457_v62 = vpop.f32.mrf.mxu0 }
 0x142   :  { %v4206_v63 = vadd.f32 %v457_v62, %v5683_v61  ;;  %v4479_v61 = vld [vmem:[#allocation8 + $0xb0] sm:$0xff] }
 0x144   :  { %3359 = vtanh.f32 %v4206_v63  ;;  %v3286_v59 = vmul.f32 -1.442695, %v4206_v63 }
 0x145   :  { %3361 = vtanh.f32 %v4212_v2 }
 0x146   :  { %3363 = vpow2.f32 %v3285_v13 }
 0x147   :  { %3365 = vpow2.f32 %v3283_v17 }
 0x14a   :  { %v3360_v3 = vpop.eup %3359 }
 0x14b   :  { %561 = vrot.lane.b32.xlu0 %v3360_v3, %s3757_s5  ;;  %v3362_v4 = vpop.eup %3361 }
 0x14c   :  { %v3364_v5 = vpop.eup %3363 }
 0x14d   :  { %v509_v19 = vadd.f32 1.0, %v3364_v5  ;;  %v3366_v20 = vpop.eup %3365 }
 0x14e   :  { %v470_v21 = vadd.f32 1.0, %v3366_v20 }
 0x14f   :  { %3367 = vrcp.f32 %v509_v19  ;;  %v522_v30 = vand.u32 2147483648, %v509_v19  ;;  %vm516_vm3 = vweird.f32 %v509_v19  ;;  %v520_v31 = vand.u32 2147483647, %v509_v19 }
 0x150   :  { %3369 = vrcp.f32 %v470_v21  ;;  %v483_v39 = vand.u32 2147483648, %v470_v21  ;;  %vm477_vm7 = vweird.f32 %v470_v21  ;;  %v481_v40 = vand.u32 2147483647, %v470_v21 }
 0x151   :  { %v523_v34 = vor.u32 1.1754944e-38, %v522_v30  ;;  %vm521_vm5 = vcmp.eq.f32.partialorder %v520_v31, 8.507059e+37 }
 0x152   :  { %v484_v42 = vor.u32 1.1754944e-38, %v483_v39  ;;  %vm482_vm9 = vcmp.eq.f32.partialorder %v481_v40, 8.507059e+37 }
 0x153   :  { %544 = vrot.lane.b32.xlu0 %v3362_v4, %s3757_s5  ;;  %v3284_v4 = vmul.f32 -1.442695, %v4212_v2 }
 0x155   :  { %v3368_v9 = vpop.eup %3367 }
 0x156   :  { %v512_v18 = vmul.f32 %v3368_v9, %v509_v19  ;;  %v3370_v25 = vpop.eup %3369  ;;  %vm517_vm2 = vweird.f32 %v3368_v9 }
 0x157   :  { %v473_v27 = vmul.f32 %v3370_v25, %v470_v21  ;;  %vm518_vm4 = vmor %vm516_vm3, %vm517_vm2  ;;  %vm478_vm6 = vweird.f32 %v3370_v25  ;;  %vm605_vm3 = vcmask 516096  }
 0x158   :  { %v513_v22 = vsub.f32 1.0, %v512_v18  ;;  %vm479_vm8 = vmor %vm477_vm7, %vm478_vm6 }
 0x159   :  { %v474_v29 = vsub.f32 1.0, %v473_v27 }
 0x15a   :  { %v514_v26 = vmul.f32 %v3368_v9, %v513_v22 }
 0x15b   :  { %598 = vperm.xlu0 %3341, %v4228_v24   ;;  %v475_v33 = vmul.f32 %v3370_v25, %v474_v29 }
 0x15c   :  { %v515_v28 = vadd.f32 %v3368_v9, %v514_v26 }
 0x15d   :  { %v476_v38 = vadd.f32 %v3370_v25, %v475_v33 }
 0x15e   :  { %v519_v32 = vsel %vm518_vm4, %v3368_v9, %v515_v28  ;;  %vm613_vm4 = vcmask 517121  }
 0x15f   :  { %v524_v35 = vsel %vm521_vm5, %v523_v34, %v519_v32  ;;  %v480_v41 = vsel %vm479_vm8, %v3370_v25, %v476_v38 }
 0x160   :  { %v485_v44 = vsel %vm482_vm9, %v484_v42, %v480_v41  ;;  %v559_v47 = vmul.f32 0.0, %v524_v35 }
 0x161   :  { %v542_v51 = vmul.f32 0.0, %v485_v44 }
 0x1bd   :  { %v562_v36 = vpop.permute.xlu0 %561 }
 0x1be   :  { %v564_v37 = vmul.f32 %v562_v36, %v524_v35 }
 0x1c0   :  { %566 = vrot.lane.b32.xlu1 %v564_v37, %s3757_s5 }
 0x1c5   :  { %v545_v43 = vpop.permute.xlu0 %544 }
 0x1c6   :  { %v547_v45 = vmul.f32 %v545_v43, %v485_v44 }
 0x1c8   :  { %549 = vrot.lane.b32.xlu1 %v547_v45, %s3757_s5 }
 0x1cd   :  { %v599_v21 = vpop.permute.xlu0 %598 }
 0x1ce   :  { %v4246_v23 = vmul.f32 0.0, %v599_v21 }
 0x232   :  { %v567_v48 = vpop.permute.xlu1 %566 }
 0x233   :  { %v4233_v49 = vadd.f32 %v567_v48, %v559_v47 }
 0x235   :  { %3371 = vtanh.f32 %v4233_v49 }
 0x23a   :  { %v550_v53 = vpop.permute.xlu1 %549 }
 0x23b   :  { %v3372_v54 = vpop.eup %3371  ;;  %v4236_v55 = vadd.f32 %v550_v53, %v542_v51 }
 0x23c   :  { %572 = vrot.lane.b32.xlu2 %v3372_v54, %s3757_s5 }
 0x23d   :  { %3373 = vtanh.f32 %v4236_v55 }
 0x23e   :  { %3375 = vpow2.f32 %v3286_v59 }
 0x243   :  { %v3374_v57 = vpop.eup %3373 }
 0x244   :  { %583 = vperm.xlu2 %3340, %v4225_v14   ;;  %555 = vrot.lane.b32.xlu1 %v3374_v57, %s3757_s5  ;;  %v3376_v62 = vpop.eup %3375 }
 0x245   :  { %v510_v0 = vadd.f32 1.0, %v3376_v62 }
 0x247   :  { %3377 = vrcp.f32 %v510_v0  ;;  %v537_v5 = vand.u32 2147483648, %v510_v0  ;;  %vm531_vm11 = vweird.f32 %v510_v0  ;;  %v535_v19 = vand.u32 2147483647, %v510_v0 }
 0x248   :  { %3379 = vpow2.f32 %v3284_v4 }
 0x249   :  { %v538_v20 = vor.u32 1.1754944e-38, %v537_v5  ;;  %vm536_vm13 = vcmp.eq.f32.partialorder %v535_v19, 8.507059e+37 }
 0x24c   :  { %3342 = vset.pattern.permute.xlu2 %v3759_v46  ;;  %590 = vperm.xlu1 %3343, %v4228_v24   ;;  %v5681_v46 = vrot.slane %v4201_v60, 2 }
 0x24d   :  { %578 = vperm.xlu2 %3342, %v4225_v14   ;;  %v3378_v3 = vpop.eup %3377 }
 0x24e   :  { %v527_v6 = vmul.f32 %v3378_v3, %v510_v0  ;;  %v3380_v13 = vpop.eup %3379  ;;  %vm532_vm10 = vweird.f32 %v3378_v3 }
 0x24f   :  { %v471_v16 = vadd.f32 1.0, %v3380_v13  ;;  %vm533_vm12 = vmor %vm531_vm11, %vm532_vm10 }
 0x250   :  { %v528_v8 = vsub.f32 1.0, %v527_v6 }
 0x251   :  { %3381 = vrcp.f32 %v471_v16  ;;  %v498_v31 = vand.u32 2147483648, %v471_v16  ;;  %vm492_vm15 = vweird.f32 %v471_v16  ;;  %v496_v32 = vand.u32 2147483647, %v471_v16 }
 0x252   :  { %v529_v11 = vmul.f32 %v3378_v3, %v528_v8 }
 0x253   :  { %v499_v34 = vor.u32 1.1754944e-38, %v498_v31  ;;  %vm497_vm2 = vcmp.eq.f32.partialorder %v496_v32, 8.507059e+37 }
 0x254   :  { %v530_v15 = vadd.f32 %v3378_v3, %v529_v11 }
 0x256   :  { %v534_v63 = vsel %vm533_vm12, %v3378_v3, %v530_v15  ;;  %v5680_v3 = vrot.slane %v4217_v7, 2 }
 0x257   :  { %v539_v9 = vsel %vm536_vm13, %v538_v20, %v534_v63  ;;  %v3382_v25 = vpop.eup %3381  ;;  %v3760_v63 = vmov 6  }
 0x258   :  { %v488_v27 = vmul.f32 %v3382_v25, %v471_v16  ;;  %vm493_vm14 = vweird.f32 %v3382_v25  ;;  %3345 = vset.pattern.permute.xlu0 %v3760_v63  ;;  %3344 = vset.pattern.permute.xlu2 %v3760_v63 }
 0x259   :  { %vm494_vm0 = vmor %vm492_vm15, %vm493_vm14 }
 0x25a   :  { %v489_v28 = vsub.f32 1.0, %v488_v27 }
 0x25c   :  { %v490_v29 = vmul.f32 %v3382_v25, %v489_v28 }
 0x25e   :  { %v491_v30 = vadd.f32 %v3382_v25, %v490_v29 }
 0x260   :  { %v495_v33 = vsel %vm494_vm0, %v3382_v25, %v491_v30 }
 0x261   :  { %v500_v35 = vsel %vm497_vm2, %v499_v34, %v495_v33 }
 0x296   :  { %v573_v17 = vpop.permute.xlu2 %572 }
 0x297   :  { %v575_v2 = vmul.f32 %v573_v17, %v539_v9 }
 0x29e   :  { %v4248_v18 = vpop.permute.xlu2 %583 }
 0x29f   :  { %5763 = vst [vmem:[#allocation29_spill] sm:$0xff] %v4248_v18  ;;  %v4251_v22 = vmul.f32 %v4248_v18, %v575_v2 }
 0x2a1   :  { %5764 = vst [vmem:[#allocation30_spill] sm:$0xff] %v4251_v22  ;;  %v4255_v26 = vadd.f32 %v4246_v23, %v4251_v22  ;;  %v4491_v22 = vld [vmem:[#allocation8 + $0x88] sm:$0xff] }
 0x2a3   :  { %622 = vrot.lane.b32.xlu2 %v4255_v26, %s3757_s5 }
 0x2a7   :  { %v4259_v38 = vpop.permute.xlu2 %578 }
 0x2a8   :  { %5765 = vst [vmem:[#allocation31_spill] sm:$0xff] %v4259_v38 }
 0x2b6   :  { %v556_v36 = vpop.permute.xlu1 %555 }
 0x2b7   :  { %v558_v37 = vmul.f32 %v556_v36, %v500_v35 }
 0x2b9   :  { %v581_v39 = vmul.f32 %v4259_v38, %v558_v37 }
 0x2bb   :  { %606 = vst.msk [vmem:[#allocation2] sm:$0x1] %vm605_vm3, %v581_v39 }
 0x2bc   :  { %614 = vst.msk [vmem:[#allocation2 + $0x7] sm:$0x2] %vm613_vm4, %v581_v39 }
 0x2be   :  { %v591_v40 = vpop.permute.xlu1 %590 }
 0x2bf   :  { %v4264_v41 = vmul.f32 0.0, %v591_v40 }
 0x2c1   :  { %v4267_v42 = vadd.f32 %v4264_v41, %v581_v39 }
 0x2fd   :  { %v623_v43 = vpop.permute.xlu2 %622 }
 0x2fe   :  { %v625_v44 = vsel %vm211_vm1, %v4267_v42, %v623_v43 }
 0x2ff   :  { %706 = vmatmul.f32.vlgmr.msrb.gmra.mxu1 %v625_v44  ;;  %726 = vmatmul.f32.vlgmr.msra.gmra.mxu2 %v625_v44 }
 0x300   :  { %746 = vmatmul.f32.vlgmr.msra.gmra.mxu3 %v625_v44  ;;  %766 = vmatmul.f32.vlgmr.msra.gmra.mxu0 %v625_v44 }
 0x37c   :  { %v707_v4 = vpop.f32.mrf.mxu1 }
 0x37d   :  { %v767_v45 = vpop.f32.mrf.mxu0  ;;  %v774_v8 = vrot.slane %v707_v4, 6 }
 0x37e   :  { %v777_v47 = vrot.slane %v767_v45, 6 }
 0x37f   :  { %v782_v13 = vadd.f32 %v774_v8, %v4222_v12  ;;  %v4517_v12 = vld [vmem:[#allocation8 + $0x50] sm:$0xff] }
 0x380   :  { %v4274_v48 = vadd.f32 %v777_v47, %v5681_v46  ;;  %v4471_v46 = vld [vmem:[#allocation8 + $0xa8] sm:$0xff]  ;;  %5777 = vst [vmem:[#allocation41_spill] sm:$0xff] %v4517_v12 }
 0x381   :  { %v3287_v15 = vmul.f32 -1.442695, %v782_v13 }
 0x382   :  { %3383 = vtanh.f32 %v4274_v48  ;;  %v727_v51 = vpop.f32.mrf.mxu2 }
 0x383   :  { %v775_v53 = vrot.slane %v727_v51, 6  ;;  %v747_v62 = vpop.f32.mrf.mxu3 }
 0x384   :  { %v776_v0 = vrot.slane %v747_v62, 6 }
 0x385   :  { %v4278_v54 = vadd.f32 %v775_v53, %v4209_v1  ;;  %v4524_v1 = vld [vmem:[#allocation8 + $0x20] sm:$0xff] }
 0x386   :  { %v784_v6 = vadd.f32 %v776_v0, %v5680_v3  ;;  %v4463_v3 = vld [vmem:[#allocation8 + $0xd8] sm:$0xff]  ;;  %5778 = vst [vmem:[#allocation42_spill] sm:$0xff] %v4524_v1 }
 0x387   :  { %3385 = vtanh.f32 %v4278_v54 }
 0x388   :  { %v3384_v57 = vpop.eup %3383  ;;  %v3289_v11 = vmul.f32 -1.442695, %v784_v6 }
 0x389   :  { %889 = vrot.lane.b32.xlu0 %v3384_v57, %s3757_s5  ;;  %v603_v57 = vmul.f32 %v4248_v18, %v4233_v49  ;;  %v595_v49 = vmul.f32 %v4259_v38, %v4236_v55  ;;  %v4485_v38 = vld [vmem:[#allocation8 + $0xb8] sm:$0xff] }
 0x38a   :  { %3387 = vpow2.f32 %v3289_v11  ;;  %v3761_v11 = vmov 1  }
 0x38b   :  { %3389 = vpow2.f32 %v3287_v15  ;;  %3347 = vset.pattern.permute.xlu1 %v3761_v11 }
 0x38d   :  { %v3386_v59 = vpop.eup %3385 }
 0x38e   :  { %869 = vrot.lane.b32.xlu1 %v3386_v59, %s3757_s5  ;;  %v604_v59 = vadd.f32 %v603_v57, %v4246_v23  ;;  %v4300_v23 = vadd.f32 %v595_v49, %v4264_v41  ;;  %v3290_v41 = vmul.f32 -1.442695, %v4274_v48  ;;  %v4332_v57 = vld [vmem:[#allocation8 + $0x1e0] sm:$0xff]  ;;  %v4358_v49 = vld [vmem:[#allocation8 + $0x1b0] sm:$0xff] }
 0x38f   :  { %1033 = vmatpush.msra.mxu1 %v4332_v57 }
 0x390   :  { %v3388_v16 = vpop.eup %3387  ;;  %v885_v62 = vrot.slane %v604_v59, 6  ;;  %v865_v15 = vrot.slane %v4300_v23, 6 }
 0x391   :  { %v831_v17 = vadd.f32 1.0, %v3388_v16  ;;  %v3390_v5 = vpop.eup %3389 }
 0x392   :  { %v792_v19 = vadd.f32 1.0, %v3390_v5 }
 0x393   :  { %3391 = vrcp.f32 %v831_v17  ;;  %v844_v30 = vand.u32 2147483648, %v831_v17  ;;  %vm838_vm6 = vweird.f32 %v831_v17  ;;  %v842_v32 = vand.u32 2147483647, %v831_v17 }
 0x394   :  { %3393 = vrcp.f32 %v792_v19  ;;  %v805_v36 = vand.u32 2147483648, %v792_v19  ;;  %vm799_vm10 = vweird.f32 %v792_v19  ;;  %v803_v40 = vand.u32 2147483647, %v792_v19 }
 0x395   :  { %v845_v34 = vor.u32 1.1754944e-38, %v844_v30  ;;  %vm843_vm9 = vcmp.eq.f32.partialorder %v842_v32, 8.507059e+37 }
 0x396   :  { %v806_v45 = vor.u32 1.1754944e-38, %v805_v36  ;;  %vm804_vm12 = vcmp.eq.f32.partialorder %v803_v40, 8.507059e+37 }
 0x399   :  { %v3392_v20 = vpop.eup %3391 }
 0x39a   :  { %v834_v21 = vmul.f32 %v3392_v20, %v831_v17  ;;  %v3394_v9 = vpop.eup %3393  ;;  %vm839_vm5 = vweird.f32 %v3392_v20 }
 0x39b   :  { %v795_v25 = vmul.f32 %v3394_v9, %v792_v19  ;;  %vm840_vm7 = vmor %vm838_vm6, %vm839_vm5  ;;  %vm800_vm8 = vweird.f32 %v3394_v9 }
 0x39c   :  { %v835_v2 = vsub.f32 1.0, %v834_v21  ;;  %vm801_vm11 = vmor %vm799_vm10, %vm800_vm8 }
 0x39d   :  { %v796_v28 = vsub.f32 1.0, %v795_v25  ;;  %v3288_v25 = vmul.f32 -1.442695, %v4278_v54 }
 0x39e   :  { %v836_v27 = vmul.f32 %v3392_v20, %v835_v2 }
 0x39f   :  { %v797_v31 = vmul.f32 %v3394_v9, %v796_v28 }
 0x3a0   :  { %v837_v29 = vadd.f32 %v3392_v20, %v836_v27 }
 0x3a1   :  { %v798_v35 = vadd.f32 %v3394_v9, %v797_v31 }
 0x3a2   :  { %v841_v33 = vsel %vm840_vm7, %v3392_v20, %v837_v29 }
 0x3a3   :  { %v846_v39 = vsel %vm843_vm9, %v845_v34, %v841_v33  ;;  %v802_v44 = vsel %vm801_vm11, %v3394_v9, %v798_v35 }
 0x3a4   :  { %v807_v51 = vsel %vm804_vm12, %v806_v45, %v802_v44  ;;  %v887_v0 = vmul.f32 %v885_v62, %v846_v39  ;;  %v4340_v62 = vld [vmem:[#allocation8 + $0x1f8] sm:$0xff] }
 0x3a5   :  { %v867_v16 = vmul.f32 %v865_v15, %v807_v51  ;;  %1093 = vmatpush.msrb.mxu0 %v4340_v62  ;;  %v4360_v15 = vld [vmem:[#allocation8 + $0x1b8] sm:$0xff] }
 0x3fb   :  { %v890_v37 = vpop.permute.xlu0 %889 }
 0x3fc   :  { %v892_v43 = vmul.f32 %v890_v37, %v846_v39 }
 0x3fe   :  { %894 = vrot.lane.b32.xlu2 %v892_v43, %s3757_s5 }
 0x400   :  { %v870_v47 = vpop.permute.xlu1 %869 }
 0x401   :  { %v872_v53 = vmul.f32 %v870_v47, %v807_v51 }
 0x403   :  { %874 = vrot.lane.b32.xlu0 %v872_v53, %s3757_s5 }
 0x406   :  { %913 = vperm.xlu2 %3344, %v4225_v14  }
 0x40b   :  { %939 = vperm.xlu0 %3345, %v4228_v24  }
 0x40e   :  { %3346 = vset.pattern.permute.xlu2 %v3761_v11  ;;  %v4352_v11 = vld [vmem:[#allocation8 + $0x1a0] sm:$0xff] }
 0x40f   :  { %905 = vperm.xlu2 %3346, %v4225_v14  }
 0x458   :  { %v895_v4 = vpop.permute.xlu2 %894 }
 0x459   :  { %v897_v6 = vadd.f32 %v895_v4, %v887_v0  ;;  %v4342_v0 = vld [vmem:[#allocation8 + $0x1c0] sm:$0xff]  ;;  %v4344_v4 = vld [vmem:[#allocation8 + $0x1c8] sm:$0xff] }
 0x45a   :  { %1034 = vmatpush.msra.mxu1 %v4342_v0 }
 0x45b   :  { %3395 = vtanh.f32 %v897_v6  ;;  %v945_v8 = vrot.slane %v897_v6, 2  ;;  %v4348_v6 = vld [vmem:[#allocation8 + $0x1d0] sm:$0xff] }
 0x45c   :  { %1035 = vmatpush.msra.mxu1 %v4352_v11 }
 0x45d   :  { %946 = vrot.lane.b32.xlu0 %v945_v8, %s3757_s5  ;;  %v4350_v8 = vld [vmem:[#allocation8 + $0x1d8] sm:$0xff] }
 0x45e   :  { %1094 = vmatpush.msrb.mxu0 %v4350_v8 }
 0x460   :  { %v4315_v39 = vpop.permute.xlu2 %913  ;;  %1095 = vmatpush.msrb.mxu0 %v4360_v15 }
 0x461   :  { %v3396_v13 = vpop.eup %3395  ;;  %5767 = vst [vmem:[#allocation33_spill] sm:$0xff] %v4315_v39 }
 0x462   :  { %900 = vrot.lane.b32.xlu1 %v3396_v13, %s3757_s5  ;;  %v4356_v13 = vld [vmem:[#allocation8 + $0x1a8] sm:$0xff] }
 0x475   :  { %v875_v17 = vpop.permute.xlu0 %874 }
 0x476   :  { %v877_v5 = vadd.f32 %v875_v17, %v867_v16  ;;  %v4366_v17 = vld [vmem:[#allocation8 + $0x180] sm:$0xff] }
 0x477   :  { %1036 = vmatpush.msra.mxu1 %v4366_v17 }
 0x478   :  { %3397 = vtanh.f32 %v877_v5  ;;  %v927_v19 = vrot.slane %v877_v5, 2  ;;  %v4368_v5 = vld [vmem:[#allocation8 + $0x188] sm:$0xff] }
 0x479   :  { %3399 = vpow2.f32 %v3290_v41 }
 0x47a   :  { %928 = vrot.lane.b32.xlu0 %v927_v19, %s3757_s5 }
 0x47d   :  { %v4306_v14 = vpop.permute.xlu0 %939 }
 0x47e   :  { %v3398_v63 = vpop.eup %3397  ;;  %5766 = vst [vmem:[#allocation32_spill] sm:$0xff] %v4306_v14  ;;  %v950_v55 = vmul.f32 %v4306_v14, %v604_v59  ;;  %v942_v40 = vmul.f32 %v4306_v14, %v4255_v26  ;;  %v4334_v26 = vld [vmem:[#allocation8 + $0x1e8] sm:$0xff]  ;;  %v4336_v59 = vld [vmem:[#allocation8 + $0x1f0] sm:$0xff] }
 0x47f   :  { %880 = vrot.lane.b32.xlu1 %v3398_v63, %s3757_s5  ;;  %v3400_v20 = vpop.eup %3399  ;;  %1053 = vmatpush.msrb.mxu2 %v4334_v26  ;;  %v4373_v63 = vld [vmem:[#allocation8 + $0x190] sm:$0xff] }
 0x480   :  { %v832_v21 = vadd.f32 1.0, %v3400_v20  ;;  %1073 = vmatpush.msrb.mxu3 %v4336_v59  ;;  %v4381_v20 = vld [vmem:[#allocation8 + $0x160] sm:$0xff]  ;;  %v4493_v14 = vld [vmem:[#allocation8 + $0x90] sm:$0xff] }
 0x481   :  { %1054 = vmatpush.msrb.mxu2 %v4344_v4  ;;  %1037 = vmatpush.msra.mxu1 %v4381_v20 }
 0x482   :  { %3401 = vrcp.f32 %v832_v21  ;;  %v859_v31 = vand.u32 2147483648, %v832_v21  ;;  %vm853_vm14 = vweird.f32 %v832_v21  ;;  %v857_v32 = vand.u32 2147483647, %v832_v21  ;;  %1074 = vmatpush.msrb.mxu3 %v4348_v6 }
 0x483   :  { %3403 = vpow2.f32 %v3288_v25  ;;  %1055 = vmatpush.msrb.mxu2 %v4356_v13  ;;  %v4395_v25 = vld [vmem:[#allocation8 + $0x178] sm:$0xff] }
 0x484   :  { %v860_v34 = vor.u32 1.1754944e-38, %v859_v31  ;;  %vm858_vm0 = vcmp.eq.f32.partialorder %v857_v32, 8.507059e+37  ;;  %1075 = vmatpush.msrb.mxu3 %v4358_v49  ;;  %v4408_v31 = vld [vmem:[#allocation8 + $0x150] sm:$0xff]  ;;  %v4410_v32 = vld [vmem:[#allocation8 + $0x158] sm:$0xff] }
 0x485   :  { %1056 = vmatpush.msrb.mxu2 %v4368_v5 }
 0x486   :  { %1076 = vmatpush.msrb.mxu3 %v4373_v63 }
 0x487   :  { %921 = vperm.xlu1 %3347, %v4228_v24   ;;  %v4515_v24 = vld [vmem:[#allocation8 + $0x48] sm:$0xff] }
 0x488   :  { %v3402_v9 = vpop.eup %3401 }
 0x489   :  { %v849_v2 = vmul.f32 %v3402_v9, %v832_v21  ;;  %vm854_vm13 = vweird.f32 %v3402_v9  ;;  %v3404_v30 = vpop.eup %3403  ;;  %v4383_v21 = vld [vmem:[#allocation8 + $0x168] sm:$0xff] }
 0x48a   :  { %vm855_vm15 = vmor %vm853_vm14, %vm854_vm13  ;;  %v4312_v33 = vadd.f32 1.0, %v3404_v30  ;;  %1057 = vmatpush.msrb.mxu2 %v4383_v21 }
 0x48b   :  { %v850_v27 = vsub.f32 1.0, %v849_v2  ;;  %v4393_v2 = vld [vmem:[#allocation8 + $0x170] sm:$0xff] }
 0x48c   :  { %3405 = vrcp.f32 %v4312_v33  ;;  %v820_v19 = vand.u32 2147483648, %v4312_v33  ;;  %vm814_vm5 = vweird.f32 %v4312_v33  ;;  %v818_v41 = vand.u32 2147483647, %v4312_v33  ;;  %1077 = vmatpush.msrb.mxu3 %v4393_v2 }
 0x48d   :  { %v851_v28 = vmul.f32 %v3402_v9, %v850_v27 }
 0x48e   :  { %v821_v30 = vor.u32 1.1754944e-38, %v820_v19  ;;  %vm819_vm7 = vcmp.eq.f32.partialorder %v818_v41, 8.507059e+37  ;;  %1078 = vmatpush.msrb.mxu3 %v4408_v31  ;;  %v4440_v19 = vld [vmem:[#allocation8 + $0xe8] sm:$0xff]  ;;  %v4442_v41 = vpop.permute.xlu2 %905 }
 0x48f   :  { %952 = vrot.lane.b32.xlu1 %v950_v55, %s3757_s5  ;;  %v852_v29 = vadd.f32 %v3402_v9, %v851_v28  ;;  %v4375_v55 = vld [vmem:[#allocation8 + $0x198] sm:$0xff]  ;;  %v4402_v28 = vld [vmem:[#allocation8 + $0x140] sm:$0xff]  ;;  %5772 = vst [vmem:[#allocation36_spill] sm:$0xff] %v4442_v41 }
 0x490   :  { %1096 = vmatpush.msrb.mxu0 %v4375_v55  ;;  %1038 = vmatpush.msra.mxu1 %v4402_v28 }
 0x491   :  { %v856_v48 = vsel %vm855_vm15, %v3402_v9, %v852_v29  ;;  %v4404_v29 = vld [vmem:[#allocation8 + $0x148] sm:$0xff]  ;;  %v4446_v9 = vld [vmem:[#allocation8 + $0xf0] sm:$0xff] }
 0x492   :  { %v861_v35 = vsel %vm858_vm0, %v860_v34, %v856_v48  ;;  %v4322_v44 = vpop.eup %3405  ;;  %1097 = vmatpush.msrb.mxu0 %v4395_v25  ;;  %v4416_v48 = vld [vmem:[#allocation8 + $0x128] sm:$0xff]  ;;  %1058 = vmatpush.msrb.mxu2 %v4404_v29 }
 0x493   :  { %v810_v47 = vmul.f32 %v4322_v44, %v4312_v33  ;;  %vm815_vm2 = vweird.f32 %v4322_v44  ;;  %v4414_v33 = vld [vmem:[#allocation8 + $0x120] sm:$0xff] }
 0x494   :  { %vm4387_vm6 = vmor %vm814_vm5, %vm815_vm2  ;;  %1098 = vmatpush.msrb.mxu0 %v4410_v32  ;;  %1039 = vmatpush.msra.mxu1 %v4414_v33 }
 0x495   :  { %v811_v51 = vsub.f32 1.0, %v810_v47  ;;  %1059 = vmatpush.msrb.mxu2 %v4416_v48  ;;  %v4432_v47 = vld [vmem:[#allocation8 + $0x110] sm:$0xff] }
 0x497   :  { %v812_v53 = vmul.f32 %v4322_v44, %v811_v51  ;;  %v4434_v51 = vld [vmem:[#allocation8 + $0x118] sm:$0xff] }
 0x499   :  { %v813_v16 = vadd.f32 %v4322_v44, %v812_v53 }
 0x49b   :  { %v817_v27 = vsel %vm4387_vm6, %v4322_v44, %v813_v16  ;;  %v4428_v44 = vld [vmem:[#allocation8 + $0x108] sm:$0xff]  ;;  %v4438_v16 = vld [vmem:[#allocation8 + $0xe0] sm:$0xff] }
 0x49c   :  { %v822_v34 = vsel %vm819_vm7, %v821_v30, %v817_v27  ;;  %1060 = vmatpush.msrb.mxu2 %v4428_v44  ;;  %v4448_v27 = vld [vmem:[#allocation8 + $0xf8] sm:$0xff] }
 0x49e   :  { %1061 = vmatpush.msrb.mxu2 %v4440_v19 }
 0x4cf   :  { %v947_v50 = vpop.permute.xlu0 %946 }
 0x4d0   :  { %v949_v7 = vmul.f32 %v947_v50, %v4315_v39  ;;  %v4536_v50 = vld [vmem:[#allocation8 + $0x38] sm:$0xff] }
 0x4d4   :  { %v901_v36 = vpop.permute.xlu1 %900 }
 0x4d5   :  { %v903_v54 = vmul.f32 %v901_v36, %v861_v35  ;;  %v4420_v36 = vld [vmem:[#allocation8 + $0x130] sm:$0xff] }
 0x4d6   :  { %1079 = vmatpush.msrb.mxu3 %v4420_v36 }
 0x4d7   :  { %v917_v37 = vrot.slane %v903_v54, 2  ;;  %v4422_v54 = vld [vmem:[#allocation8 + $0x138] sm:$0xff] }
 0x4d8   :  { %1099 = vmatpush.msrb.mxu0 %v4422_v54  ;;  %1080 = vmatpush.msrb.mxu3 %v4432_v47 }
 0x4d9   :  { %v4320_v43 = vmul.f32 %v917_v37, %v4315_v39 }
 0x4da   :  { %1100 = vmatpush.msrb.mxu0 %v4434_v51  ;;  %1081 = vmatpush.msrb.mxu3 %v4446_v9 }
 0x4db   :  { %5768 = vst [vmem:[#allocation34_spill] sm:$0xff] %v4320_v43  ;;  %v4325_v45 = vadd.f32 %v942_v40, %v4320_v43  ;;  %v4426_v40 = vld [vmem:[#allocation8 + $0x100] sm:$0xff] }
 0x4dc   :  { %1040 = vmatpush.msra.mxu1 %v4426_v40  ;;  %1101 = vmatpush.msrb.mxu0 %v4448_v27  ;;  %v4487_v43 = vld [vmem:[#allocation8 + $0x80] sm:$0xff] }
 0x4dd   :  { %5769 = vst [vmem:[#allocation35_spill] sm:$0xff] %v4325_v45  ;;  %965 = vrot.lane.b32.xlu2 %v4325_v45, %s3757_s5  ;;  %v4511_v45 = vld [vmem:[#allocation8 + $0x40] sm:$0xff] }
 0x4de   :  { %1041 = vmatpush.msra.mxu1 %v4438_v16  ;;  %1102 = vmatpush.msrb.mxu0 %v4463_v3 }
 0x4e0   :  { %1103 = vmatpush.msrb.mxu0 %v4485_v38 }
 0x4f1   :  { %v881_v35 = vpop.permute.xlu1 %880 }
 0x4f2   :  { %v883_v37 = vmul.f32 %v881_v35, %v822_v34  ;;  %v4455_v34 = vld [vmem:[#allocation8 + $0xc0] sm:$0xff]  ;;  %v4457_v35 = vld [vmem:[#allocation8 + $0xc8] sm:$0xff] }
 0x4f3   :  { %1042 = vmatpush.msra.mxu1 %v4455_v34  ;;  %1062 = vmatpush.msrb.mxu2 %v4457_v35 }
 0x4f4   :  { %v909_v53 = vrot.slane %v883_v37, 2  ;;  %v4461_v37 = vld [vmem:[#allocation8 + $0xd0] sm:$0xff] }
 0x4f5   :  { %1082 = vmatpush.msrb.mxu3 %v4461_v37  ;;  %1063 = vmatpush.msrb.mxu2 %v4471_v46 }
 0x4f6   :  { %v4451_v30 = vmul.f32 %v909_v53, %v4442_v41  ;;  %v4469_v53 = vld [vmem:[#allocation8 + $0xa0] sm:$0xff]  ;;  %v4522_v41 = vld [vmem:[#allocation8 + $0x58] sm:$0xff] }
 0x4f7   :  { %1043 = vmatpush.msra.mxu1 %v4469_v53  ;;  %1083 = vmatpush.msrb.mxu3 %v4479_v61 }
 0x4f8   :  { %5773 = vst [vmem:[#allocation37_spill] sm:$0xff] %v4451_v30  ;;  %1064 = vmatpush.msrb.mxu2 %v4491_v22 }
 0x4f9   :  { %956 = vst.msk [vmem:[#allocation2 + $0x1] sm:$0x1] %vm605_vm3, %v4451_v30  ;;  %v4475_v10 = vpop.permute.xlu1 %921  ;;  %1044 = vmatpush.msra.mxu1 %v4487_v43  ;;  %1084 = vmatpush.msrb.mxu3 %v4493_v14 }
 0x4fa   :  { %962 = vst.msk [vmem:[#allocation2 + $0x8] sm:$0x2] %vm613_vm4, %v4451_v30  ;;  %v932_v18 = vmul.f32 %v4475_v10, %v4300_v23  ;;  %v4497_v23 = vld [vmem:[#allocation8 + $0x98] sm:$0xff]  ;;  %1065 = vmatpush.msrb.mxu2 %v4503_v56  ;;  %v4528_v30 = vld [vmem:[#allocation8 + $0x28] sm:$0xff] }
 0x4fb   :  { %5774 = vst [vmem:[#allocation38_spill] sm:$0xff] %v4475_v10  ;;  %1104 = vmatpush.msrb.mxu0 %v4497_v23  ;;  %1045 = vmatpush.msra.mxu1 %v4499_v52  ;;  %v4530_v52 = vld [vmem:[#allocation8 + $0x30] sm:$0xff] }
 0x4fc   :  { %934 = vrot.lane.b32.xlu1 %v932_v18, %s3757_s5  ;;  %5775 = vst [vmem:[#allocation39_spill] sm:$0xff] %v4497_v23  ;;  %v4509_v18 = vld [vmem:[#allocation8 + $0x78] sm:$0xff]  ;;  %1085 = vmatpush.msrb.mxu3 %v4505_v58 }
 0x4fd   :  { %1105 = vmatpush.msrb.mxu0 %v4509_v18  ;;  %1046 = vmatpush.msra.mxu1 %v4511_v45 }
 0x4fe   :  { %1066 = vmatpush.msrb.mxu2 %v4515_v24  ;;  %1086 = vmatpush.msrb.mxu3 %v4517_v12  ;;  %v4549_v12 = vld [vmem:[#allocation8 + $0x10] sm:$0xff] }
 0x4ff   :  { %1106 = vmatpush.msrb.mxu0 %v4522_v41  ;;  %1047 = vmatpush.msra.mxu1 %v4524_v1  ;;  %v4553_v1 = vld [vmem:[#allocation8 + $0x18] sm:$0xff] }
 0x500   :  { %1067 = vmatpush.msrb.mxu2 %v4528_v30  ;;  %1087 = vmatpush.msrb.mxu3 %v4530_v52 }
 0x501   :  { %v953_v60 = vpop.permute.xlu1 %952  ;;  %1107 = vmatpush.msrb.mxu0 %v4536_v50 }
 0x502   :  { %v4532_v23 = vadd.f32 %v953_v60, %v949_v7  ;;  %v4545_v60 = vld [vmem:[#allocation8] sm:$0xff]  ;;  %v4547_v7 = vld [vmem:[#allocation8 + $0x8] sm:$0xff]  ;;  %1088 = vmatpush.msrb.mxu3 %v4549_v12 }
 0x503   :  { %1048 = vmatpush.msra.mxu1 %v4545_v60  ;;  %1068 = vmatpush.msrb.mxu2 %v4547_v7 }
 0x504   :  { %v1230_v39 = vrot.slane %v4532_v23, 4  ;;  %1108 = vmatpush.msrb.mxu0 %v4553_v1  ;;  %1412 = vmatpush.msra.mxu3 %v4336_v59  ;;  %v5786_v59 = vld [vmem:[#allocation25_spill] sm:$0xff] }
 0x505   :  { %1372 = vmatpush.msrb.mxu1 %v4332_v57  ;;  %1392 = vmatpush.msra.mxu2 %v4334_v26  ;;  %v5779_v57 = vld [vmem:[#allocation39_spill] sm:$0xff] }
 0x506   :  { %1231 = vrot.lane.b32.xlu0 %v1230_v39, %s3757_s5  ;;  %1432 = vmatpush.msra.mxu0 %v4340_v62  ;;  %v924_v39 = vmul.f32 %v4475_v10, %v4267_v42  ;;  %v4898_v10 = vld [vmem:[#allocation8 + $0x88] sm:$0xff] }
 0x507   :  { %1373 = vmatpush.msrb.mxu1 %v4342_v0  ;;  %1393 = vmatpush.msra.mxu2 %v4344_v4 }
 0x508   :  { %1413 = vmatpush.msra.mxu3 %v4348_v6  ;;  %1433 = vmatpush.msra.mxu0 %v4350_v8  ;;  %v5787_v6 = vld [vmem:[#allocation36_spill] sm:$0xff] }
 0x509   :  { %1374 = vmatpush.msrb.mxu1 %v4352_v11  ;;  %1394 = vmatpush.msra.mxu2 %v4356_v13 }
 0x50a   :  { %1414 = vmatpush.msra.mxu3 %v4358_v49  ;;  %1434 = vmatpush.msra.mxu0 %v4360_v15 }
 0x50b   :  { %1375 = vmatpush.msrb.mxu1 %v4366_v17  ;;  %1395 = vmatpush.msra.mxu2 %v4368_v5  ;;  %v5788_v17 = vld [vmem:[#allocation26_spill] sm:$0xff] }
 0x50c   :  { %1415 = vmatpush.msra.mxu3 %v4373_v63  ;;  %1435 = vmatpush.msra.mxu0 %v4375_v55  ;;  %v5789_v5 = vrot.slane %v5788_v17, 6 }
 0x50d   :  { %1376 = vmatpush.msrb.mxu1 %v4381_v20  ;;  %1396 = vmatpush.msra.mxu2 %v4383_v21 }
 0x50e   :  { %1416 = vmatpush.msra.mxu3 %v4393_v2  ;;  %1436 = vmatpush.msra.mxu0 %v4395_v25  ;;  %v5790_v2 = vld [vmem:[#allocation27_spill] sm:$0xff] }
 0x50f   :  { %1377 = vmatpush.msrb.mxu1 %v4402_v28  ;;  %1397 = vmatpush.msra.mxu2 %v4404_v29 }
 0x510   :  { %1417 = vmatpush.msra.mxu3 %v4408_v31  ;;  %1437 = vmatpush.msra.mxu0 %v4410_v32 }
 0x511   :  { %1378 = vmatpush.msrb.mxu1 %v4414_v33  ;;  %1398 = vmatpush.msra.mxu2 %v4416_v48 }
 0x512   :  { %1418 = vmatpush.msra.mxu3 %v4420_v36  ;;  %1438 = vmatpush.msra.mxu0 %v4422_v54 }
 0x513   :  { %1379 = vmatpush.msrb.mxu1 %v4426_v40  ;;  %1399 = vmatpush.msra.mxu2 %v4428_v44  ;;  %v3762_v44 = vmov 5  }
 0x514   :  { %1419 = vmatpush.msra.mxu3 %v4432_v47  ;;  %1439 = vmatpush.msra.mxu0 %v4434_v51  ;;  %v4647_v47 = vld [vmem:[#allocation3] sm:$0x3] }
 0x515   :  { %1380 = vmatpush.msrb.mxu1 %v4438_v16  ;;  %1400 = vmatpush.msra.mxu2 %v4440_v19 }
 0x516   :  { %1420 = vmatpush.msra.mxu3 %v4446_v9  ;;  %1440 = vmatpush.msra.mxu0 %v4448_v27 }
 0x517   :  { %1381 = vmatpush.msrb.mxu1 %v4455_v34  ;;  %1401 = vmatpush.msra.mxu2 %v4457_v35 }
 0x518   :  { %1421 = vmatpush.msra.mxu3 %v4461_v37  ;;  %1441 = vmatpush.msra.mxu0 %v4463_v3  ;;  %v5780_v3 = vld [vmem:[#allocation40_spill] sm:$0xff] }
 0x519   :  { %1382 = vmatpush.msrb.mxu1 %v4469_v53  ;;  %1402 = vmatpush.msra.mxu2 %v4471_v46  ;;  %v5783_v46 = vld [vmem:[#allocation42_spill] sm:$0xff] }
 0x51a   :  { %1422 = vmatpush.msra.mxu3 %v4479_v61  ;;  %1442 = vmatpush.msra.mxu0 %v4485_v38  ;;  %v5781_v61 = vld [vmem:[#allocation37_spill] sm:$0xff] }
 0x51b   :  { %1383 = vmatpush.msrb.mxu1 %v4487_v43  ;;  %1403 = vmatpush.msra.mxu2 %v4491_v22  ;;  %v4614_v22 = vadd.f32 %v924_v39, %v5781_v61  ;;  %v5782_v38 = vld [vmem:[#allocation41_spill] sm:$0xff] }
 0x51c   :  { %1423 = vmatpush.msra.mxu3 %v4493_v14  ;;  %1443 = vmatpush.msra.mxu0 %v5779_v57  ;;  %v5784_v14 = vld [vmem:[#allocation24_spill] sm:$0xff] }
 0x51d   :  { %1384 = vmatpush.msrb.mxu1 %v5780_v3  ;;  %1404 = vmatpush.msra.mxu2 %v4503_v56  ;;  %v5785_v43 = vrot.slane %v5784_v14, 6 }
 0x51e   :  { %1424 = vmatpush.msra.mxu3 %v4505_v58  ;;  %1444 = vmatpush.msra.mxu0 %v4509_v18 }
 0x51f   :  { %1385 = vmatpush.msrb.mxu1 %v4511_v45  ;;  %1405 = vmatpush.msra.mxu2 %v4515_v24 }
 0x520   :  { %1425 = vmatpush.msra.mxu3 %v5782_v38  ;;  %1445 = vmatpush.msra.mxu0 %v4522_v41 }
 0x521   :  { %1386 = vmatpush.msrb.mxu1 %v5783_v46  ;;  %1406 = vmatpush.msra.mxu2 %v4528_v30  ;;  %v3763_v46 = vmov 2  }
 0x522   :  { %1426 = vmatpush.msra.mxu3 %v4530_v52  ;;  %1446 = vmatpush.msra.mxu0 %v4536_v50 }
 0x523   :  { %1387 = vmatpush.msrb.mxu1 %v4545_v60  ;;  %1407 = vmatpush.msra.mxu2 %v4547_v7 }
 0x524   :  { %1427 = vmatpush.msra.mxu3 %v4549_v12  ;;  %1447 = vmatpush.msra.mxu0 %v4553_v1  ;;  %v929_v12 = vpop.permute.xlu0 %928 }
 0x525   :  { %v931_v8 = vmul.f32 %v929_v12, %v5787_v6  ;;  %3349 = vset.pattern.permute.xlu0 %v3762_v44  ;;  %3348 = vset.pattern.permute.xlu2 %v3762_v44 }
 0x526   :  { %3351 = vset.pattern.permute.xlu1 %v3763_v46 }
 0x537   :  { %v966_v42 = vpop.permute.xlu2 %965 }
 0x538   :  { %v968_v56 = vsel %vm211_vm1, %v4614_v22, %v966_v42  ;;  %v5791_v42 = vld [vmem:[#allocation28_spill] sm:$0xff] }
 0x539   :  { %1049 = vmatmul.f32.vlgmr.msra.gmra.mxu1 %v968_v56  ;;  %1069 = vmatmul.f32.vlgmr.msrb.gmra.mxu2 %v968_v56 }
 0x53a   :  { %1089 = vmatmul.f32.vlgmr.msrb.gmra.mxu3 %v968_v56  ;;  %1109 = vmatmul.f32.vlgmr.msrb.gmra.mxu0 %v968_v56 }
 0x56e   :  { %v935_v4 = vpop.permute.xlu1 %934 }
 0x56f   :  { %v4640_v11 = vadd.f32 %v935_v4, %v931_v8 }
 0x571   :  { %v1208_v13 = vrot.slane %v4640_v11, 4 }
 0x578   :  { %v1232_v56 = vpop.permute.xlu0 %1231 }
 0x5b6   :  { %v1050_v55 = vpop.f32.mrf.mxu1 }
 0x5b7   :  { %v1110_v58 = vpop.f32.mrf.mxu0  ;;  %v1117_v20 = vrot.slane %v1050_v55, 4 }
 0x5b8   :  { %v1120_v24 = vrot.slane %v1110_v58, 4 }
 0x5b9   :  { %v1125_v25 = vadd.f32 %v1117_v20, %v5790_v2 }
 0x5ba   :  { %v4630_v45 = vadd.f32 %v1120_v24, %v5785_v43 }
 0x5bb   :  { %v3291_v28 = vmul.f32 -1.442695, %v1125_v25 }
 0x5bc   :  { %3407 = vtanh.f32 %v4630_v45  ;;  %v1070_v52 = vpop.f32.mrf.mxu2 }
 0x5bd   :  { %v1118_v26 = vrot.slane %v1070_v52, 4  ;;  %v1090_v49 = vpop.f32.mrf.mxu3 }
 0x5be   :  { %v1119_v15 = vrot.slane %v1090_v49, 4 }
 0x5bf   :  { %v4634_v62 = vadd.f32 %v1118_v26, %v5786_v59 }
 0x5c0   :  { %v1127_v63 = vadd.f32 %v1119_v15, %v5789_v5 }
 0x5c1   :  { %3409 = vtanh.f32 %v4634_v62  ;;  %v3292_v49 = vmul.f32 -1.442695, %v4634_v62 }
 0x5c2   :  { %v3408_v0 = vpop.eup %3407  ;;  %v3293_v21 = vmul.f32 -1.442695, %v1127_v63 }
 0x5c3   :  { %1236 = vrot.lane.b32.xlu2 %v3408_v0, %s3757_s5 }
 0x5c4   :  { %3411 = vpow2.f32 %v3293_v21 }
 0x5c5   :  { %3413 = vpow2.f32 %v3291_v28 }
 0x5c7   :  { %v3410_v1 = vpop.eup %3409 }
 0x5ca   :  { %v3412_v29 = vpop.eup %3411 }
 0x5cb   :  { %1214 = vrot.lane.b32.xlu2 %v3410_v1, %s3757_s5  ;;  %v1174_v31 = vadd.f32 1.0, %v3412_v29  ;;  %v3414_v32 = vpop.eup %3413 }
 0x5cc   :  { %v1135_v33 = vadd.f32 1.0, %v3414_v32 }
 0x5cd   :  { %3415 = vrcp.f32 %v1174_v31  ;;  %v1187_v9 = vand.u32 2147483648, %v1174_v31  ;;  %vm1181_vm9 = vweird.f32 %v1174_v31  ;;  %v1185_v27 = vand.u32 2147483647, %v1174_v31 }
 0x5ce   :  { %3417 = vrcp.f32 %v1135_v33  ;;  %v1148_v60 = vand.u32 2147483648, %v1135_v33  ;;  %vm1142_vm13 = vweird.f32 %v1135_v33  ;;  %v1146_v7 = vand.u32 2147483647, %v1135_v33 }
 0x5cf   :  { %v1188_v35 = vor.u32 1.1754944e-38, %v1187_v9  ;;  %vm1186_vm11 = vcmp.eq.f32.partialorder %v1185_v27, 8.507059e+37 }
 0x5d0   :  { %v1149_v57 = vor.u32 1.1754944e-38, %v1148_v60  ;;  %vm1147_vm15 = vcmp.eq.f32.partialorder %v1146_v7, 8.507059e+37 }
 0x5d3   :  { %1209 = vrot.lane.b32.xlu2 %v1208_v13, %s3757_s5  ;;  %v3416_v48 = vpop.eup %3415  ;;  %v3294_v13 = vmul.f32 -1.442695, %v4630_v45 }
 0x5d4   :  { %v1177_v36 = vmul.f32 %v3416_v48, %v1174_v31  ;;  %v3418_v40 = vpop.eup %3417  ;;  %vm1182_vm8 = vweird.f32 %v3416_v48 }
 0x5d5   :  { %v1138_v16 = vmul.f32 %v3418_v40, %v1135_v33  ;;  %vm1183_vm10 = vmor %vm1181_vm9, %vm1182_vm8  ;;  %vm1143_vm12 = vweird.f32 %v3418_v40 }
 0x5d6   :  { %v1178_v54 = vsub.f32 1.0, %v1177_v36  ;;  %vm1144_vm14 = vmor %vm1142_vm13, %vm1143_vm12 }
 0x5d7   :  { %v1139_v41 = vsub.f32 1.0, %v1138_v16 }
 0x5d8   :  { %v1179_v51 = vmul.f32 %v3416_v48, %v1178_v54 }
 0x5d9   :  { %v1140_v34 = vmul.f32 %v3418_v40, %v1139_v41 }
 0x5da   :  { %v1180_v19 = vadd.f32 %v3416_v48, %v1179_v51 }
 0x5db   :  { %1260 = vperm.xlu2 %3348, %v4647_v47   ;;  %v1141_v50 = vadd.f32 %v3418_v40, %v1140_v34  ;;  %v5794_v34 = vld [vmem:[#allocation35_spill] sm:$0xff] }
 0x5dc   :  { %v1184_v30 = vsel %vm1183_vm10, %v3416_v48, %v1180_v19 }
 0x5dd   :  { %v1189_v53 = vsel %vm1186_vm11, %v1188_v35, %v1184_v30  ;;  %v1145_v39 = vsel %vm1144_vm14, %v3418_v40, %v1141_v50 }
 0x5de   :  { %v1150_v61 = vsel %vm1147_vm15, %v1149_v57, %v1145_v39  ;;  %v1234_v58 = vmul.f32 %v1232_v56, %v1189_v53 }
 0x5e3   :  { %3350 = vset.pattern.permute.xlu2 %v3763_v46 }
 0x5e4   :  { %1252 = vperm.xlu2 %3350, %v4647_v47  }
 0x61d   :  { %v1237_v37 = vpop.permute.xlu2 %1236 }
 0x61e   :  { %v1239_v18 = vmul.f32 %v1237_v37, %v1189_v53 }
 0x620   :  { %1241 = vrot.lane.b32.xlu1 %v1239_v18, %s3757_s5 }
 0x625   :  { %v1215_v3 = vpop.permute.xlu2 %1214 }
 0x626   :  { %v1217_v38 = vmul.f32 %v1215_v3, %v1150_v61 }
 0x628   :  { %1219 = vrot.lane.b32.xlu0 %v1217_v38, %s3757_s5 }
 0x62d   :  { %v1210_v26 = vpop.permute.xlu2 %1209 }
 0x62e   :  { %v1212_v0 = vmul.f32 %v1210_v26, %v1150_v61 }
 0x630   :  { %1282 = vperm.xlu0 %3349, %v5791_v42  }
 0x635   :  { %v4662_v41 = vpop.permute.xlu2 %1260 }
 0x636   :  { %5793 = vst [vmem:[#allocation40_spill] sm:$0xff] %v4662_v41 }
 0x63e   :  { %v4674_v57 = vpop.permute.xlu2 %1252 }
 0x63f   :  { %5796 = vst [vmem:[#allocation41_spill] sm:$0xff] %v4674_v57 }
 0x692   :  { %v1242_v24 = vpop.permute.xlu1 %1241 }
 0x693   :  { %v1244_v43 = vadd.f32 %v1242_v24, %v1234_v58 }
 0x695   :  { %3419 = vtanh.f32 %v1244_v43  ;;  %v1288_v52 = vrot.slane %v1244_v43, 4 }
 0x697   :  { %1289 = vrot.lane.b32.xlu0 %v1288_v52, %s3757_s5 }
 0x69a   :  { %v1220_v12 = vpop.permute.xlu0 %1219 }
 0x69b   :  { %v3420_v1 = vpop.eup %3419  ;;  %v1222_v4 = vadd.f32 %v1220_v12, %v1212_v0  ;;  %v5798_v0 = vrot.slane %v5784_v14, 2 }
 0x69c   :  { %1247 = vrot.lane.b32.xlu1 %v3420_v1, %s3757_s5 }
 0x69d   :  { %3421 = vtanh.f32 %v1222_v4  ;;  %v1274_v38 = vrot.slane %v1222_v4, 4 }
 0x69e   :  { %3423 = vpow2.f32 %v3294_v13 }
 0x69f   :  { %3425 = vpow2.f32 %v3292_v49 }
 0x6a2   :  { %v4660_v19 = vpop.permute.xlu0 %1282 }
 0x6a3   :  { %v3422_v8 = vpop.eup %3421  ;;  %5792 = vst [vmem:[#allocation39_spill] sm:$0xff] %v4660_v19  ;;  %v1285_v35 = vmul.f32 %v4660_v19, %v5794_v34 }
 0x6a4   :  { %1225 = vrot.lane.b32.xlu1 %v3422_v8, %s3757_s5  ;;  %v3424_v15 = vpop.eup %3423 }
 0x6a5   :  { %v1175_v5 = vadd.f32 1.0, %v3424_v15  ;;  %v3426_v63 = vpop.eup %3425  ;;  %v1293_v15 = vmul.f32 %v4660_v19, %v4532_v23  ;;  %v4916_v19 = vld [vmem:[#allocation8 + $0x78] sm:$0xff] }
 0x6a6   :  { %v1136_v55 = vadd.f32 1.0, %v3426_v63 }
 0x6a7   :  { %3427 = vrcp.f32 %v1175_v5  ;;  %v1202_v45 = vand.u32 2147483648, %v1175_v5  ;;  %vm1196_vm2 = vweird.f32 %v1175_v5  ;;  %v1200_v48 = vand.u32 2147483647, %v1175_v5 }
 0x6a8   :  { %3429 = vrcp.f32 %v1136_v55  ;;  %v1163_v9 = vand.u32 2147483648, %v1136_v55  ;;  %vm1157_vm8 = vweird.f32 %v1136_v55  ;;  %v1161_v30 = vand.u32 2147483647, %v1136_v55 }
 0x6a9   :  { %v1203_v54 = vor.u32 1.1754944e-38, %v1202_v45  ;;  %vm1201_vm6 = vcmp.eq.f32.partialorder %v1200_v48, 8.507059e+37 }
 0x6aa   :  { %v1164_v18 = vor.u32 1.1754944e-38, %v1163_v9  ;;  %vm1162_vm10 = vcmp.eq.f32.partialorder %v1161_v30, 8.507059e+37  ;;  %v3764_v9 = vmov 4  }
 0x6ab   :  { %3352 = vset.pattern.permute.xlu0 %v3764_v9 }
 0x6ac   :  { %1268 = vperm.xlu1 %3351, %v5791_v42  }
 0x6ad   :  { %v3428_v20 = vpop.eup %3427 }
 0x6ae   :  { %v1192_v21 = vmul.f32 %v3428_v20, %v1175_v5  ;;  %v3430_v28 = vpop.eup %3429  ;;  %vm1197_vm0 = vweird.f32 %v3428_v20 }
 0x6af   :  { %v1153_v31 = vmul.f32 %v3430_v28, %v1136_v55  ;;  %vm1198_vm5 = vmor %vm1196_vm2, %vm1197_vm0  ;;  %vm1158_vm7 = vweird.f32 %v3430_v28 }
 0x6b0   :  { %v1193_v25 = vsub.f32 1.0, %v1192_v21  ;;  %vm1159_vm9 = vmor %vm1157_vm8, %vm1158_vm7 }
 0x6b1   :  { %v1154_v33 = vsub.f32 1.0, %v1153_v31  ;;  %v5801_v31 = vrot.slane %v5788_v17, 2 }
 0x6b2   :  { %v1194_v29 = vmul.f32 %v3428_v20, %v1193_v25 }
 0x6b3   :  { %v1155_v36 = vmul.f32 %v3430_v28, %v1154_v33 }
 0x6b4   :  { %v1195_v32 = vadd.f32 %v3428_v20, %v1194_v29  ;;  %3353 = vset.pattern.permute.xlu1 %v3764_v9 }
 0x6b5   :  { %v1156_v16 = vadd.f32 %v3430_v28, %v1155_v36 }
 0x6b6   :  { %v1199_v62 = vsel %vm1198_vm5, %v3428_v20, %v1195_v32 }
 0x6b7   :  { %v1204_v40 = vsel %vm1201_vm6, %v1203_v54, %v1199_v62  ;;  %v1160_v53 = vsel %vm1159_vm9, %v3430_v28, %v1156_v16 }
 0x6b8   :  { %v1165_v60 = vsel %vm1162_vm10, %v1164_v18, %v1160_v53 }
 0x709   :  { %v1290_v4 = vpop.permute.xlu0 %1289 }
 0x70a   :  { %v1292_v13 = vmul.f32 %v1290_v4, %v4662_v41 }
 0x70c   :  { %v4701_v14 = vadd.f32 %v1293_v15, %v1292_v13 }
 0x70e   :  { %v1248_v44 = vpop.permute.xlu1 %1247  ;;  %5799 = vst [vmem:[#allocation24_spill] sm:$0xff] %v4701_v14  ;;  %v1569_v20 = vrot.slane %v4701_v14, 2  ;;  %v4943_v14 = vld [vmem:[#allocation8 + $0x30] sm:$0xff] }
 0x70f   :  { %v1250_v51 = vmul.f32 %v1248_v44, %v1204_v40 }
 0x711   :  { %v1264_v27 = vrot.slane %v1250_v51, 4 }
 0x713   :  { %v4667_v37 = vmul.f32 %v1264_v27, %v4662_v41  ;;  %v3765_v27 = vmov 3   ;;  %v4910_v41 = vld [vmem:[#allocation8 + $0x68] sm:$0xff] }
 0x714   :  { %3355 = vset.pattern.permute.xlu2 %v3765_v27 }
 0x715   :  { %5795 = vst [vmem:[#allocation37_spill] sm:$0xff] %v4667_v37  ;;  %v4670_v50 = vadd.f32 %v1285_v35, %v4667_v37  ;;  %v4896_v37 = vld [vmem:[#allocation8 + $0x80] sm:$0xff] }
 0x716   :  { %v1226_v7 = vpop.permute.xlu1 %1225 }
 0x717   :  { %v1228_v39 = vmul.f32 %v1226_v7, %v1165_v60  ;;  %1304 = vrot.lane.b32.xlu2 %v4670_v50, %s3757_s5 }
 0x719   :  { %v1256_v3 = vrot.slane %v1228_v39, 4 }
 0x71b   :  { %v1258_v61 = vmul.f32 %v1256_v3, %v4674_v57 }
 0x71d   :  { %1295 = vst.msk [vmem:[#allocation2 + $0x2] sm:$0x1] %vm605_vm3, %v1258_v61 }
 0x71e   :  { %1301 = vst.msk [vmem:[#allocation2 + $0x9] sm:$0x2] %vm613_vm4, %v1258_v61  ;;  %v4680_v46 = vpop.permute.xlu1 %1268 }
 0x71f   :  { %1275 = vrot.lane.b32.xlu2 %v1274_v38, %s3757_s5  ;;  %5797 = vst [vmem:[#allocation42_spill] sm:$0xff] %v4680_v46  ;;  %v1271_v56 = vmul.f32 %v4680_v46, %v4614_v22 }
 0x721   :  { %v4684_v58 = vadd.f32 %v1271_v56, %v1258_v61 }
 0x771   :  { %v1305_v24 = vpop.permute.xlu2 %1304 }
 0x772   :  { %v1307_v43 = vsel %vm211_vm1, %v4684_v58, %v1305_v24 }
 0x773   :  { %1388 = vmatmul.f32.vlgmr.msrb.gmra.mxu1 %v1307_v43  ;;  %1408 = vmatmul.f32.vlgmr.msra.gmra.mxu2 %v1307_v43 }
 0x774   :  { %1428 = vmatmul.f32.vlgmr.msra.gmra.mxu3 %v1307_v43  ;;  %1448 = vmatmul.f32.vlgmr.msra.gmra.mxu0 %v1307_v43 }
 0x779   :  { %v1276_v5 = vpop.permute.xlu2 %1275 }
 0x77a   :  { %v1278_v63 = vmul.f32 %v1276_v5, %v4674_v57 }
 0x7f0   :  { %v1389_v29 = vpop.f32.mrf.mxu1 }
 0x7f1   :  { %v1449_v52 = vpop.f32.mrf.mxu0  ;;  %v1456_v33 = vrot.slane %v1389_v29, 2 }
 0x7f2   :  { %v1459_v26 = vrot.slane %v1449_v52, 2 }
 0x7f3   :  { %v1464_v45 = vadd.f32 %v1456_v33, %v5790_v2 }
 0x7f4   :  { %v4690_v12 = vadd.f32 %v1459_v26, %v5798_v0 }
 0x7f5   :  { %v3295_v48 = vmul.f32 -1.442695, %v1464_v45 }
 0x7f6   :  { %3431 = vtanh.f32 %v4690_v12  ;;  %v1409_v1 = vpop.f32.mrf.mxu2 }
 0x7f7   :  { %v1457_v22 = vrot.slane %v1409_v1, 2  ;;  %v1429_v25 = vpop.f32.mrf.mxu3 }
 0x7f8   :  { %v1458_v28 = vrot.slane %v1429_v25, 2 }
 0x7f9   :  { %v4694_v8 = vadd.f32 %v1457_v22, %v5786_v59  ;;  %v1279_v59 = vmul.f32 %v4680_v46, %v4640_v11 }
 0x7fa   :  { %v1466_v32 = vadd.f32 %v1458_v28, %v5801_v31 }
 0x7fb   :  { %3433 = vtanh.f32 %v4694_v8  ;;  %v4708_v21 = vadd.f32 %v1279_v59, %v1278_v63  ;;  %v3296_v33 = vmul.f32 -1.442695, %v4694_v8 }
 0x7fc   :  { %v3432_v49 = vpop.eup %3431  ;;  %v3297_v11 = vmul.f32 -1.442695, %v1466_v32 }
 0x7fd   :  { %1575 = vrot.lane.b32.xlu1 %v3432_v49, %s3757_s5  ;;  %5800 = vst [vmem:[#allocation25_spill] sm:$0xff] %v4708_v21  ;;  %v1547_v23 = vrot.slane %v4708_v21, 2  ;;  %v4934_v21 = vld [vmem:[#allocation8 + $0x20] sm:$0xff] }
 0x7fe   :  { %3435 = vpow2.f32 %v3297_v11  ;;  %5810 = vst [vmem:[#allocation45_spill] sm:$0xff] %v4934_v21 }
 0x7ff   :  { %3437 = vpow2.f32 %v3295_v48 }
 0x801   :  { %v3434_v55 = vpop.eup %3433 }
 0x802   :  { %1553 = vrot.lane.b32.xlu0 %v3434_v55, %s3757_s5 }
 0x804   :  { %v3436_v62 = vpop.eup %3435 }
 0x805   :  { %1570 = vrot.lane.b32.xlu1 %v1569_v20, %s3757_s5  ;;  %v1513_v36 = vadd.f32 1.0, %v3436_v62  ;;  %v3438_v54 = vpop.eup %3437 }
 0x806   :  { %v1474_v40 = vadd.f32 1.0, %v3438_v54 }
 0x807   :  { %3439 = vrcp.f32 %v1513_v36  ;;  %v1526_v53 = vand.u32 2147483648, %v1513_v36  ;;  %vm1520_vm12 = vweird.f32 %v1513_v36  ;;  %v1524_v60 = vand.u32 2147483647, %v1513_v36 }
 0x808   :  { %3441 = vrcp.f32 %v1474_v40  ;;  %v1487_v61 = vand.u32 2147483648, %v1474_v40  ;;  %vm1481_vm0 = vweird.f32 %v1474_v40  ;;  %v1485_v24 = vand.u32 2147483647, %v1474_v40 }
 0x809   :  { %v1527_v39 = vor.u32 1.1754944e-38, %v1526_v53  ;;  %vm1525_vm15 = vcmp.eq.f32.partialorder %v1524_v60, 8.507059e+37  ;;  %v4755_v60 = vld [vmem:[#allocation8 + $0x1f8] sm:$0xff] }
 0x80a   :  { %1548 = vrot.lane.b32.xlu0 %v1547_v23, %s3757_s5  ;;  %v1488_v26 = vor.u32 1.1754944e-38, %v1487_v61  ;;  %vm1486_vm5 = vcmp.eq.f32.partialorder %v1485_v24, 8.507059e+37  ;;  %1777 = vmatpush.msrb.mxu0 %v4755_v60  ;;  %v4767_v61 = vld [vmem:[#allocation8 + $0x1a0] sm:$0xff] }
 0x80d   :  { %v3440_v44 = vpop.eup %3439 }
 0x80e   :  { %v1516_v51 = vmul.f32 %v3440_v44, %v1513_v36  ;;  %v3442_v16 = vpop.eup %3441  ;;  %vm1521_vm11 = vweird.f32 %v3440_v44 }
 0x80f   :  { %v1477_v2 = vmul.f32 %v3442_v16, %v1474_v40  ;;  %vm1522_vm13 = vmor %vm1520_vm12, %vm1521_vm11  ;;  %vm1482_vm14 = vweird.f32 %v3442_v16 }
 0x810   :  { %v1517_v17 = vsub.f32 1.0, %v1516_v51  ;;  %vm1483_vm2 = vmor %vm1481_vm0, %vm1482_vm14 }
 0x811   :  { %v1478_v34 = vsub.f32 1.0, %v1477_v2 }
 0x812   :  { %1599 = vperm.xlu0 %3352, %v4647_v47   ;;  %v1518_v30 = vmul.f32 %v3440_v44, %v1517_v17 }
 0x813   :  { %v1479_v18 = vmul.f32 %v3442_v16, %v1478_v34  ;;  %v4744_v34 = vld [vmem:[#allocation8 + $0x1e8] sm:$0xff] }
 0x814   :  { %v1519_v35 = vadd.f32 %v3440_v44, %v1518_v30  ;;  %v4742_v30 = vld [vmem:[#allocation8 + $0x1e0] sm:$0xff]  ;;  %1737 = vmatpush.msrb.mxu2 %v4744_v34 }
 0x815   :  { %v1480_v3 = vadd.f32 %v3442_v16, %v1479_v18  ;;  %1717 = vmatpush.msra.mxu1 %v4742_v30 }
 0x816   :  { %v1523_v7 = vsel %vm1522_vm13, %v3440_v44, %v1519_v35  ;;  %v4746_v35 = vld [vmem:[#allocation8 + $0x1f0] sm:$0xff] }
 0x817   :  { %v1528_v56 = vsel %vm1525_vm15, %v1527_v39, %v1523_v7  ;;  %v1484_v52 = vsel %vm1483_vm2, %v3442_v16, %v1480_v3  ;;  %v4759_v7 = vld [vmem:[#allocation8 + $0x1c8] sm:$0xff]  ;;  %1757 = vmatpush.msrb.mxu3 %v4746_v35  ;;  %v4763_v39 = vld [vmem:[#allocation8 + $0x1d0] sm:$0xff]  ;;  %v4765_v3 = vld [vmem:[#allocation8 + $0x1d8] sm:$0xff] }
 0x818   :  { %v1489_v1 = vsel %vm1486_vm5, %v1488_v26, %v1484_v52  ;;  %1738 = vmatpush.msrb.mxu2 %v4759_v7  ;;  %v4782_v52 = vld [vmem:[#allocation8 + $0x180] sm:$0xff]  ;;  %1778 = vmatpush.msrb.mxu0 %v4765_v3  ;;  %v4786_v26 = vld [vmem:[#allocation8 + $0x188] sm:$0xff] }
 0x819   :  { %1758 = vmatpush.msrb.mxu3 %v4763_v39 }
 0x86f   :  { %v1576_v38 = vpop.permute.xlu1 %1575 }
 0x870   :  { %v1578_v43 = vmul.f32 %v1576_v38, %v1528_v56  ;;  %v4772_v38 = vld [vmem:[#allocation8 + $0x1a8] sm:$0xff] }
 0x871   :  { %1739 = vmatpush.msrb.mxu2 %v4772_v38 }
 0x872   :  { %1580 = vrot.lane.b32.xlu2 %v1578_v43, %s3757_s5  ;;  %v4780_v43 = vld [vmem:[#allocation8 + $0x1b8] sm:$0xff] }
 0x873   :  { %1779 = vmatpush.msrb.mxu0 %v4780_v43  ;;  %1740 = vmatpush.msrb.mxu2 %v4786_v26 }
 0x874   :  { %v1554_v0 = vpop.permute.xlu0 %1553 }
 0x875   :  { %v1556_v22 = vmul.f32 %v1554_v0, %v1489_v1  ;;  %v4788_v0 = vld [vmem:[#allocation8 + $0x190] sm:$0xff] }
 0x877   :  { %1558 = vrot.lane.b32.xlu1 %v1556_v22, %s3757_s5  ;;  %v1571_v4 = vpop.permute.xlu1 %1570  ;;  %v4794_v22 = vld [vmem:[#allocation8 + $0x160] sm:$0xff] }
 0x878   :  { %v1573_v13 = vmul.f32 %v1571_v4, %v1528_v56  ;;  %v4774_v56 = vld [vmem:[#allocation8 + $0x1b0] sm:$0xff]  ;;  %v4798_v4 = vld [vmem:[#allocation8 + $0x168] sm:$0xff] }
 0x879   :  { %1759 = vmatpush.msrb.mxu3 %v4774_v56  ;;  %1741 = vmatpush.msrb.mxu2 %v4798_v4 }
 0x87b   :  { %1760 = vmatpush.msrb.mxu3 %v4788_v0 }
 0x87c   :  { %v1549_v55 = vpop.permute.xlu0 %1548 }
 0x87d   :  { %v1551_v59 = vmul.f32 %v1549_v55, %v1489_v1  ;;  %v4792_v1 = vld [vmem:[#allocation8 + $0x198] sm:$0xff]  ;;  %v4811_v55 = vld [vmem:[#allocation8 + $0x148] sm:$0xff] }
 0x87e   :  { %1780 = vmatpush.msrb.mxu0 %v4792_v1  ;;  %1742 = vmatpush.msrb.mxu2 %v4811_v55 }
 0x87f   :  { %1621 = vperm.xlu1 %3353, %v5791_v42  }
 0x884   :  { %v4735_v9 = vpop.permute.xlu0 %1599 }
 0x885   :  { %5803 = vst [vmem:[#allocation27_spill] sm:$0xff] %v4735_v9 }
 0x887   :  { %3354 = vset.pattern.permute.xlu1 %v3765_v27 }
 0x888   :  { %1591 = vperm.xlu1 %3354, %v4647_v47   ;;  %v3298_v47 = vmul.f32 -1.442695, %v4690_v12 }
 0x8cc   :  { %v1581_v49 = vpop.permute.xlu2 %1580 }
 0x8cd   :  { %v1583_v15 = vadd.f32 %v1581_v49, %v1573_v13  ;;  %v4800_v13 = vld [vmem:[#allocation8 + $0x170] sm:$0xff] }
 0x8ce   :  { %1761 = vmatpush.msrb.mxu3 %v4800_v13 }
 0x8cf   :  { %3443 = vtanh.f32 %v1583_v15  ;;  %v1627_v5 = vrot.slane %v1583_v15, 6  ;;  %v4804_v15 = vld [vmem:[#allocation8 + $0x178] sm:$0xff] }
 0x8d0   :  { %1781 = vmatpush.msrb.mxu0 %v4804_v15 }
 0x8d1   :  { %1628 = vrot.lane.b32.xlu1 %v1627_v5, %s3757_s5 }
 0x8d5   :  { %v3444_v63 = vpop.eup %3443 }
 0x8d6   :  { %1586 = vrot.lane.b32.xlu2 %v3444_v63, %s3757_s5  ;;  %v4809_v63 = vld [vmem:[#allocation8 + $0x140] sm:$0xff] }
 0x8e9   :  { %v1559_v20 = vpop.permute.xlu1 %1558 }
 0x8ea   :  { %v4723_v23 = vadd.f32 %v1559_v20, %v1551_v59  ;;  %v4815_v59 = vld [vmem:[#allocation8 + $0x150] sm:$0xff]  ;;  %v4817_v20 = vld [vmem:[#allocation8 + $0x158] sm:$0xff] }
 0x8eb   :  { %1762 = vmatpush.msrb.mxu3 %v4815_v59  ;;  %1782 = vmatpush.msrb.mxu0 %v4817_v20 }
 0x8ec   :  { %3445 = vtanh.f32 %v4723_v23  ;;  %v1613_v5 = vrot.slane %v4723_v23, 6  ;;  %v4821_v23 = vld [vmem:[#allocation8 + $0x120] sm:$0xff] }
 0x8ed   :  { %3447 = vpow2.f32 %v3298_v47 }
 0x8f1   :  { %v4733_v16 = vpop.permute.xlu1 %1621 }
 0x8f2   :  { %v3446_v25 = vpop.eup %3445  ;;  %5802 = vst [vmem:[#allocation26_spill] sm:$0xff] %v4733_v16  ;;  %v1624_v27 = vmul.f32 %v4733_v16, %v4670_v50  ;;  %v4757_v50 = vld [vmem:[#allocation8 + $0x1c0] sm:$0xff]  ;;  %v4936_v16 = vld [vmem:[#allocation8 + $0x28] sm:$0xff] }
 0x8f3   :  { %1564 = vrot.lane.b32.xlu2 %v3446_v25, %s3757_s5  ;;  %v3448_v28 = vpop.eup %3447  ;;  %1718 = vmatpush.msra.mxu1 %v4757_v50  ;;  %v4823_v25 = vld [vmem:[#allocation8 + $0x128] sm:$0xff] }
 0x8f4   :  { %v1514_v29 = vadd.f32 1.0, %v3448_v28  ;;  %v4828_v28 = vld [vmem:[#allocation8 + $0x130] sm:$0xff]  ;;  %1743 = vmatpush.msrb.mxu2 %v4823_v25 }
 0x8f5   :  { %1719 = vmatpush.msra.mxu1 %v4767_v61  ;;  %1763 = vmatpush.msrb.mxu3 %v4828_v28 }
 0x8f6   :  { %3449 = vrcp.f32 %v1514_v29  ;;  %v1541_v36 = vand.u32 2147483648, %v1514_v29  ;;  %vm1535_vm7 = vweird.f32 %v1514_v29  ;;  %v1539_v54 = vand.u32 2147483647, %v1514_v29 }
 0x8f7   :  { %3451 = vpow2.f32 %v3296_v33  ;;  %1720 = vmatpush.msra.mxu1 %v4782_v52  ;;  %v4840_v33 = vld [vmem:[#allocation8 + $0x110] sm:$0xff] }
 0x8f8   :  { %v1542_v40 = vor.u32 1.1754944e-38, %v1541_v36  ;;  %vm1540_vm9 = vcmp.eq.f32.partialorder %v1539_v54, 8.507059e+37  ;;  %v4854_v36 = vld [vmem:[#allocation8 + $0xf0] sm:$0xff]  ;;  %v4856_v54 = vld [vmem:[#allocation8 + $0xf8] sm:$0xff]  ;;  %1764 = vmatpush.msrb.mxu3 %v4840_v33 }
 0x8f9   :  { %1721 = vmatpush.msra.mxu1 %v4794_v22 }
 0x8fa   :  { %1765 = vmatpush.msrb.mxu3 %v4854_v36 }
 0x8fb   :  { %1607 = vperm.xlu2 %3355, %v5791_v42   ;;  %1722 = vmatpush.msra.mxu1 %v4809_v63 }
 0x8fc   :  { %v3450_v31 = vpop.eup %3449 }
 0x8fd   :  { %v1531_v32 = vmul.f32 %v3450_v31, %v1514_v29  ;;  %vm1536_vm6 = vweird.f32 %v3450_v31  ;;  %v3452_v62 = vpop.eup %3451  ;;  %v4830_v29 = vld [vmem:[#allocation8 + $0x138] sm:$0xff]  ;;  %1723 = vmatpush.msra.mxu1 %v4821_v23 }
 0x8fe   :  { %vm1537_vm8 = vmor %vm1535_vm7, %vm1536_vm6  ;;  %v4730_v42 = vadd.f32 1.0, %v3452_v62  ;;  %1783 = vmatpush.msrb.mxu0 %v4830_v29 }
 0x8ff   :  { %v1532_v11 = vsub.f32 1.0, %v1531_v32  ;;  %v4836_v32 = vld [vmem:[#allocation8 + $0x108] sm:$0xff] }
 0x900   :  { %3453 = vrcp.f32 %v4730_v42  ;;  %1744 = vmatpush.msrb.mxu2 %v4836_v32  ;;  %vm1496_vm11 = vweird.f32 %v4730_v42 }
 0x901   :  { %v1533_v45 = vmul.f32 %v3450_v31, %v1532_v11  ;;  %v4842_v11 = vld [vmem:[#allocation8 + $0x118] sm:$0xff] }
 0x902   :  { %1784 = vmatpush.msrb.mxu0 %v4842_v11 }
 0x903   :  { %v1534_v48 = vadd.f32 %v3450_v31, %v1533_v45  ;;  %v4846_v45 = vld [vmem:[#allocation8 + $0xe0] sm:$0xff] }
 0x904   :  { %1785 = vmatpush.msrb.mxu0 %v4856_v54 }
 0x905   :  { %v1538_v12 = vsel %vm1537_vm8, %v3450_v31, %v1534_v48  ;;  %v4834_v31 = vld [vmem:[#allocation8 + $0x100] sm:$0xff]  ;;  %v4848_v48 = vld [vmem:[#allocation8 + $0xe8] sm:$0xff] }
 0x906   :  { %v1543_v44 = vsel %vm1540_vm9, %v1542_v40, %v1538_v12  ;;  %v4748_v53 = vpop.eup %3453  ;;  %1724 = vmatpush.msra.mxu1 %v4834_v31  ;;  %v1502_v12 = vand.u32 2147483648, %v4730_v42  ;;  %v4861_v40 = vld [vmem:[#allocation8 + $0xc0] sm:$0xff]  ;;  %1745 = vmatpush.msrb.mxu2 %v4848_v48 }
 0x907   :  { %v1492_v24 = vmul.f32 %v4748_v53, %v4730_v42  ;;  %vm1497_vm10 = vweird.f32 %v4748_v53 }
 0x908   :  { %1725 = vmatpush.msra.mxu1 %v4846_v45  ;;  %vm4875_vm12 = vmor %vm1496_vm11, %vm1497_vm10 }
 0x909   :  { %v1493_v49 = vsub.f32 1.0, %v1492_v24  ;;  %v4881_v24 = vld [vmem:[#allocation8 + $0xa0] sm:$0xff] }
 0x90a   :  { %1726 = vmatpush.msra.mxu1 %v4861_v40 }
 0x90b   :  { %v1494_v47 = vmul.f32 %v4748_v53, %v1493_v49 }
 0x90c   :  { %1727 = vmatpush.msra.mxu1 %v4881_v24 }
 0x90d   :  { %v1495_v62 = vadd.f32 %v4748_v53, %v1494_v47  ;;  %v4892_v47 = vld [vmem:[#allocation8 + $0xb8] sm:$0xff] }
 0x90e   :  { %1728 = vmatpush.msra.mxu1 %v4896_v37 }
 0x90f   :  { %v1499_v49 = vsel %vm4875_vm12, %v4748_v53, %v1495_v62  ;;  %v4902_v53 = vld [vmem:[#allocation8 + $0x90] sm:$0xff]  ;;  %v4904_v62 = vld [vmem:[#allocation8 + $0x98] sm:$0xff] }
 0x930   :  { %v1587_v51 = vpop.permute.xlu2 %1586 }
 0x931   :  { %v1589_v8 = vmul.f32 %v1587_v51, %v1543_v44  ;;  %v4863_v44 = vld [vmem:[#allocation8 + $0xc8] sm:$0xff]  ;;  %v1500_v51 = vand.u32 2147483647, %v4730_v42 }
 0x932   :  { %v4883_v42 = vld [vmem:[#allocation8 + $0xa8] sm:$0xff]  ;;  %1746 = vmatpush.msrb.mxu2 %v4863_v44 }
 0x933   :  { %v1603_v17 = vrot.slane %v1589_v8, 6  ;;  %v4869_v8 = vld [vmem:[#allocation8 + $0xd0] sm:$0xff]  ;;  %vm1501_vm13 = vcmp.eq.f32.partialorder %v1500_v51, 8.507059e+37 }
 0x934   :  { %1766 = vmatpush.msrb.mxu3 %v4869_v8  ;;  %1747 = vmatpush.msrb.mxu2 %v4883_v42  ;;  %v4914_v51 = vld [vmem:[#allocation8 + $0x70] sm:$0xff] }
 0x935   :  { %v4740_v2 = vmul.f32 %v1603_v17, %v4735_v9  ;;  %v4871_v17 = vld [vmem:[#allocation8 + $0xd8] sm:$0xff] }
 0x936   :  { %1786 = vmatpush.msrb.mxu0 %v4871_v17  ;;  %1748 = vmatpush.msrb.mxu2 %v4898_v10  ;;  %v4945_v9 = vld [vmem:[#allocation8 + $0x38] sm:$0xff] }
 0x937   :  { %5804 = vst [vmem:[#allocation28_spill] sm:$0xff] %v4740_v2  ;;  %v4751_v18 = vadd.f32 %v1624_v27, %v4740_v2  ;;  %v1503_v2 = vor.u32 1.1754944e-38, %v1502_v12  ;;  %v4908_v12 = vld [vmem:[#allocation8 + $0x60] sm:$0xff] }
 0x938   :  { %1787 = vmatpush.msrb.mxu0 %v4892_v47  ;;  %1729 = vmatpush.msra.mxu1 %v4908_v12 }
 0x939   :  { %5805 = vst [vmem:[#allocation35_spill] sm:$0xff] %v4751_v18  ;;  %1649 = vrot.lane.b32.xlu0 %v4751_v18, %s3757_s5  ;;  %v1504_v27 = vsel %vm1501_vm13, %v1503_v2, %v1499_v49  ;;  %v4920_v2 = vld [vmem:[#allocation8 + $0x40] sm:$0xff]  ;;  %v4922_v49 = vld [vmem:[#allocation8 + $0x48] sm:$0xff]  ;;  %1749 = vmatpush.msrb.mxu2 %v4910_v41  ;;  %v4930_v18 = vpop.permute.xlu1 %1591 }
 0x93a   :  { %1788 = vmatpush.msrb.mxu0 %v4904_v62  ;;  %5809 = vst [vmem:[#allocation44_spill] sm:$0xff] %v4930_v18  ;;  %1730 = vmatpush.msra.mxu1 %v4920_v2 }
 0x93b   :  { %1750 = vmatpush.msrb.mxu2 %v4922_v49 }
 0x93c   :  { %1789 = vmatpush.msrb.mxu0 %v4916_v19  ;;  %1731 = vmatpush.msra.mxu1 %v4934_v21  ;;  %v4965_v21 = vld [vmem:[#allocation8 + $0x18] sm:$0xff] }
 0x93d   :  { %1751 = vmatpush.msrb.mxu2 %v4936_v16 }
 0x941   :  { %1614 = vrot.lane.b32.xlu0 %v1613_v5, %s3757_s5  ;;  %v4890_v5 = vld [vmem:[#allocation8 + $0xb0] sm:$0xff] }
 0x942   :  { %1767 = vmatpush.msrb.mxu3 %v4890_v5 }
 0x944   :  { %1768 = vmatpush.msrb.mxu3 %v4902_v53 }
 0x946   :  { %1769 = vmatpush.msrb.mxu3 %v4914_v51 }
 0x94d   :  { %v1565_v6 = vpop.permute.xlu2 %1564 }
 0x94e   :  { %v1567_v57 = vmul.f32 %v1565_v6, %v1504_v27  ;;  %v4926_v6 = vld [vmem:[#allocation8 + $0x50] sm:$0xff]  ;;  %v4928_v27 = vld [vmem:[#allocation8 + $0x58] sm:$0xff] }
 0x94f   :  { %5808 = vst [vmem:[#allocation43_spill] sm:$0xff] %v4926_v6  ;;  %1770 = vmatpush.msrb.mxu3 %v4926_v6  ;;  %1790 = vmatpush.msrb.mxu0 %v4928_v27  ;;  %v4961_v6 = vld [vmem:[#allocation8 + $0x10] sm:$0xff] }
 0x950   :  { %v1595_v46 = vrot.slane %v1567_v57, 6 }
 0x951   :  { %1771 = vmatpush.msrb.mxu3 %v4943_v14  ;;  %1791 = vmatpush.msrb.mxu0 %v4945_v9 }
 0x952   :  { %v4939_v57 = vmul.f32 %v1595_v46, %v4930_v18  ;;  %v4957_v46 = vld [vmem:[#allocation8] sm:$0xff]  ;;  %v4959_v18 = vld [vmem:[#allocation8 + $0x8] sm:$0xff] }
 0x953   :  { %1732 = vmatpush.msra.mxu1 %v4957_v46  ;;  %1752 = vmatpush.msrb.mxu2 %v4959_v18 }
 0x954   :  { %1634 = vst.msk [vmem:[#allocation2 + $0x3] sm:$0x1] %vm605_vm3, %v4939_v57  ;;  %1772 = vmatpush.msrb.mxu3 %v4961_v6  ;;  %1792 = vmatpush.msrb.mxu0 %v4965_v21 }
 0x955   :  { %1640 = vst.msk [vmem:[#allocation2 + $0xa] sm:$0x2] %vm613_vm4, %v4939_v57  ;;  %2022 = vmatpush.msrb.mxu1 %v4742_v30  ;;  %2042 = vmatpush.msra.mxu2 %v4744_v34  ;;  %v5009_v30 = vpop.permute.xlu2 %1607 }
 0x956   :  { %2062 = vmatpush.msra.mxu3 %v4746_v35  ;;  %2082 = vmatpush.msra.mxu0 %v4755_v60  ;;  %v1610_v34 = vmul.f32 %v5009_v30, %v4684_v58  ;;  %v5812_v35 = vld [vmem:[#allocation45_spill] sm:$0xff] }
 0x957   :  { %2023 = vmatpush.msrb.mxu1 %v4757_v50  ;;  %2043 = vmatpush.msra.mxu2 %v4759_v7  ;;  %v5814_v50 = vld [vmem:[#allocation22_spill] sm:$0xff] }
 0x958   :  { %2063 = vmatpush.msra.mxu3 %v4763_v39  ;;  %2083 = vmatpush.msra.mxu0 %v4765_v3  ;;  %v1629_v39 = vpop.permute.xlu1 %1628 }
 0x959   :  { %2024 = vmatpush.msrb.mxu1 %v4767_v61  ;;  %2044 = vmatpush.msra.mxu2 %v4772_v38  ;;  %v5816_v38 = vld [vmem:[#allocation24_spill] sm:$0xff] }
 0x95a   :  { %2064 = vmatpush.msra.mxu3 %v4774_v56  ;;  %2084 = vmatpush.msra.mxu0 %v4780_v43  ;;  %v5817_v56 = vld [vmem:[#allocation26_spill] sm:$0xff] }
 0x95b   :  { %2025 = vmatpush.msrb.mxu1 %v4782_v52  ;;  %2045 = vmatpush.msra.mxu2 %v4786_v26  ;;  %v1632_v43 = vmul.f32 %v5817_v56, %v5816_v38 }
 0x95c   :  { %2065 = vmatpush.msra.mxu3 %v4788_v0  ;;  %2085 = vmatpush.msra.mxu0 %v4792_v1  ;;  %v5818_v0 = vld [vmem:[#allocation44_spill] sm:$0xff] }
 0x95d   :  { %2026 = vmatpush.msrb.mxu1 %v4794_v22  ;;  %2046 = vmatpush.msra.mxu2 %v4798_v4  ;;  %v5819_v22 = vld [vmem:[#allocation25_spill] sm:$0xff] }
 0x95e   :  { %2066 = vmatpush.msra.mxu3 %v4800_v13  ;;  %2086 = vmatpush.msra.mxu0 %v4804_v15  ;;  %v1618_v4 = vmul.f32 %v5009_v30, %v5819_v22 }
 0x95f   :  { %2027 = vmatpush.msrb.mxu1 %v4809_v63  ;;  %2047 = vmatpush.msra.mxu2 %v4811_v55  ;;  %v5820_v63 = vld [vmem:[#allocation20_spill] sm:$0xff] }
 0x960   :  { %2067 = vmatpush.msra.mxu3 %v4815_v59  ;;  %2087 = vmatpush.msra.mxu0 %v4817_v20  ;;  %v5739_v55 = vrot.slane %v5820_v63, 6 }
 0x961   :  { %2028 = vmatpush.msrb.mxu1 %v4821_v23  ;;  %2048 = vmatpush.msra.mxu2 %v4823_v25 }
 0x962   :  { %2068 = vmatpush.msra.mxu3 %v4828_v28  ;;  %2088 = vmatpush.msra.mxu0 %v4830_v29 }
 0x963   :  { %2029 = vmatpush.msrb.mxu1 %v4834_v31  ;;  %2049 = vmatpush.msra.mxu2 %v4836_v32  ;;  %v5821_v31 = vld [vmem:[#allocation21_spill] sm:$0xff] }
 0x964   :  { %2069 = vmatpush.msra.mxu3 %v4840_v33  ;;  %2089 = vmatpush.msra.mxu0 %v4842_v11 }
 0x965   :  { %2030 = vmatpush.msrb.mxu1 %v4846_v45  ;;  %2050 = vmatpush.msra.mxu2 %v4848_v48 }
 0x966   :  { %2070 = vmatpush.msra.mxu3 %v4854_v36  ;;  %2090 = vmatpush.msra.mxu0 %v4856_v54 }
 0x967   :  { %2031 = vmatpush.msrb.mxu1 %v4861_v40  ;;  %2051 = vmatpush.msra.mxu2 %v4863_v44 }
 0x968   :  { %2071 = vmatpush.msra.mxu3 %v4869_v8  ;;  %2091 = vmatpush.msra.mxu0 %v4871_v17 }
 0x969   :  { %2032 = vmatpush.msrb.mxu1 %v4881_v24  ;;  %2052 = vmatpush.msra.mxu2 %v4883_v42 }
 0x96a   :  { %2072 = vmatpush.msra.mxu3 %v4890_v5  ;;  %2092 = vmatpush.msra.mxu0 %v4892_v47 }
 0x96b   :  { %2033 = vmatpush.msrb.mxu1 %v4896_v37  ;;  %2053 = vmatpush.msra.mxu2 %v4898_v10  ;;  %v5028_v10 = vadd.f32 %v1610_v34, %v4939_v57  ;;  %v5811_v37 = vld [vmem:[#allocation43_spill] sm:$0xff] }
 0x96c   :  { %2073 = vmatpush.msra.mxu3 %v4902_v53  ;;  %2093 = vmatpush.msra.mxu0 %v4904_v62 }
 0x96d   :  { %2034 = vmatpush.msrb.mxu1 %v4908_v12  ;;  %2054 = vmatpush.msra.mxu2 %v4910_v41 }
 0x96e   :  { %2074 = vmatpush.msra.mxu3 %v4914_v51  ;;  %2094 = vmatpush.msra.mxu0 %v4916_v19  ;;  %v5813_v19 = vld [vmem:[#allocation23_spill] sm:$0xff] }
 0x96f   :  { %2035 = vmatpush.msrb.mxu1 %v4920_v2  ;;  %2055 = vmatpush.msra.mxu2 %v4922_v49 }
 0x970   :  { %2075 = vmatpush.msra.mxu3 %v5811_v37  ;;  %2095 = vmatpush.msra.mxu0 %v4928_v27 }
 0x971   :  { %2036 = vmatpush.msrb.mxu1 %v5812_v35  ;;  %2056 = vmatpush.msra.mxu2 %v4936_v16  ;;  %v5740_v16 = vrot.slane %v5813_v19, 6 }
 0x972   :  { %2076 = vmatpush.msra.mxu3 %v4943_v14  ;;  %2096 = vmatpush.msra.mxu0 %v4945_v9 }
 0x973   :  { %2037 = vmatpush.msrb.mxu1 %v4957_v46  ;;  %2057 = vmatpush.msra.mxu2 %v4959_v18 }
 0x974   :  { %2077 = vmatpush.msra.mxu3 %v4961_v6  ;;  %2097 = vmatpush.msra.mxu0 %v4965_v21  ;;  %v5815_v21 = vld [vmem:[#allocation27_spill] sm:$0xff] }
 0x975   :  { %v1631_v3 = vmul.f32 %v1629_v39, %v5815_v21 }
 0x977   :  { %v5057_v26 = vadd.f32 %v1632_v43, %v1631_v3 }
 0x979   :  { %v1935_v43 = vmul.f32 %v5057_v26, %v5009_v30 }
 0x9ab   :  { %v1650_v58 = vpop.permute.xlu0 %1649 }
 0x9ac   :  { %v1652_v41 = vsel %vm211_vm1, %v5028_v10, %v1650_v58 }
 0x9ad   :  { %1733 = vmatmul.f32.vlgmr.msra.gmra.mxu1 %v1652_v41  ;;  %1753 = vmatmul.f32.vlgmr.msrb.gmra.mxu2 %v1652_v41 }
 0x9ae   :  { %1773 = vmatmul.f32.vlgmr.msrb.gmra.mxu3 %v1652_v41  ;;  %1793 = vmatmul.f32.vlgmr.msrb.gmra.mxu0 %v1652_v41 }
 0x9b3   :  { %v1615_v52 = vpop.permute.xlu0 %1614 }
 0x9b4   :  { %v1617_v1 = vmul.f32 %v1615_v52, %v5818_v0 }
 0x9b6   :  { %v5064_v13 = vadd.f32 %v1618_v4, %v1617_v1 }
 0x9b8   :  { %v1926_v52 = vmul.f32 %v5817_v56, %v5064_v13 }
 0xa2a   :  { %v1734_v28 = vpop.f32.mrf.mxu1 }
 0xa2b   :  { %v1794_v60 = vpop.f32.mrf.mxu0  ;;  %v1797_v32 = vadd.f32 %v1734_v28, %v5821_v31 }
 0xa2c   :  { %v5045_v14 = vadd.f32 %v1794_v60, %v5740_v16 }
 0xa2d   :  { %v3299_v11 = vmul.f32 -1.442695, %v1797_v32 }
 0xa2e   :  { %3455 = vtanh.f32 %v5045_v14  ;;  %v3302_v1 = vmul.f32 -1.442695, %v5045_v14 }
 0xa30   :  { %v1754_v9 = vpop.f32.mrf.mxu2 }
 0xa31   :  { %v5049_v7 = vadd.f32 %v1754_v9, %v5814_v50  ;;  %v1774_v15 = vpop.f32.mrf.mxu3 }
 0xa32   :  { %v1799_v59 = vadd.f32 %v1774_v15, %v5739_v55  ;;  %v5316_v55 = vld [vmem:[#allocation8 + $0x60] sm:$0xff] }
 0xa33   :  { %3457 = vtanh.f32 %v5049_v7 }
 0xa34   :  { %v3456_v18 = vpop.eup %3455  ;;  %v3301_v20 = vmul.f32 -1.442695, %v1799_v59 }
 0xa35   :  { %1906 = vrot.lane.b32.xlu2 %v3456_v18, %s3757_s5 }
 0xa36   :  { %3459 = vpow2.f32 %v3301_v20 }
 0xa39   :  { %v3458_v61 = vpop.eup %3457 }
 0xa3a   :  { %1885 = vrot.lane.b32.xlu1 %v3458_v61, %s3757_s5 }
 0xa3c   :  { %v3460_v23 = vpop.eup %3459 }
 0xa3d   :  { %1901 = vrot.lane.b32.xlu2 %v5057_v26, %s3757_s5  ;;  %v1846_v25 = vadd.f32 1.0, %v3460_v23 }
 0xa3f   :  { %3461 = vrcp.f32 %v1846_v25  ;;  %v1859_v40 = vand.u32 2147483648, %v1846_v25  ;;  %vm1853_vm15 = vweird.f32 %v1846_v25  ;;  %v1857_v44 = vand.u32 2147483647, %v1846_v25 }
 0xa40   :  { %3463 = vpow2.f32 %v3299_v11  ;;  %v5822_v11 = vld [vmem:[#allocation35_spill] sm:$0xff] }
 0xa41   :  { %v1860_v24 = vor.u32 1.1754944e-38, %v1859_v40  ;;  %vm1858_vm2 = vcmp.eq.f32.partialorder %v1857_v44, 8.507059e+37 }
 0xa42   :  { %1880 = vrot.lane.b32.xlu1 %v5064_v13, %s3757_s5 }
 0xa45   :  { %v3462_v29 = vpop.eup %3461 }
 0xa46   :  { %v1849_v33 = vmul.f32 %v3462_v29, %v1846_v25  ;;  %vm1854_vm14 = vweird.f32 %v3462_v29  ;;  %v3464_v54 = vpop.eup %3463 }
 0xa47   :  { %vm1855_vm0 = vmor %vm1853_vm15, %vm1854_vm14  ;;  %v1807_v8 = vadd.f32 1.0, %v3464_v54  ;;  %v3300_v54 = vmul.f32 -1.442695, %v5049_v7 }
 0xa48   :  { %v1850_v45 = vsub.f32 1.0, %v1849_v33 }
 0xa49   :  { %3465 = vrcp.f32 %v1807_v8  ;;  %v1820_v49 = vand.u32 2147483648, %v1807_v8  ;;  %vm1814_vm6 = vweird.f32 %v1807_v8  ;;  %v1818_v6 = vand.u32 2147483647, %v1807_v8 }
 0xa4a   :  { %v1851_v48 = vmul.f32 %v3462_v29, %v1850_v45  ;;  %v1932_v45 = vmul.f32 %v5822_v11, %v5009_v30 }
 0xa4b   :  { %v1821_v57 = vor.u32 1.1754944e-38, %v1820_v49  ;;  %vm1819_vm8 = vcmp.eq.f32.partialorder %v1818_v6, 8.507059e+37  ;;  %v1923_v49 = vmul.f32 %v5817_v56, %v5028_v10 }
 0xa4c   :  { %v1852_v36 = vadd.f32 %v3462_v29, %v1851_v48 }
 0xa4e   :  { %v1856_v17 = vsel %vm1855_vm0, %v3462_v29, %v1852_v36 }
 0xa4f   :  { %v1861_v5 = vsel %vm1858_vm2, %v1860_v24, %v1856_v17  ;;  %v3466_v53 = vpop.eup %3465 }
 0xa50   :  { %v1810_v62 = vmul.f32 %v3466_v53, %v1807_v8  ;;  %vm1815_vm5 = vweird.f32 %v3466_v53 }
 0xa51   :  { %vm1816_vm7 = vmor %vm1814_vm6, %vm1815_vm5 }
 0xa52   :  { %v1811_v12 = vsub.f32 1.0, %v1810_v62 }
 0xa54   :  { %v1812_v51 = vmul.f32 %v3466_v53, %v1811_v12 }
 0xa56   :  { %v1813_v2 = vadd.f32 %v3466_v53, %v1812_v51 }
 0xa58   :  { %v1817_v27 = vsel %vm1816_vm7, %v3466_v53, %v1813_v2 }
 0xa59   :  { %v1822_v34 = vsel %vm1819_vm8, %v1821_v57, %v1817_v27 }
 0xa8f   :  { %v1907_v42 = vpop.permute.xlu2 %1906 }
 0xa90   :  { %v1909_v47 = vmul.f32 %v1907_v42, %v1861_v5 }
 0xa92   :  { %1911 = vrot.lane.b32.xlu0 %v1909_v47, %s3757_s5 }
 0xa97   :  { %v1902_v58 = vpop.permute.xlu2 %1901 }
 0xa98   :  { %v1904_v35 = vmul.f32 %v1902_v58, %v1861_v5 }
 0xaac   :  { %v1886_v46 = vpop.permute.xlu1 %1885 }
 0xaad   :  { %v1888_v37 = vmul.f32 %v1886_v46, %v1822_v34 }
 0xaaf   :  { %1890 = vrot.lane.b32.xlu2 %v1888_v37, %s3757_s5 }
 0xab4   :  { %v1881_v60 = vpop.permute.xlu1 %1880 }
 0xab5   :  { %v1883_v18 = vmul.f32 %v1881_v60, %v1822_v34  ;;  %v5738_v34 = vrot.slane %v5813_v19, 2  ;;  %v5353_v19 = vld [vmem:[#allocation8 + $0x38] sm:$0xff] }
 0xb04   :  { %v1912_v41 = vpop.permute.xlu0 %1911 }
 0xb05   :  { %v5074_v9 = vadd.f32 %v1912_v41, %v1904_v35 }
 0xb07   :  { %3467 = vtanh.f32 %v5074_v9 }
 0xb09   :  { %v1891_v39 = vpop.permute.xlu2 %1890 }
 0xb0a   :  { %v5077_v3 = vadd.f32 %v1891_v39, %v1883_v18 }
 0xb0c   :  { %3469 = vtanh.f32 %v5077_v3 }
 0xb0d   :  { %v3468_v61 = vpop.eup %3467  ;;  %3471 = vpow2.f32 %v3302_v1 }
 0xb0e   :  { %1917 = vrot.lane.b32.xlu0 %v3468_v61, %s3757_s5 }
 0xb12   :  { %v3470_v38 = vpop.eup %3469 }
 0xb13   :  { %1896 = vrot.lane.b32.xlu1 %v3470_v38, %s3757_s5  ;;  %v3472_v22 = vpop.eup %3471 }
 0xb14   :  { %v1847_v4 = vadd.f32 1.0, %v3472_v22  ;;  %v5737_v22 = vrot.slane %v5820_v63, 2  ;;  %v5345_v63 = vld [vmem:[#allocation8 + $0x20] sm:$0xff] }
 0xb16   :  { %3473 = vrcp.f32 %v1847_v4  ;;  %v1874_v26 = vand.u32 2147483648, %v1847_v4  ;;  %vm1868_vm10 = vweird.f32 %v1847_v4  ;;  %v1872_v28 = vand.u32 2147483647, %v1847_v4 }
 0xb17   :  { %3475 = vpow2.f32 %v3300_v54 }
 0xb18   :  { %v1875_v13 = vor.u32 1.1754944e-38, %v1874_v26  ;;  %vm1873_vm12 = vcmp.eq.f32.partialorder %v1872_v28, 8.507059e+37 }
 0xb1b   :  { %1937 = vrot.lane.b32.xlu1 %v1935_v43, %s3757_s5 }
 0xb1c   :  { %v3474_v15 = vpop.eup %3473 }
 0xb1d   :  { %v1864_v59 = vmul.f32 %v3474_v15, %v1847_v4  ;;  %vm1869_vm9 = vweird.f32 %v3474_v15  ;;  %v3476_v40 = vpop.eup %3475 }
 0xb1e   :  { %vm1870_vm11 = vmor %vm1868_vm10, %vm1869_vm9  ;;  %v1808_v44 = vadd.f32 1.0, %v3476_v40 }
 0xb1f   :  { %v1865_v20 = vsub.f32 1.0, %v1864_v59 }
 0xb20   :  { %3477 = vrcp.f32 %v1808_v44  ;;  %v1835_v5 = vand.u32 2147483648, %v1808_v44  ;;  %vm1829_vm14 = vweird.f32 %v1808_v44  ;;  %v1833_v47 = vand.u32 2147483647, %v1808_v44 }
 0xb21   :  { %v1866_v23 = vmul.f32 %v3474_v15, %v1865_v20 }
 0xb22   :  { %v1836_v62 = vor.u32 1.1754944e-38, %v1835_v5  ;;  %vm1834_vm0 = vcmp.eq.f32.partialorder %v1833_v47, 8.507059e+37 }
 0xb23   :  { %1928 = vrot.lane.b32.xlu1 %v1926_v52, %s3757_s5  ;;  %v1867_v25 = vadd.f32 %v3474_v15, %v1866_v23 }
 0xb25   :  { %v1871_v29 = vsel %vm1870_vm11, %v3474_v15, %v1867_v25 }
 0xb26   :  { %v1876_v32 = vsel %vm1873_vm12, %v1875_v13, %v1871_v29  ;;  %v3478_v8 = vpop.eup %3477 }
 0xb27   :  { %v1825_v17 = vmul.f32 %v3478_v8, %v1808_v44  ;;  %vm1830_vm13 = vweird.f32 %v3478_v8 }
 0xb28   :  { %vm1831_vm15 = vmor %vm1829_vm14, %vm1830_vm13 }
 0xb29   :  { %v1826_v24 = vsub.f32 1.0, %v1825_v17 }
 0xb2b   :  { %v1827_v42 = vmul.f32 %v3478_v8, %v1826_v24 }
 0xb2d   :  { %v1828_v30 = vadd.f32 %v3478_v8, %v1827_v42 }
 0xb2f   :  { %v1832_v53 = vsel %vm1831_vm15, %v3478_v8, %v1828_v30 }
 0xb30   :  { %v1837_v51 = vsel %vm1834_vm0, %v1836_v62, %v1832_v53 }
 0xb80   :  { %v1918_v33 = vpop.permute.xlu0 %1917 }
 0xb81   :  { %v1920_v14 = vmul.f32 %v1918_v33, %v1876_v32 }
 0xb83   :  { %v5092_v48 = vmul.f32 %v1920_v14, %v5818_v0 }
 0xb85   :  { %5823 = vst [vmem:[#allocation43_spill] sm:$0xff] %v5092_v48  ;;  %v5095_v36 = vadd.f32 %v1932_v45, %v5092_v48  ;;  %v1897_v12 = vpop.permute.xlu1 %1896  ;;  %v5320_v48 = vld [vmem:[#allocation8 + $0x68] sm:$0xff] }
 0xb86   :  { %v1899_v7 = vmul.f32 %v1897_v12, %v1837_v51 }
 0xb87   :  { %1954 = vrot.lane.b32.xlu2 %v5095_v36, %s3757_s5 }
 0xb88   :  { %v5101_v2 = vmul.f32 %v1899_v7, %v5815_v21 }
 0xb8a   :  { %5824 = vst [vmem:[#allocation45_spill] sm:$0xff] %v5101_v2  ;;  %v5106_v6 = vadd.f32 %v1923_v49, %v5101_v2  ;;  %v5322_v2 = vld [vmem:[#allocation8 + $0x70] sm:$0xff] }
 0xb8d   :  { %v1938_v7 = vpop.permute.xlu1 %1937 }
 0xb95   :  { %v1929_v49 = vpop.permute.xlu1 %1928 }
 0xbe1   :  { %v1955_v27 = vpop.permute.xlu2 %1954 }
 0xbe2   :  { %v1957_v57 = vsel %vm211_vm1, %v5106_v6, %v1955_v27  ;;  %v1925_v27 = vmul.f32 %v5077_v3, %v5815_v21 }
 0xbe3   :  { %2038 = vmatmul.f32.vlgmr.msrb.gmra.mxu1 %v1957_v57  ;;  %2058 = vmatmul.f32.vlgmr.msra.gmra.mxu2 %v1957_v57 }
 0xbe4   :  { %2078 = vmatmul.f32.vlgmr.msra.gmra.mxu3 %v1957_v57  ;;  %2098 = vmatmul.f32.vlgmr.msra.gmra.mxu0 %v1957_v57  ;;  %v1931_v57 = vadd.f32 %v1929_v49, %v1925_v27  ;;  %v5176_v49 = vld [vmem:[#allocation8 + $0x1a8] sm:$0xff]  ;;  %v5178_v27 = vld [vmem:[#allocation8 + $0x1b0] sm:$0xff] }
 0xc60   :  { %v2039_v18 = vpop.f32.mrf.mxu1 }
 0xc61   :  { %v2099_v46 = vpop.f32.mrf.mxu0  ;;  %v2106_v39 = vrot.slane %v2039_v18, 6 }
 0xc62   :  { %v2109_v37 = vrot.slane %v2099_v46, 6  ;;  %v2197_v46 = vrot.slane %v1931_v57, 6 }
 0xc63   :  { %v2114_v61 = vadd.f32 %v2106_v39, %v5821_v31  ;;  %v5825_v39 = vld [vmem:[#allocation42_spill] sm:$0xff] }
 0xc64   :  { %v5113_v58 = vadd.f32 %v2109_v37, %v5738_v34  ;;  %v5314_v34 = vld [vmem:[#allocation8 + $0x98] sm:$0xff] }
 0xc65   :  { %v3303_v38 = vmul.f32 -1.442695, %v2114_v61 }
 0xc66   :  { %3479 = vtanh.f32 %v5113_v58  ;;  %v2059_v10 = vpop.f32.mrf.mxu2 }
 0xc67   :  { %v2107_v56 = vrot.slane %v2059_v10, 6  ;;  %v2079_v43 = vpop.f32.mrf.mxu3 }
 0xc68   :  { %v2108_v1 = vrot.slane %v2079_v43, 6 }
 0xc69   :  { %v5117_v35 = vadd.f32 %v2107_v56, %v5814_v50  ;;  %v5347_v50 = vld [vmem:[#allocation8 + $0x28] sm:$0xff] }
 0xc6a   :  { %v2116_v15 = vadd.f32 %v2108_v1, %v5737_v22  ;;  %v5308_v22 = vld [vmem:[#allocation8 + $0x90] sm:$0xff] }
 0xc6b   :  { %3481 = vtanh.f32 %v5117_v35 }
 0xc6c   :  { %v3480_v41 = vpop.eup %3479  ;;  %3483 = vpow2.f32 %v3303_v38  ;;  %v3305_v59 = vmul.f32 -1.442695, %v2116_v15  ;;  %v5826_v38 = vld [vmem:[#allocation39_spill] sm:$0xff]  ;;  %v3304_v15 = vmul.f32 -1.442695, %v5117_v35 }
 0xc6d   :  { %2221 = vrot.lane.b32.xlu0 %v3480_v41, %s3757_s5  ;;  %v2252_v43 = vmul.f32 %v1931_v57, %v5826_v38  ;;  %v5180_v57 = vld [vmem:[#allocation8 + $0x1b8] sm:$0xff] }
 0xc71   :  { %v3482_v60 = vpop.eup %3481 }
 0xc72   :  { %2201 = vrot.lane.b32.xlu2 %v3482_v60, %s3757_s5  ;;  %v3484_v52 = vpop.eup %3483  ;;  %v1934_v60 = vmul.f32 %v5074_v9, %v5818_v0 }
 0xc73   :  { %v2124_v4 = vadd.f32 1.0, %v3484_v52 }
 0xc74   :  { %v1940_v18 = vadd.f32 %v1938_v7, %v1934_v60  ;;  %v5172_v7 = vld [vmem:[#allocation8 + $0x1a0] sm:$0xff] }
 0xc75   :  { %3485 = vrcp.f32 %v2124_v4  ;;  %v2137_v32 = vand.u32 2147483648, %v2124_v4  ;;  %vm2131_vm5 = vweird.f32 %v2124_v4  ;;  %v2135_v33 = vand.u32 2147483647, %v2124_v4  ;;  %v5198_v60 = vld [vmem:[#allocation8 + $0x160] sm:$0xff] }
 0xc76   :  { %3487 = vpow2.f32 %v3305_v59  ;;  %v2266_v61 = vmul.f32 %v1940_v18, %v5825_v39  ;;  %v2217_v21 = vrot.slane %v1940_v18, 6  ;;  %v5200_v18 = vld [vmem:[#allocation8 + $0x168] sm:$0xff] }
 0xc77   :  { %v2138_v45 = vor.u32 1.1754944e-38, %v2137_v32  ;;  %vm2136_vm7 = vcmp.eq.f32.partialorder %v2135_v33, 8.507059e+37 }
 0xc7b   :  { %v3486_v20 = vpop.eup %3485 }
 0xc7c   :  { %v2127_v23 = vmul.f32 %v3486_v20, %v2124_v4  ;;  %v3488_v25 = vpop.eup %3487  ;;  %vm2132_vm2 = vweird.f32 %v3486_v20 }
 0xc7d   :  { %v2163_v28 = vadd.f32 1.0, %v3488_v25  ;;  %vm2133_vm6 = vmor %vm2131_vm5, %vm2132_vm2 }
 0xc7e   :  { %v2128_v26 = vsub.f32 1.0, %v2127_v23 }
 0xc7f   :  { %3489 = vrcp.f32 %v2163_v28  ;;  %v2176_v30 = vand.u32 2147483648, %v2163_v28  ;;  %vm2170_vm9 = vweird.f32 %v2163_v28  ;;  %v2174_v5 = vand.u32 2147483647, %v2163_v28 }
 0xc80   :  { %v2129_v29 = vmul.f32 %v3486_v20, %v2128_v26 }
 0xc81   :  { %v2177_v53 = vor.u32 1.1754944e-38, %v2176_v30  ;;  %vm2175_vm11 = vcmp.eq.f32.partialorder %v2174_v5, 8.507059e+37  ;;  %v5155_v30 = vld [vmem:[#allocation8 + $0x1f0] sm:$0xff]  ;;  %v5159_v5 = vld [vmem:[#allocation8 + $0x1f8] sm:$0xff] }
 0xc82   :  { %v2130_v13 = vadd.f32 %v3486_v20, %v2129_v29  ;;  %2389 = vmatpush.msrb.mxu3 %v5155_v30  ;;  %2409 = vmatpush.msrb.mxu0 %v5159_v5 }
 0xc84   :  { %v2134_v11 = vsel %vm2133_vm6, %v3486_v20, %v2130_v13 }
 0xc85   :  { %v3490_v14 = vpop.eup %3489  ;;  %v2139_v40 = vsel %vm2136_vm7, %v2138_v45, %v2134_v11 }
 0xc86   :  { %v2166_v44 = vmul.f32 %v3490_v14, %v2163_v28  ;;  %vm2171_vm8 = vweird.f32 %v3490_v14  ;;  %v2199_v37 = vmul.f32 %v2197_v46, %v2139_v40  ;;  %v5184_v46 = vld [vmem:[#allocation8 + $0x180] sm:$0xff] }
 0xc87   :  { %vm2172_vm10 = vmor %vm2170_vm9, %vm2171_vm8 }
 0xc88   :  { %v2167_v17 = vsub.f32 1.0, %v2166_v44 }
 0xc8a   :  { %v2168_v24 = vmul.f32 %v3490_v14, %v2167_v17 }
 0xc8c   :  { %v2169_v42 = vadd.f32 %v3490_v14, %v2168_v24 }
 0xc8e   :  { %v2173_v47 = vsel %vm2172_vm10, %v3490_v14, %v2169_v42  ;;  %v3306_v14 = vmul.f32 -1.442695, %v5113_v58  ;;  %v5151_v42 = vld [vmem:[#allocation8 + $0x1e0] sm:$0xff]  ;;  %v5153_v58 = vld [vmem:[#allocation8 + $0x1e8] sm:$0xff] }
 0xc8f   :  { %v2178_v12 = vsel %vm2175_vm11, %v2177_v53, %v2173_v47  ;;  %2349 = vmatpush.msra.mxu1 %v5151_v42  ;;  %2369 = vmatpush.msrb.mxu2 %v5153_v58  ;;  %v5161_v47 = vld [vmem:[#allocation8 + $0x1c0] sm:$0xff]  ;;  %v5163_v53 = vld [vmem:[#allocation8 + $0x1c8] sm:$0xff] }
 0xc90   :  { %v2219_v3 = vmul.f32 %v2217_v21, %v2178_v12  ;;  %v5207_v21 = vld [vmem:[#allocation8 + $0x178] sm:$0xff] }
 0xc91   :  { %2350 = vmatpush.msra.mxu1 %v5161_v47  ;;  %2370 = vmatpush.msrb.mxu2 %v5163_v53 }
 0xc93   :  { %2351 = vmatpush.msra.mxu1 %v5172_v7  ;;  %2371 = vmatpush.msrb.mxu2 %v5176_v49 }
 0xc95   :  { %2352 = vmatpush.msra.mxu1 %v5184_v46 }
 0xc97   :  { %2353 = vmatpush.msra.mxu1 %v5198_v60 }
 0xccc   :  { %v2202_v54 = vpop.permute.xlu2 %2201 }
 0xccd   :  { %v2204_v8 = vmul.f32 %v2202_v54, %v2139_v40 }
 0xccf   :  { %2206 = vrot.lane.b32.xlu2 %v2204_v8, %s3757_s5 }
 0xcdf   :  { %v2222_v62 = vpop.permute.xlu0 %2221 }
 0xce0   :  { %v2224_v51 = vmul.f32 %v2222_v62, %v2178_v12  ;;  %v5168_v12 = vld [vmem:[#allocation8 + $0x1d0] sm:$0xff] }
 0xce1   :  { %2390 = vmatpush.msrb.mxu3 %v5168_v12 }
 0xce2   :  { %2226 = vrot.lane.b32.xlu0 %v2224_v51, %s3757_s5  ;;  %v5170_v51 = vld [vmem:[#allocation8 + $0x1d8] sm:$0xff] }
 0xce3   :  { %2410 = vmatpush.msrb.mxu0 %v5170_v51  ;;  %2391 = vmatpush.msrb.mxu3 %v5178_v27 }
 0xce5   :  { %2411 = vmatpush.msrb.mxu0 %v5180_v57 }
 0xd29   :  { %v2207_v10 = vpop.permute.xlu2 %2206 }
 0xd2a   :  { %v2209_v56 = vadd.f32 %v2207_v10, %v2199_v37  ;;  %v5186_v37 = vld [vmem:[#allocation8 + $0x188] sm:$0xff]  ;;  %v5190_v10 = vld [vmem:[#allocation8 + $0x190] sm:$0xff] }
 0xd2b   :  { %2372 = vmatpush.msrb.mxu2 %v5186_v37  ;;  %2392 = vmatpush.msrb.mxu3 %v5190_v10 }
 0xd2c   :  { %3491 = vtanh.f32 %v2209_v56  ;;  %v2247_v9 = vrot.slane %v2209_v56, 2  ;;  %v5192_v56 = vld [vmem:[#allocation8 + $0x198] sm:$0xff] }
 0xd2d   :  { %2412 = vmatpush.msrb.mxu0 %v5192_v56  ;;  %2373 = vmatpush.msrb.mxu2 %v5200_v18 }
 0xd2f   :  { %2413 = vmatpush.msrb.mxu0 %v5207_v21 }
 0xd32   :  { %v3492_v41 = vpop.eup %3491 }
 0xd33   :  { %2212 = vrot.lane.b32.xlu1 %v3492_v41, %s3757_s5 }
 0xd3b   :  { %2268 = vrot.lane.b32.xlu1 %v2266_v61, %s3757_s5 }
 0xd43   :  { %2254 = vrot.lane.b32.xlu1 %v2252_v43, %s3757_s5  ;;  %v5205_v43 = vld [vmem:[#allocation8 + $0x170] sm:$0xff] }
 0xd44   :  { %2393 = vmatpush.msrb.mxu3 %v5205_v43 }
 0xd54   :  { %v2227_v52 = vpop.permute.xlu0 %2226 }
 0xd55   :  { %v2229_v1 = vadd.f32 %v2227_v52, %v2219_v3  ;;  %v5213_v52 = vld [vmem:[#allocation8 + $0x140] sm:$0xff] }
 0xd56   :  { %2354 = vmatpush.msra.mxu1 %v5213_v52 }
 0xd57   :  { %3493 = vtanh.f32 %v2229_v1  ;;  %v2261_v0 = vrot.slane %v2229_v1, 2  ;;  %v5215_v1 = vld [vmem:[#allocation8 + $0x148] sm:$0xff] }
 0xd58   :  { %3495 = vpow2.f32 %v3304_v15  ;;  %2374 = vmatpush.msrb.mxu2 %v5215_v1 }
 0xd5d   :  { %v3494_v4 = vpop.eup %3493 }
 0xd5e   :  { %2232 = vrot.lane.b32.xlu0 %v3494_v4, %s3757_s5  ;;  %v3496_v59 = vpop.eup %3495  ;;  %v2258_v4 = vmul.f32 %v5095_v36, %v5825_v39  ;;  %v5300_v36 = vld [vmem:[#allocation8 + $0xb8] sm:$0xff]  ;;  %v5302_v39 = vld [vmem:[#allocation8 + $0x80] sm:$0xff] }
 0xd5f   :  { %v2125_v20 = vadd.f32 1.0, %v3496_v59  ;;  %v5234_v59 = vld [vmem:[#allocation8 + $0x120] sm:$0xff] }
 0xd60   :  { %2355 = vmatpush.msra.mxu1 %v5234_v59 }
 0xd61   :  { %3497 = vrcp.f32 %v2125_v20  ;;  %v2152_v13 = vand.u32 2147483648, %v2125_v20  ;;  %vm2146_vm13 = vweird.f32 %v2125_v20  ;;  %v2150_v32 = vand.u32 2147483647, %v2125_v20 }
 0xd62   :  { %3499 = vpow2.f32 %v3306_v14  ;;  %v5254_v14 = vld [vmem:[#allocation8 + $0x118] sm:$0xff] }
 0xd63   :  { %v2153_v11 = vor.u32 1.1754944e-38, %v2152_v13  ;;  %vm2151_vm15 = vcmp.eq.f32.partialorder %v2150_v32, 8.507059e+37 }
 0xd66   :  { %2262 = vrot.lane.b32.xlu0 %v2261_v0, %s3757_s5  ;;  %v5225_v0 = vld [vmem:[#allocation8 + $0x150] sm:$0xff] }
 0xd67   :  { %v3498_v23 = vpop.eup %3497  ;;  %2394 = vmatpush.msrb.mxu3 %v5225_v0 }
 0xd68   :  { %v2142_v25 = vmul.f32 %v3498_v23, %v2125_v20  ;;  %vm2147_vm12 = vweird.f32 %v3498_v23  ;;  %v3500_v40 = vpop.eup %3499  ;;  %v5236_v20 = vld [vmem:[#allocation8 + $0x128] sm:$0xff] }
 0xd69   :  { %vm2148_vm14 = vmor %vm2146_vm13, %vm2147_vm12  ;;  %v5144_v44 = vadd.f32 1.0, %v3500_v40  ;;  %2375 = vmatpush.msrb.mxu2 %v5236_v20  ;;  %v5264_v40 = vld [vmem:[#allocation8 + $0xf0] sm:$0xff] }
 0xd6a   :  { %v2143_v26 = vsub.f32 1.0, %v2142_v25  ;;  %v5240_v25 = vld [vmem:[#allocation8 + $0x130] sm:$0xff] }
 0xd6b   :  { %3501 = vrcp.f32 %v5144_v44  ;;  %v2191_v61 = vand.u32 2147483648, %v5144_v44  ;;  %vm2185_vm2 = vweird.f32 %v5144_v44  ;;  %v2189_v3 = vand.u32 2147483647, %v5144_v44  ;;  %2395 = vmatpush.msrb.mxu3 %v5240_v25 }
 0xd6c   :  { %v2144_v28 = vmul.f32 %v3498_v23, %v2143_v26  ;;  %v5242_v26 = vld [vmem:[#allocation8 + $0x138] sm:$0xff] }
 0xd6d   :  { %vm2190_vm6 = vcmp.eq.f32.partialorder %v2189_v3, 8.507059e+37 }
 0xd6e   :  { %2248 = vrot.lane.b32.xlu0 %v2247_v9, %s3757_s5  ;;  %v2145_v29 = vadd.f32 %v3498_v23, %v2144_v28  ;;  %v5227_v9 = vld [vmem:[#allocation8 + $0x158] sm:$0xff]  ;;  %v5246_v28 = vld [vmem:[#allocation8 + $0x100] sm:$0xff] }
 0xd6f   :  { %2414 = vmatpush.msrb.mxu0 %v5227_v9  ;;  %2356 = vmatpush.msra.mxu1 %v5246_v28 }
 0xd70   :  { %v2149_v33 = vsel %vm2148_vm14, %v3498_v23, %v2145_v29  ;;  %v2192_v23 = vor.u32 1.1754944e-38, %v2191_v61  ;;  %v5248_v29 = vld [vmem:[#allocation8 + $0x108] sm:$0xff] }
 0xd71   :  { %v2154_v35 = vsel %vm2151_vm15, %v2153_v11, %v2149_v33  ;;  %v5147_v8 = vpop.eup %3501  ;;  %v5252_v33 = vld [vmem:[#allocation8 + $0x110] sm:$0xff]  ;;  %2415 = vmatpush.msrb.mxu0 %v5242_v26  ;;  %2376 = vmatpush.msrb.mxu2 %v5248_v29 }
 0xd72   :  { %v2181_v17 = vmul.f32 %v5147_v8, %v5144_v44  ;;  %vm2186_vm0 = vweird.f32 %v5147_v8  ;;  %v5266_v44 = vld [vmem:[#allocation8 + $0xf8] sm:$0xff]  ;;  %2396 = vmatpush.msrb.mxu3 %v5252_v33  ;;  %v5829_v61 = vld [vmem:[#allocation41_spill] sm:$0xff] }
 0xd73   :  { %vm5219_vm5 = vmor %vm2185_vm2, %vm2186_vm0  ;;  %2416 = vmatpush.msrb.mxu0 %v5254_v14 }
 0xd74   :  { %v2182_v24 = vsub.f32 1.0, %v2181_v17  ;;  %v5270_v17 = vld [vmem:[#allocation8 + $0xc0] sm:$0xff]  ;;  %2397 = vmatpush.msrb.mxu3 %v5264_v40 }
 0xd75   :  { %2417 = vmatpush.msrb.mxu0 %v5266_v44 }
 0xd76   :  { %v2183_v62 = vmul.f32 %v5147_v8, %v2182_v24  ;;  %v5272_v24 = vld [vmem:[#allocation8 + $0xc8] sm:$0xff] }
 0xd78   :  { %v2184_v41 = vadd.f32 %v5147_v8, %v2183_v62  ;;  %v5276_v62 = vld [vmem:[#allocation8 + $0xd0] sm:$0xff] }
 0xd79   :  { %2398 = vmatpush.msrb.mxu3 %v5276_v62 }
 0xd7a   :  { %v2188_v15 = vsel %vm5219_vm5, %v5147_v8, %v2184_v41  ;;  %v5278_v41 = vld [vmem:[#allocation8 + $0xd8] sm:$0xff] }
 0xd7b   :  { %v2193_v13 = vsel %vm2190_vm6, %v2192_v23, %v2188_v15  ;;  %v5287_v15 = vld [vmem:[#allocation8 + $0xa0] sm:$0xff]  ;;  %v5289_v23 = vld [vmem:[#allocation8 + $0xa8] sm:$0xff]  ;;  %2418 = vmatpush.msrb.mxu0 %v5278_v41 }
 0xd7d   :  { %2419 = vmatpush.msrb.mxu0 %v5300_v36 }
 0xd7f   :  { %2420 = vmatpush.msrb.mxu0 %v5314_v34 }
 0xda5   :  { %v2213_v45 = vpop.permute.xlu1 %2212 }
 0xda6   :  { %v5142_v54 = vmul.f32 %v2213_v45, %v2154_v35  ;;  %v5258_v35 = vld [vmem:[#allocation8 + $0xe0] sm:$0xff]  ;;  %v5260_v45 = vld [vmem:[#allocation8 + $0xe8] sm:$0xff] }
 0xda7   :  { %2357 = vmatpush.msra.mxu1 %v5258_v35  ;;  %2377 = vmatpush.msrb.mxu2 %v5260_v45 }
 0xda9   :  { %2358 = vmatpush.msra.mxu1 %v5270_v17  ;;  %2378 = vmatpush.msrb.mxu2 %v5272_v24 }
 0xdab   :  { %2359 = vmatpush.msra.mxu1 %v5287_v15  ;;  %2379 = vmatpush.msrb.mxu2 %v5289_v23 }
 0xdad   :  { %v2269_v16 = vpop.permute.xlu1 %2268  ;;  %2360 = vmatpush.msra.mxu1 %v5302_v39 }
 0xdaf   :  { %2361 = vmatpush.msra.mxu1 %v5316_v55 }
 0xdd0   :  { %v2233_v32 = vpop.permute.xlu0 %2232 }
 0xdd1   :  { %v2235_v11 = vmul.f32 %v2233_v32, %v2193_v13  ;;  %v5293_v13 = vld [vmem:[#allocation8 + $0xb0] sm:$0xff] }
 0xdd2   :  { %2399 = vmatpush.msrb.mxu3 %v5293_v13 }
 0xdd3   :  { %v2241_v8 = vrot.slane %v2235_v11, 2 }
 0xdd4   :  { %2400 = vmatpush.msrb.mxu3 %v5308_v22 }
 0xdd5   :  { %v5281_v3 = vmul.f32 %v2241_v8, %v5829_v61  ;;  %v5306_v8 = vld [vmem:[#allocation8 + $0x88] sm:$0xff] }
 0xdd6   :  { %2380 = vmatpush.msrb.mxu2 %v5306_v8  ;;  %2401 = vmatpush.msrb.mxu3 %v5322_v2 }
 0xdd7   :  { %5830 = vst [vmem:[#allocation27_spill] sm:$0xff] %v5281_v3  ;;  %v5296_v32 = vadd.f32 %v2258_v4, %v5281_v3 }
 0xdd8   :  { %v2263_v11 = vpop.permute.xlu0 %2262  ;;  %2381 = vmatpush.msrb.mxu2 %v5320_v48 }
 0xdd9   :  { %5831 = vst [vmem:[#allocation24_spill] sm:$0xff] %v5296_v32  ;;  %v2265_v4 = vmul.f32 %v2263_v11, %v5829_v61  ;;  %2281 = vrot.lane.b32.xlu2 %v5296_v32, %s3757_s5  ;;  %v5328_v61 = vld [vmem:[#allocation8 + $0x78] sm:$0xff]  ;;  %v5330_v11 = vld [vmem:[#allocation8 + $0x40] sm:$0xff]  ;;  %v5334_v32 = vld [vmem:[#allocation8 + $0x48] sm:$0xff] }
 0xdda   :  { %5833 = vst [vmem:[#allocation44_spill] sm:$0xff] %v5330_v11  ;;  %2421 = vmatpush.msrb.mxu0 %v5328_v61  ;;  %2362 = vmatpush.msra.mxu1 %v5330_v11  ;;  %v5361_v11 = vld [vmem:[#allocation8] sm:$0xff] }
 0xddb   :  { %v5324_v3 = vadd.f32 %v2269_v16, %v2265_v4  ;;  %5834 = vst [vmem:[#allocation25_spill] sm:$0xff] %v5334_v32  ;;  %v5339_v16 = vld [vmem:[#allocation8 + $0x50] sm:$0xff]  ;;  %v5341_v4 = vld [vmem:[#allocation8 + $0x58] sm:$0xff]  ;;  %2382 = vmatpush.msrb.mxu2 %v5334_v32 }
 0xddc   :  { %5835 = vst [vmem:[#allocation35_spill] sm:$0xff] %v5339_v16  ;;  %2402 = vmatpush.msrb.mxu3 %v5339_v16  ;;  %2422 = vmatpush.msrb.mxu0 %v5341_v4  ;;  %v5365_v32 = vld [vmem:[#allocation8 + $0x10] sm:$0xff]  ;;  %v5369_v16 = vld [vmem:[#allocation8 + $0x18] sm:$0xff] }
 0xddd   :  { %5832 = vst [vmem:[#allocation26_spill] sm:$0xff] %v5324_v3  ;;  %v2546_v31 = vrot.slane %v5324_v3, 4  ;;  %v5351_v3 = vld [vmem:[#allocation8 + $0x30] sm:$0xff]  ;;  %2363 = vmatpush.msra.mxu1 %v5345_v63  ;;  %2383 = vmatpush.msrb.mxu2 %v5347_v50 }
 0xdde   :  { %2403 = vmatpush.msrb.mxu3 %v5351_v3  ;;  %2423 = vmatpush.msrb.mxu0 %v5353_v19 }
 0xddf   :  { %2547 = vrot.lane.b32.xlu0 %v2546_v31, %s3757_s5  ;;  %v5363_v31 = vld [vmem:[#allocation8 + $0x8] sm:$0xff]  ;;  %2364 = vmatpush.msra.mxu1 %v5361_v11 }
 0xde0   :  { %2384 = vmatpush.msrb.mxu2 %v5363_v31  ;;  %2404 = vmatpush.msrb.mxu3 %v5365_v32 }
 0xde1   :  { %2424 = vmatpush.msrb.mxu0 %v5369_v16  ;;  %2672 = vmatpush.msrb.mxu1 %v5151_v42  ;;  %v2237_v42 = vrot.slane %v5142_v54, 2  ;;  %v2244_v54 = vmul.f32 %v5106_v6, %v5826_v38 }
 0xde2   :  { %2692 = vmatpush.msra.mxu2 %v5153_v58  ;;  %2712 = vmatpush.msra.mxu3 %v5155_v30  ;;  %v5836_v58 = vld [vmem:[#allocation40_spill] sm:$0xff] }
 0xde3   :  { %2732 = vmatpush.msra.mxu0 %v5159_v5  ;;  %2673 = vmatpush.msrb.mxu1 %v5161_v47  ;;  %v5421_v30 = vmul.f32 %v2237_v42, %v5836_v58  ;;  %v5837_v5 = vld [vmem:[#allocation44_spill] sm:$0xff]  ;;  %v5838_v47 = vld [vmem:[#allocation25_spill] sm:$0xff] }
 0xde4   :  { %2693 = vmatpush.msra.mxu2 %v5163_v53  ;;  %2713 = vmatpush.msra.mxu3 %v5168_v12  ;;  %v5842_v12 = vld [vmem:[#allocation22_spill] sm:$0xff] }
 0xde5   :  { %2733 = vmatpush.msra.mxu0 %v5170_v51  ;;  %2674 = vmatpush.msrb.mxu1 %v5172_v7  ;;  %v5434_v53 = vadd.f32 %v2244_v54, %v5421_v30 }
 0xde6   :  { %2694 = vmatpush.msra.mxu2 %v5176_v49  ;;  %2714 = vmatpush.msra.mxu3 %v5178_v27  ;;  %v2249_v49 = vpop.permute.xlu0 %2248 }
 0xde7   :  { %2734 = vmatpush.msra.mxu0 %v5180_v57  ;;  %2675 = vmatpush.msrb.mxu1 %v5184_v46  ;;  %v2251_v27 = vmul.f32 %v2249_v49, %v5836_v58  ;;  %v2255_v46 = vpop.permute.xlu1 %2254 }
 0xde8   :  { %2695 = vmatpush.msra.mxu2 %v5186_v37  ;;  %2715 = vmatpush.msra.mxu3 %v5190_v10 }
 0xde9   :  { %2735 = vmatpush.msra.mxu0 %v5192_v56  ;;  %2676 = vmatpush.msrb.mxu1 %v5198_v60  ;;  %v5460_v37 = vadd.f32 %v2255_v46, %v2251_v27 }
 0xdea   :  { %2696 = vmatpush.msra.mxu2 %v5200_v18  ;;  %2716 = vmatpush.msra.mxu3 %v5205_v43  ;;  %v5843_v18 = vld [vmem:[#allocation20_spill] sm:$0xff] }
 0xdeb   :  { %2736 = vmatpush.msra.mxu0 %v5207_v21  ;;  %2677 = vmatpush.msrb.mxu1 %v5213_v52  ;;  %v2524_v10 = vrot.slane %v5460_v37, 4  ;;  %v5844_v43 = vrot.slane %v5843_v18, 6 }
 0xdec   :  { %2697 = vmatpush.msra.mxu2 %v5215_v1  ;;  %2717 = vmatpush.msra.mxu3 %v5225_v0 }
 0xded   :  { %2737 = vmatpush.msra.mxu0 %v5227_v9  ;;  %2678 = vmatpush.msrb.mxu1 %v5234_v59  ;;  %v5845_v9 = vld [vmem:[#allocation21_spill] sm:$0xff] }
 0xdee   :  { %2698 = vmatpush.msra.mxu2 %v5236_v20  ;;  %2718 = vmatpush.msra.mxu3 %v5240_v25 }
 0xdef   :  { %2738 = vmatpush.msra.mxu0 %v5242_v26  ;;  %2679 = vmatpush.msrb.mxu1 %v5246_v28 }
 0xdf0   :  { %2699 = vmatpush.msra.mxu2 %v5248_v29  ;;  %2719 = vmatpush.msra.mxu3 %v5252_v33 }
 0xdf1   :  { %2739 = vmatpush.msra.mxu0 %v5254_v14  ;;  %2680 = vmatpush.msrb.mxu1 %v5258_v35 }
 0xdf2   :  { %2700 = vmatpush.msra.mxu2 %v5260_v45  ;;  %2720 = vmatpush.msra.mxu3 %v5264_v40 }
 0xdf3   :  { %2740 = vmatpush.msra.mxu0 %v5266_v44  ;;  %2681 = vmatpush.msrb.mxu1 %v5270_v17 }
 0xdf4   :  { %2701 = vmatpush.msra.mxu2 %v5272_v24  ;;  %2721 = vmatpush.msra.mxu3 %v5276_v62 }
 0xdf5   :  { %2741 = vmatpush.msra.mxu0 %v5278_v41  ;;  %2682 = vmatpush.msrb.mxu1 %v5287_v15 }
 0xdf6   :  { %2702 = vmatpush.msra.mxu2 %v5289_v23  ;;  %2722 = vmatpush.msra.mxu3 %v5293_v13 }
 0xdf7   :  { %2742 = vmatpush.msra.mxu0 %v5300_v36  ;;  %2683 = vmatpush.msrb.mxu1 %v5302_v39 }
 0xdf8   :  { %2703 = vmatpush.msra.mxu2 %v5306_v8  ;;  %2723 = vmatpush.msra.mxu3 %v5308_v22  ;;  %v5839_v22 = vld [vmem:[#allocation35_spill] sm:$0xff] }
 0xdf9   :  { %2743 = vmatpush.msra.mxu0 %v5314_v34  ;;  %2684 = vmatpush.msrb.mxu1 %v5316_v55 }
 0xdfa   :  { %2704 = vmatpush.msra.mxu2 %v5320_v48  ;;  %2724 = vmatpush.msra.mxu3 %v5322_v2  ;;  %v5840_v2 = vld [vmem:[#allocation23_spill] sm:$0xff] }
 0xdfb   :  { %2744 = vmatpush.msra.mxu0 %v5328_v61  ;;  %2685 = vmatpush.msrb.mxu1 %v5837_v5  ;;  %v5841_v6 = vrot.slane %v5840_v2, 6 }
 0xdfc   :  { %2705 = vmatpush.msra.mxu2 %v5838_v47  ;;  %2725 = vmatpush.msra.mxu3 %v5839_v22 }
 0xdfd   :  { %2745 = vmatpush.msra.mxu0 %v5341_v4  ;;  %2686 = vmatpush.msrb.mxu1 %v5345_v63 }
 0xdfe   :  { %2706 = vmatpush.msra.mxu2 %v5347_v50  ;;  %2726 = vmatpush.msra.mxu3 %v5351_v3 }
 0xdff   :  { %2746 = vmatpush.msra.mxu0 %v5353_v19  ;;  %2687 = vmatpush.msrb.mxu1 %v5361_v11 }
 0xe00   :  { %2707 = vmatpush.msra.mxu2 %v5363_v31  ;;  %2727 = vmatpush.msra.mxu3 %v5365_v32 }
 0xe01   :  { %2747 = vmatpush.msra.mxu0 %v5369_v16 }
 0xe33   :  { %v2282_v55 = vpop.permute.xlu2 %2281 }
 0xe34   :  { %v2284_v48 = vsel %vm211_vm1, %v5434_v53, %v2282_v55 }
 0xe35   :  { %2365 = vmatmul.f32.vlgmr.msra.gmra.mxu1 %v2284_v48  ;;  %2385 = vmatmul.f32.vlgmr.msrb.gmra.mxu2 %v2284_v48 }
 0xe36   :  { %2405 = vmatmul.f32.vlgmr.msrb.gmra.mxu3 %v2284_v48  ;;  %2425 = vmatmul.f32.vlgmr.msrb.gmra.mxu0 %v2284_v48 }
 0xe51   :  { %v2548_v58 = vpop.permute.xlu0 %2547 }
 0xeb2   :  { %v2366_v52 = vpop.f32.mrf.mxu1 }
 0xeb3   :  { %v2426_v50 = vpop.f32.mrf.mxu0  ;;  %v2433_v1 = vrot.slane %v2366_v52, 4 }
 0xeb4   :  { %v2436_v63 = vrot.slane %v2426_v50, 4 }
 0xeb5   :  { %v2441_v59 = vadd.f32 %v2433_v1, %v5845_v9 }
 0xeb6   :  { %v5450_v34 = vadd.f32 %v2436_v63, %v5841_v6 }
 0xeb7   :  { %v3307_v20 = vmul.f32 -1.442695, %v2441_v59 }
 0xeb8   :  { %3503 = vtanh.f32 %v5450_v34  ;;  %v2386_v19 = vpop.f32.mrf.mxu2 }
 0xeb9   :  { %v2434_v38 = vrot.slane %v2386_v19, 4  ;;  %v2406_v56 = vpop.f32.mrf.mxu3 }
 0xeba   :  { %v2435_v60 = vrot.slane %v2406_v56, 4 }
 0xebb   :  { %v5454_v51 = vadd.f32 %v2434_v38, %v5842_v12  ;;  %v3310_v38 = vmul.f32 -1.442695, %v5450_v34 }
 0xebc   :  { %v2443_v21 = vadd.f32 %v2435_v60, %v5844_v43 }
 0xebd   :  { %3505 = vtanh.f32 %v5454_v51 }
 0xebe   :  { %v3504_v7 = vpop.eup %3503  ;;  %v3309_v0 = vmul.f32 -1.442695, %v2443_v21 }
 0xebf   :  { %2552 = vrot.lane.b32.xlu2 %v3504_v7, %s3757_s5 }
 0xec0   :  { %3507 = vpow2.f32 %v3309_v0 }
 0xec1   :  { %3509 = vpow2.f32 %v3307_v20  ;;  %v5846_v20 = vld [vmem:[#allocation36_spill] sm:$0xff] }
 0xec3   :  { %v3506_v57 = vpop.eup %3505 }
 0xec6   :  { %v3508_v25 = vpop.eup %3507 }
 0xec7   :  { %2530 = vrot.lane.b32.xlu2 %v3506_v57, %s3757_s5  ;;  %v2490_v26 = vadd.f32 1.0, %v3508_v25  ;;  %v3510_v28 = vpop.eup %3509 }
 0xec8   :  { %v2451_v29 = vadd.f32 1.0, %v3510_v28  ;;  %v5848_v28 = vld [vmem:[#allocation24_spill] sm:$0xff] }
 0xec9   :  { %3511 = vrcp.f32 %v2490_v26  ;;  %v2503_v62 = vand.u32 2147483648, %v2490_v26  ;;  %vm2497_vm8 = vweird.f32 %v2490_v26  ;;  %v2501_v41 = vand.u32 2147483647, %v2490_v26 }
 0xeca   :  { %3513 = vrcp.f32 %v2451_v29  ;;  %v2464_v8 = vand.u32 2147483648, %v2451_v29  ;;  %vm2458_vm12 = vweird.f32 %v2451_v29  ;;  %v2462_v61 = vand.u32 2147483647, %v2451_v29 }
 0xecb   :  { %v2504_v23 = vor.u32 1.1754944e-38, %v2503_v62  ;;  %vm2502_vm10 = vcmp.eq.f32.partialorder %v2501_v41, 8.507059e+37 }
 0xecc   :  { %v2465_v16 = vor.u32 1.1754944e-38, %v2464_v8  ;;  %vm2463_vm14 = vcmp.eq.f32.partialorder %v2462_v61, 8.507059e+37  ;;  %v5849_v8 = vld [vmem:[#allocation33_spill] sm:$0xff] }
 0xecf   :  { %2525 = vrot.lane.b32.xlu2 %v2524_v10, %s3757_s5  ;;  %v3512_v33 = vpop.eup %3511 }
 0xed0   :  { %v2493_v14 = vmul.f32 %v3512_v33, %v2490_v26  ;;  %v3514_v45 = vpop.eup %3513  ;;  %vm2498_vm7 = vweird.f32 %v3512_v33  ;;  %v5847_v26 = vld [vmem:[#allocation38_spill] sm:$0xff] }
 0xed1   :  { %v2454_v44 = vmul.f32 %v3514_v45, %v2451_v29  ;;  %vm2499_vm9 = vmor %vm2497_vm8, %vm2498_vm7  ;;  %vm2459_vm11 = vweird.f32 %v3514_v45  ;;  %v2585_v29 = vmul.f32 %v5848_v28, %v5847_v26 }
 0xed2   :  { %v2494_v35 = vsub.f32 1.0, %v2493_v14  ;;  %vm2460_vm13 = vmor %vm2458_vm12, %vm2459_vm11 }
 0xed3   :  { %v2455_v24 = vsub.f32 1.0, %v2454_v44 }
 0xed4   :  { %v2495_v40 = vmul.f32 %v3512_v33, %v2494_v35  ;;  %v3308_v35 = vmul.f32 -1.442695, %v5454_v51 }
 0xed5   :  { %v2456_v15 = vmul.f32 %v3514_v45, %v2455_v24 }
 0xed6   :  { %v2496_v17 = vadd.f32 %v3512_v33, %v2495_v40 }
 0xed7   :  { %v2457_v39 = vadd.f32 %v3514_v45, %v2456_v15 }
 0xed8   :  { %v2500_v3 = vsel %vm2499_vm9, %v3512_v33, %v2496_v17 }
 0xed9   :  { %v2505_v32 = vsel %vm2502_vm10, %v2504_v23, %v2500_v3  ;;  %v2461_v11 = vsel %vm2460_vm13, %v3514_v45, %v2457_v39 }
 0xeda   :  { %v2466_v31 = vsel %vm2463_vm14, %v2465_v16, %v2461_v11  ;;  %v2550_v54 = vmul.f32 %v2548_v58, %v2505_v32  ;;  %v5850_v11 = vld [vmem:[#allocation32_spill] sm:$0xff] }
 0xedb   :  { %v2575_v16 = vmul.f32 %v5434_v53, %v5850_v11 }
 0xf19   :  { %v2553_v13 = vpop.permute.xlu2 %2552 }
 0xf1a   :  { %v2555_v36 = vmul.f32 %v2553_v13, %v2505_v32 }
 0xf1c   :  { %2557 = vrot.lane.b32.xlu1 %v2555_v36, %s3757_s5 }
 0xf21   :  { %v2531_v4 = vpop.permute.xlu2 %2530 }
 0xf22   :  { %v2533_v42 = vmul.f32 %v2531_v4, %v2466_v31 }
 0xf24   :  { %2535 = vrot.lane.b32.xlu0 %v2533_v42, %s3757_s5 }
 0xf29   :  { %v2526_v22 = vpop.permute.xlu2 %2525 }
 0xf2a   :  { %v2528_v55 = vmul.f32 %v2526_v22, %v2466_v31 }
 0xf8e   :  { %v2558_v5 = vpop.permute.xlu1 %2557 }
 0xf8f   :  { %v2560_v47 = vadd.f32 %v2558_v5, %v2550_v54  ;;  %v5851_v5 = vrot.slane %v5840_v2, 2 }
 0xf91   :  { %3515 = vtanh.f32 %v2560_v47  ;;  %v2588_v6 = vrot.slane %v2560_v47, 4 }
 0xf96   :  { %v2536_v48 = vpop.permute.xlu0 %2535 }
 0xf97   :  { %v3516_v50 = vpop.eup %3515  ;;  %v2538_v63 = vadd.f32 %v2536_v48, %v2528_v55 }
 0xf98   :  { %2563 = vrot.lane.b32.xlu1 %v3516_v50, %s3757_s5 }
 0xf99   :  { %3517 = vtanh.f32 %v2538_v63  ;;  %v2578_v14 = vrot.slane %v2538_v63, 4 }
 0xf9a   :  { %3519 = vpow2.f32 %v3310_v38 }
 0xf9f   :  { %v3518_v19 = vpop.eup %3517 }
 0xfa0   :  { %2541 = vrot.lane.b32.xlu2 %v3518_v19, %s3757_s5  ;;  %2589 = vrot.lane.b32.xlu1 %v2588_v6, %s3757_s5  ;;  %v3520_v7 = vpop.eup %3519  ;;  %v5852_v6 = vld [vmem:[#allocation26_spill] sm:$0xff] }
 0xfa1   :  { %v2491_v49 = vadd.f32 1.0, %v3520_v7  ;;  %v2593_v19 = vmul.f32 %v5852_v6, %v5847_v26 }
 0xfa3   :  { %3521 = vrcp.f32 %v2491_v49  ;;  %v2518_v60 = vand.u32 2147483648, %v2491_v49  ;;  %vm2512_vm0 = vweird.f32 %v2491_v49  ;;  %v2516_v43 = vand.u32 2147483647, %v2491_v49 }
 0xfa4   :  { %3523 = vpow2.f32 %v3308_v35 }
 0xfa5   :  { %v2519_v52 = vor.u32 1.1754944e-38, %v2518_v60  ;;  %vm2517_vm5 = vcmp.eq.f32.partialorder %v2516_v43, 8.507059e+37  ;;  %v5854_v43 = vrot.slane %v5843_v18, 2 }
 0xfa9   :  { %v3522_v27 = vpop.eup %3521 }
 0xfaa   :  { %v2508_v57 = vmul.f32 %v3522_v27, %v2491_v49  ;;  %vm2513_vm15 = vweird.f32 %v3522_v27  ;;  %v3524_v45 = vpop.eup %3523 }
 0xfab   :  { %vm2514_vm2 = vmor %vm2512_vm0, %vm2513_vm15  ;;  %v2452_v40 = vadd.f32 1.0, %v3524_v45 }
 0xfac   :  { %v2509_v46 = vsub.f32 1.0, %v2508_v57 }
 0xfad   :  { %3525 = vrcp.f32 %v2452_v40  ;;  %v2479_v3 = vand.u32 2147483648, %v2452_v40  ;;  %vm2473_vm7 = vweird.f32 %v2452_v40  ;;  %v2477_v15 = vand.u32 2147483647, %v2452_v40 }
 0xfae   :  { %v2510_v10 = vmul.f32 %v3522_v27, %v2509_v46 }
 0xfaf   :  { %v2480_v13 = vor.u32 1.1754944e-38, %v2479_v3  ;;  %vm2478_vm9 = vcmp.eq.f32.partialorder %v2477_v15, 8.507059e+37 }
 0xfb0   :  { %v2511_v56 = vadd.f32 %v3522_v27, %v2510_v10  ;;  %v5853_v10 = vld [vmem:[#allocation37_spill] sm:$0xff] }
 0xfb2   :  { %v2515_v21 = vsel %vm2514_vm2, %v3522_v27, %v2511_v56  ;;  %v2583_v27 = vmul.f32 %v5460_v37, %v5850_v11  ;;  %vm611_vm2 = vcmask 1040896  }
 0xfb3   :  { %v2520_v1 = vsel %vm2517_vm5, %v2519_v52, %v2515_v21  ;;  %v3526_v44 = vpop.eup %3525  ;;  %vm615_vm5 = vcmask 1041921  }
 0xfb4   :  { %v2469_v17 = vmul.f32 %v3526_v44, %v2452_v40  ;;  %vm2474_vm6 = vweird.f32 %v3526_v44 }
 0xfb5   :  { %vm2475_vm8 = vmor %vm2473_vm7, %vm2474_vm6 }
 0xfb6   :  { %v2470_v24 = vsub.f32 1.0, %v2469_v17 }
 0xfb8   :  { %v2471_v62 = vmul.f32 %v3526_v44, %v2470_v24 }
 0xfba   :  { %v2472_v41 = vadd.f32 %v3526_v44, %v2471_v62 }
 0xfbc   :  { %v2476_v23 = vsel %vm2475_vm8, %v3526_v44, %v2472_v41 }
 0xfbd   :  { %v2481_v36 = vsel %vm2478_vm9, %v2480_v13, %v2476_v23 }
 0xffa   :  { %v2542_v32 = vpop.permute.xlu2 %2541 }
 0xffb   :  { %v2544_v51 = vmul.f32 %v2542_v32, %v2481_v36 }
 0xffd   :  { %v2568_v39 = vrot.slane %v2544_v51, 4 }
 0xfff   :  { %v5483_v61 = vmul.f32 %v2568_v39, %v5849_v8 }
0x1001   :  { %v2576_v4 = vadd.f32 %v2575_v16, %v5483_v61 }
0x100a   :  { %v2564_v0 = vpop.permute.xlu1 %2563 }
0x100b   :  { %v2566_v34 = vmul.f32 %v2564_v0, %v2520_v1 }
0x100d   :  { %v2572_v59 = vrot.slane %v2566_v34, 4 }
0x100f   :  { %v5474_v25 = vmul.f32 %v2572_v59, %v5846_v20 }
0x1011   :  { %v2586_v33 = vadd.f32 %v2585_v29, %v5474_v25 }
0x1012   :  { %v2590_v53 = vpop.permute.xlu1 %2589 }
0x1013   :  { %2604 = vrot.lane.b32.xlu0 %v2586_v33, %s3757_s5  ;;  %v2592_v50 = vmul.f32 %v2590_v53, %v5846_v20 }
0x1015   :  { %v2594_v2 = vadd.f32 %v2593_v19, %v2592_v50 }
0x101b   :  { %2579 = vrot.lane.b32.xlu0 %v2578_v14, %s3757_s5 }
0x1085   :  { %v2605_v31 = vpop.permute.xlu0 %2604 }
0x1086   :  { %v2607_v42 = vsel %vm211_vm1, %v2576_v4, %v2605_v31 }
0x1087   :  { %2688 = vmatmul.f32.vlgmr.msrb.gmra.mxu1 %v2607_v42  ;;  %2708 = vmatmul.f32.vlgmr.msra.gmra.mxu2 %v2607_v42 }
0x1088   :  { %2728 = vmatmul.f32.vlgmr.msra.gmra.mxu3 %v2607_v42  ;;  %2748 = vmatmul.f32.vlgmr.msra.gmra.mxu0 %v2607_v42  ;;  %v5855_v42 = vld [vmem:[#allocation30_spill] sm:$0xff] }
0x108d   :  { %v2580_v38 = vpop.permute.xlu0 %2579 }
0x108e   :  { %v2582_v7 = vmul.f32 %v2580_v38, %v5849_v8 }
0x1090   :  { %v2584_v57 = vadd.f32 %v2583_v27, %v2582_v7  ;;  %v5859_v7 = vld [vmem:[#allocation45_spill] sm:$0xff] }
0x1092   :  { %v2847_v46 = vrot.slane %v2584_v57, 2 }
0x1104   :  { %v2689_v0 = vpop.f32.mrf.mxu1 }
0x1105   :  { %v2749_v58 = vpop.f32.mrf.mxu0  ;;  %v2756_v34 = vrot.slane %v2689_v0, 2  ;;  %v2923_v0 = vld [vmem:[#allocation9 + $0x78] sm:$0xff] }
0x1106   :  { %v2759_v54 = vrot.slane %v2749_v58, 2  ;;  %2928 = vmatpush.msra.mxu1 %v2923_v0 }
0x1107   :  { %v2764_v20 = vadd.f32 %v2756_v34, %v5845_v9  ;;  %v2922_v34 = vld [vmem:[#allocation9 + $0x70] sm:$0xff] }
0x1108   :  { %v5491_v47 = vadd.f32 %v2759_v54, %v5851_v5  ;;  %v5856_v54 = vld [vmem:[#allocation28_spill] sm:$0xff]  ;;  %2929 = vmatpush.msra.mxu1 %v2922_v34 }
0x1109   :  { %v3311_v28 = vmul.f32 -1.442695, %v2764_v20  ;;  %v2991_v34 = vld [vmem:[%s5676_s9] sm:$0xff] }
0x110a   :  { %3527 = vtanh.f32 %v5491_v47  ;;  %v2709_v22 = vpop.f32.mrf.mxu2 }
0x110b   :  { %v2757_v55 = vrot.slane %v2709_v22, 2  ;;  %v2729_v56 = vpop.f32.mrf.mxu3 }
0x110c   :  { %v2758_v60 = vrot.slane %v2729_v56, 2 }
0x110d   :  { %v5495_v48 = vadd.f32 %v2757_v55, %v5842_v12  ;;  %v2869_v12 = vrot.slane %v2594_v2, 2  ;;  %v5858_v2 = vld [vmem:[#allocation27_spill] sm:$0xff] }
0x110e   :  { %v2766_v21 = vadd.f32 %v2758_v60, %v5854_v43 }
0x110f   :  { %3529 = vtanh.f32 %v5495_v48  ;;  %v3312_v57 = vmul.f32 -1.442695, %v5495_v48  ;;  %v2920_v48 = vld [vmem:[#allocation9 + $0x60] sm:$0xff] }
0x1110   :  { %v3528_v63 = vpop.eup %3527  ;;  %v3313_v52 = vmul.f32 -1.442695, %v2766_v21 }
0x1111   :  { %2875 = vrot.lane.b32.xlu2 %v3528_v63, %s3757_s5 }
0x1112   :  { %3531 = vpow2.f32 %v3313_v52 }
0x1115   :  { %v3530_v49 = vpop.eup %3529 }
0x1116   :  { %2853 = vrot.lane.b32.xlu1 %v3530_v49, %s3757_s5  ;;  %v5860_v49 = vld [vmem:[#allocation43_spill] sm:$0xff] }
0x1118   :  { %v3532_v37 = vpop.eup %3531 }
0x1119   :  { %2870 = vrot.lane.b32.xlu2 %v2869_v12, %s3757_s5  ;;  %v2813_v1 = vadd.f32 1.0, %v3532_v37  ;;  %v3314_v12 = vmul.f32 -1.442695, %v5491_v47 }
0x111b   :  { %3533 = vrcp.f32 %v2813_v1  ;;  %v2826_v18 = vand.u32 2147483648, %v2813_v1  ;;  %vm2820_vm10 = vweird.f32 %v2813_v1  ;;  %v2824_v45 = vand.u32 2147483647, %v2813_v1 }
0x111c   :  { %3535 = vpow2.f32 %v3311_v28 }
0x111d   :  { %v2827_v17 = vor.u32 1.1754944e-38, %v2826_v18  ;;  %vm2825_vm12 = vcmp.eq.f32.partialorder %v2824_v45, 8.507059e+37  ;;  %v2917_v18 = vld [vmem:[#allocation9 + $0x48] sm:$0xff] }
0x111e   :  { %2848 = vrot.lane.b32.xlu1 %v2847_v46, %s3757_s5 }
0x1121   :  { %v3534_v59 = vpop.eup %3533 }
0x1122   :  { %v2816_v26 = vmul.f32 %v3534_v59, %v2813_v1  ;;  %vm2821_vm1 = vweird.f32 %v3534_v59  ;;  %v3536_v35 = vpop.eup %3535 }
0x1123   :  { %vm2822_vm11 = vmor %vm2820_vm10, %vm2821_vm1  ;;  %v2774_v40 = vadd.f32 1.0, %v3536_v35 }
0x1124   :  { %v2817_v29 = vsub.f32 1.0, %v2816_v26  ;;  %v2919_v26 = vld [vmem:[#allocation9 + $0x58] sm:$0xff] }
0x1125   :  { %3537 = vrcp.f32 %v2774_v40  ;;  %v2787_v32 = vand.u32 2147483648, %v2774_v40  ;;  %vm2781_vm14 = vweird.f32 %v2774_v40  ;;  %v2785_v36 = vand.u32 2147483647, %v2774_v40 }
0x1126   :  { %1297 = vrot.lane.b32.xlu1 %v5853_v10, %s3757_s5  ;;  %v2818_v33 = vmul.f32 %v3534_v59, %v2817_v29 }
0x1127   :  { %v2788_v39 = vor.u32 1.1754944e-38, %v2787_v32  ;;  %vm2786_vm0 = vcmp.eq.f32.partialorder %v2785_v36, 8.507059e+37 }
0x1128   :  { %v2819_v14 = vadd.f32 %v3534_v59, %v2818_v33 }
0x112a   :  { %v2823_v44 = vsel %vm2822_vm11, %v3534_v59, %v2819_v14  ;;  %v2921_v59 = vld [vmem:[#allocation9 + $0x68] sm:$0xff]  ;;  %v2918_v14 = vld [vmem:[#allocation9 + $0x50] sm:$0xff] }
0x112b   :  { %v2828_v62 = vsel %vm2825_vm12, %v2827_v17, %v2823_v44  ;;  %v3538_v41 = vpop.eup %3537  ;;  %2930 = vmatpush.msra.mxu1 %v2921_v59  ;;  %v2916_v17 = vld [vmem:[#allocation9 + $0x40] sm:$0xff] }
0x112c   :  { %v2777_v3 = vmul.f32 %v3538_v41, %v2774_v40  ;;  %vm2782_vm13 = vweird.f32 %v3538_v41 }
0x112d   :  { %vm2783_vm15 = vmor %vm2781_vm14, %vm2782_vm13  ;;  %2931 = vmatpush.msra.mxu1 %v2920_v48 }
0x112e   :  { %v2778_v15 = vsub.f32 1.0, %v2777_v3  ;;  %v2915_v3 = vld [vmem:[#allocation9 + $0x38] sm:$0xff] }
0x112f   :  { %2932 = vmatpush.msra.mxu1 %v2919_v26 }
0x1130   :  { %v2779_v23 = vmul.f32 %v3538_v41, %v2778_v15 }
0x1131   :  { %2933 = vmatpush.msra.mxu1 %v2918_v14 }
0x1132   :  { %v2780_v13 = vadd.f32 %v3538_v41, %v2779_v23 }
0x1133   :  { %2934 = vmatpush.msra.mxu1 %v2917_v18 }
0x1134   :  { %v2784_v51 = vsel %vm2783_vm15, %v3538_v41, %v2780_v13  ;;  %v2914_v13 = vld [vmem:[#allocation9 + $0x30] sm:$0xff] }
0x1135   :  { %v2789_v8 = vsel %vm2786_vm0, %v2788_v39, %v2784_v51  ;;  %2935 = vmatpush.msra.mxu1 %v2916_v17  ;;  %v2913_v51 = vld [vmem:[#allocation9 + $0x28] sm:$0xff]  ;;  %v5861_v39 = vld [vmem:[#allocation31_spill] sm:$0xff] }
0x1137   :  { %2936 = vmatpush.msra.mxu1 %v2915_v3 }
0x1139   :  { %2937 = vmatpush.msra.mxu1 %v2914_v13 }
0x113b   :  { %2938 = vmatpush.msra.mxu1 %v2913_v51 }
0x116b   :  { %v2876_v24 = vpop.permute.xlu2 %2875 }
0x116c   :  { %v2878_v9 = vmul.f32 %v2876_v24, %v2828_v62 }
0x116e   :  { %2880 = vrot.lane.b32.xlu0 %v2878_v9, %s3757_s5 }
0x1173   :  { %v2871_v5 = vpop.permute.xlu2 %2870 }
0x1174   :  { %v2873_v22 = vmul.f32 %v2871_v5, %v2828_v62 }
0x1188   :  { %v2854_v11 = vpop.permute.xlu1 %2853 }
0x1189   :  { %v2856_v16 = vmul.f32 %v2854_v11, %v2789_v8 }
0x118b   :  { %2858 = vrot.lane.b32.xlu2 %v2856_v16, %s3757_s5 }
0x1190   :  { %v2849_v4 = vpop.permute.xlu1 %2848 }
0x1191   :  { %v2851_v31 = vmul.f32 %v2849_v4, %v2789_v8 }
0x1193   :  { %608 = vrot.lane.b32.xlu2 %v5855_v42, %s3757_s5 }
0x1198   :  { %v1298_v58 = vpop.permute.xlu1 %1297 }
0x1199   :  { %1300 = vst.msk [vmem:[#allocation2 + $0x5] sm:$0x1] %vm611_vm2, %v1298_v58 }
0x119a   :  { %1302 = vst.msk [vmem:[#allocation2 + $0xc] sm:$0x2] %vm615_vm5, %v1298_v58 }
0x119b   :  { %2272 = vst.msk [vmem:[#allocation2 + $0x5] sm:$0x1] %vm605_vm3, %v5421_v30  ;;  %1636 = vrot.lane.b32.xlu2 %v5856_v54, %s3757_s5  ;;  %v5862_v54 = vld [vmem:[#allocation29_spill] sm:$0xff] }
0x119c   :  { %2278 = vst.msk [vmem:[#allocation2 + $0xc] sm:$0x2] %vm613_vm4, %v5421_v30  ;;  %v5857_v30 = vld [vmem:[#allocation34_spill] sm:$0xff] }
0x11a3   :  { %2597 = vrot.lane.b32.xlu2 %v5474_v25, %s3757_s5 }
0x11e0   :  { %v2881_v55 = vpop.permute.xlu0 %2880 }
0x11e1   :  { %v2883_v53 = vadd.f32 %v2881_v55, %v2873_v22 }
0x11e3   :  { %3539 = vtanh.f32 %v2883_v53  ;;  %v2911_v53 = vld [vmem:[#allocation9 + $0x18] sm:$0xff] }
0x11e5   :  { %v2859_v50 = vpop.permute.xlu2 %2858 }
0x11e6   :  { %v2861_v63 = vadd.f32 %v2859_v50, %v2851_v31  ;;  %v2912_v31 = vld [vmem:[#allocation9 + $0x20] sm:$0xff]  ;;  %v2910_v50 = vld [vmem:[#allocation9 + $0x10] sm:$0xff] }
0x11e7   :  { %2939 = vmatpush.msra.mxu1 %v2912_v31 }
0x11e8   :  { %3541 = vtanh.f32 %v2861_v63  ;;  %v2909_v63 = vld [vmem:[#allocation9 + $0x8] sm:$0xff] }
0x11e9   :  { %v3540_v6 = vpop.eup %3539  ;;  %3543 = vpow2.f32 %v3314_v12  ;;  %2940 = vmatpush.msra.mxu1 %v2911_v53  ;;  %v3000_v12 = vld [vmem:[%s5676_s9 + $0x48] sm:$0xff] }
0x11ea   :  { %2886 = vrot.lane.b32.xlu0 %v3540_v6, %s3757_s5  ;;  %3545 = vpow2.f32 %v3312_v57  ;;  %v2908_v6 = vld [vmem:[#allocation9] sm:$0xff]  ;;  %v2999_v57 = vld [vmem:[%s5676_s9 + $0x40] sm:$0xff] }
0x11eb   :  { %2941 = vmatpush.msra.mxu1 %v2910_v50 }
0x11ed   :  { %v609_v19 = vpop.permute.xlu2 %608  ;;  %2942 = vmatpush.msra.mxu1 %v2909_v63 }
0x11ee   :  { %v3542_v38 = vpop.eup %3541  ;;  %612 = vst.msk [vmem:[#allocation2 + $0x7] sm:$0x1] %vm611_vm2, %v609_v19 }
0x11ef   :  { %616 = vst.msk [vmem:[#allocation2 + $0xe] sm:$0x2] %vm615_vm5, %v609_v19  ;;  %2864 = vrot.lane.b32.xlu1 %v3542_v38, %s3757_s5  ;;  %v3544_v46 = vpop.eup %3543  ;;  %2943 = vmatpush.msra.mxu1 %v2908_v6 }
0x11f0   :  { %v2814_v10 = vadd.f32 1.0, %v3544_v46  ;;  %v3546_v56 = vpop.eup %3545  ;;  %v2998_v46 = vld [vmem:[%s5676_s9 + $0x38] sm:$0xff] }
0x11f1   :  { %v2775_v60 = vadd.f32 1.0, %v3546_v56  ;;  %v2996_v56 = vld [vmem:[%s5676_s9 + $0x28] sm:$0xff] }
0x11f2   :  { %958 = vrot.lane.b32.xlu0 %v5857_v30, %s3757_s5  ;;  %3547 = vrcp.f32 %v2814_v10  ;;  %v2841_v29 = vand.u32 2147483648, %v2814_v10  ;;  %vm2835_vm7 = vweird.f32 %v2814_v10  ;;  %v2839_v35 = vand.u32 2147483647, %v2814_v10  ;;  %v3006_v30 = vld [vmem:[%s5676_s9 + $0x78] sm:$0xff] }
0x11f3   :  { %3549 = vrcp.f32 %v2775_v60  ;;  %v2802_v24 = vand.u32 2147483648, %v2775_v60  ;;  %vm2796_vm10 = vweird.f32 %v2775_v60  ;;  %v2800_v41 = vand.u32 2147483647, %v2775_v60  ;;  %3007 = vmatpush.msrb.mxu2 %v3006_v30 }
0x11f4   :  { %v2842_v40 = vor.u32 1.1754944e-38, %v2841_v29  ;;  %vm2840_vm1 = vcmp.eq.f32.partialorder %v2839_v35, 8.507059e+37 }
0x11f5   :  { %v1637_v25 = vpop.permute.xlu2 %1636  ;;  %v2803_v36 = vor.u32 1.1754944e-38, %v2802_v24  ;;  %vm2801_vm12 = vcmp.eq.f32.partialorder %v2800_v41, 8.507059e+37 }
0x11f6   :  { %1639 = vst.msk [vmem:[#allocation2 + $0x4] sm:$0x1] %vm611_vm2, %v1637_v25 }
0x11f7   :  { %1641 = vst.msk [vmem:[#allocation2 + $0xb] sm:$0x2] %vm615_vm5, %v1637_v25  ;;  %2274 = vrot.lane.b32.xlu1 %v5858_v2, %s3757_s5  ;;  %v3005_v25 = vld [vmem:[%s5676_s9 + $0x70] sm:$0xff]  ;;  %v3004_v2 = vld [vmem:[%s5676_s9 + $0x68] sm:$0xff] }
0x11f8   :  { %1941 = vst.msk [vmem:[#allocation2 + $0x4] sm:$0x1] %vm605_vm3, %v5859_v7  ;;  %v3548_v43 = vpop.eup %3547  ;;  %3008 = vmatpush.msrb.mxu2 %v3005_v25 }
0x11f9   :  { %1947 = vst.msk [vmem:[#allocation2 + $0xb] sm:$0x2] %vm613_vm4, %v5859_v7  ;;  %v2831_v21 = vmul.f32 %v3548_v43, %v2814_v10  ;;  %v3550_v52 = vpop.eup %3549  ;;  %vm2836_vm6 = vweird.f32 %v3548_v43  ;;  %v3003_v7 = vld [vmem:[%s5676_s9 + $0x60] sm:$0xff]  ;;  %v2997_v10 = vld [vmem:[%s5676_s9 + $0x30] sm:$0xff] }
0x11fa   :  { %1943 = vrot.lane.b32.xlu0 %v5860_v49, %s3757_s5  ;;  %v2792_v1 = vmul.f32 %v3550_v52, %v2775_v60  ;;  %vm2837_vm8 = vmor %vm2835_vm7, %vm2836_vm6  ;;  %vm2797_vm9 = vweird.f32 %v3550_v52  ;;  %3009 = vmatpush.msrb.mxu2 %v3004_v2  ;;  %v3002_v49 = vld [vmem:[%s5676_s9 + $0x58] sm:$0xff]  ;;  %v2995_v60 = vld [vmem:[%s5676_s9 + $0x20] sm:$0xff]  ;;  %vm3030_vm6 = vcmask 7168  }
0x11fb   :  { %v2832_v37 = vsub.f32 1.0, %v2831_v21  ;;  %vm2798_vm11 = vmor %vm2796_vm10, %vm2797_vm9  ;;  %v2994_v21 = vld [vmem:[%s5676_s9 + $0x18] sm:$0xff] }
0x11fc   :  { %v2793_v20 = vsub.f32 1.0, %v2792_v1  ;;  %3010 = vmatpush.msrb.mxu2 %v3003_v7 }
0x11fd   :  { %v2598_v27 = vpop.permute.xlu2 %2597  ;;  %v2833_v47 = vmul.f32 %v3548_v43, %v2832_v37  ;;  %v2992_v37 = vld [vmem:[%s5676_s9 + $0x8] sm:$0xff] }
0x11fe   :  { %2600 = vst.msk [vmem:[#allocation2 + $0x1] sm:$0x1] %vm611_vm2, %v2598_v27  ;;  %v2794_v33 = vmul.f32 %v3550_v52, %v2793_v20  ;;  %3011 = vmatpush.msrb.mxu2 %v3002_v49 }
0x11ff   :  { %2602 = vst.msk [vmem:[#allocation2 + $0x8] sm:$0x2] %vm615_vm5, %v2598_v27  ;;  %v2834_v28 = vadd.f32 %v3548_v43, %v2833_v47  ;;  %v3001_v27 = vld [vmem:[%s5676_s9 + $0x50] sm:$0xff] }
0x1200   :  { %v2795_v44 = vadd.f32 %v3550_v52, %v2794_v33  ;;  %3012 = vmatpush.msrb.mxu2 %v3001_v27 }
0x1201   :  { %v2838_v45 = vsel %vm2837_vm8, %v3548_v43, %v2834_v28  ;;  %v3357_v43 = vld [vmem:[#allocation11] ss:$0 sm:$0xff] }
0x1202   :  { %v2843_v62 = vsel %vm2840_vm1, %v2842_v40, %v2838_v45  ;;  %v2799_v23 = vsel %vm2798_vm11, %v3550_v52, %v2795_v44  ;;  %3013 = vmatpush.msrb.mxu2 %v3000_v12  ;;  %v2993_v52 = vld [vmem:[%s5676_s9 + $0x10] sm:$0xff] }
0x1203   :  { %v2804_v11 = vsel %vm2801_vm12, %v2803_v36, %v2799_v23 }
0x1204   :  { %3014 = vmatpush.msrb.mxu2 %v2999_v57 }
0x1206   :  { %3015 = vmatpush.msrb.mxu2 %v2998_v46 }
0x1208   :  { %3016 = vmatpush.msrb.mxu2 %v2997_v10 }
0x120a   :  { %3017 = vmatpush.msrb.mxu2 %v2996_v56 }
0x120c   :  { %3018 = vmatpush.msrb.mxu2 %v2995_v60 }
0x120e   :  { %3019 = vmatpush.msrb.mxu2 %v2994_v21 }
0x1210   :  { %3020 = vmatpush.msrb.mxu2 %v2993_v52 }
0x1212   :  { %3021 = vmatpush.msrb.mxu2 %v2992_v37 }
0x1214   :  { %3022 = vmatpush.msrb.mxu2 %v2991_v34 }
0x125c   :  { %v2887_v9 = vpop.permute.xlu0 %2886 }
0x125d   :  { %v2889_v15 = vmul.f32 %v2887_v9, %v2843_v62 }
0x125f   :  { %v2895_v32 = vrot.slane %v2889_v15, 6 }
0x1261   :  { %v2897_v8 = vmul.f32 %v2895_v32, %v5861_v39  ;;  %v2865_v16 = vpop.permute.xlu1 %2864 }
0x1262   :  { %v2867_v4 = vmul.f32 %v2865_v16, %v2804_v11 }
0x1263   :  { %2900 = vrot.lane.b32.xlu0 %v2897_v8, %s3757_s5 }
0x1264   :  { %v2891_v42 = vrot.slane %v2867_v4, 6  ;;  %v959_v58 = vpop.permute.xlu0 %958 }
0x1265   :  { %961 = vst.msk [vmem:[#allocation2 + $0x6] sm:$0x1] %vm611_vm2, %v959_v58 }
0x1266   :  { %v2893_v5 = vmul.f32 %v2891_v42, %v5862_v54  ;;  %963 = vst.msk [vmem:[#allocation2 + $0xd] sm:$0x2] %vm615_vm5, %v959_v58 }
0x1267   :  { %2595 = vst.msk [vmem:[#allocation2 + $0x6] sm:$0x1] %vm605_vm3, %v5483_v61 }
0x1268   :  { %2898 = vst.msk [vmem:[#allocation2 + $0x7] sm:$0x1] %vm605_vm3, %v2893_v5 }
0x1269   :  { %2904 = vst.msk [vmem:[#allocation2 + $0xe] sm:$0x2] %vm613_vm4, %v2893_v5  ;;  %v2275_v22 = vpop.permute.xlu1 %2274 }
0x126a   :  { %2601 = vst.msk [vmem:[#allocation2 + $0xd] sm:$0x2] %vm613_vm4, %v5483_v61 }
0x126b   :  { %2277 = vst.msk [vmem:[#allocation2 + $0x2] sm:$0x1] %vm611_vm2, %v2275_v22 }
0x126c   :  { %2279 = vst.msk [vmem:[#allocation2 + $0x9] sm:$0x2] %vm615_vm5, %v2275_v22  ;;  %v1944_v55 = vpop.permute.xlu0 %1943 }
0x126d   :  { %1946 = vst.msk [vmem:[#allocation2 + $0x3] sm:$0x1] %vm611_vm2, %v1944_v55 }
0x126e   :  { %1948 = vst.msk [vmem:[#allocation2 + $0xa] sm:$0x2] %vm615_vm5, %v1944_v55 }
0x12d5   :  { %v2901_v19 = vpop.permute.xlu0 %2900 }
0x12d6   :  { %2903 = vst.msk [vmem:[#allocation2] sm:$0x1] %vm611_vm2, %v2901_v19 }
0x12d7   :  { %2905 = vst.msk [vmem:[#allocation2 + $0x7] sm:$0x2] %vm615_vm5, %v2901_v19 }
0x12dd   :  { %v2906_v61 = vld [vmem:[#allocation2] sm:$0xff] }
0x12de   :  { %2944 = vmatmul.f32.vlgmr.msra.gmra.mxu1 %v2906_v61  ;;  %3114 = vmatpush.msrb.mxu3 %v2906_v61  ;;  %v2907_v38 = vld [vmem:[#allocation2 + $0x8] sm:$0xff] }
0x12df   :  { %3201 = vmatpush.msrb.mxu0 %v2907_v38 }
0x12e6   :  { %2947 = vmatmul.f32.gmra.mxu1 %v2907_v38 }
0x135b   :  { %v2945_v1 = vpop.f32.mrf.mxu1 }
0x135c   :  { %v2946_v0 = vadd.f32 %v3357_v43, %v2945_v1 }
0x135e   :  { %v3315_v59 = vmul.f32 -1.442695, %v2946_v0 }
0x1360   :  { %3551 = vpow2.f32 %v3315_v59 }
0x1363   :  { %v2948_v47 = vpop.f32.mrf.mxu1 }
0x1364   :  { %v2949_v20 = vadd.f32 %v3357_v43, %v2948_v47 }
0x1366   :  { %v3552_v48 = vpop.eup %3551  ;;  %v3316_v26 = vmul.f32 -1.442695, %v2949_v20 }
0x1367   :  { %v2957_v28 = vadd.f32 1.0, %v3552_v48 }
0x1368   :  { %3553 = vpow2.f32 %v3316_v26 }
0x1369   :  { %3555 = vrcp.f32 %v2957_v28  ;;  %v2970_v45 = vand.u32 2147483648, %v2957_v28  ;;  %v2968_v44 = vand.u32 2147483647, %v2957_v28  ;;  %vm2964_vm4 = vweird.f32 %v2957_v28 }
0x136b   :  { %v2971_v62 = vor.u32 1.1754944e-38, %v2970_v45  ;;  %vm2969_vm14 = vcmp.eq.f32.partialorder %v2968_v44, 8.507059e+37 }
0x136e   :  { %v3554_v29 = vpop.eup %3553 }
0x136f   :  { %v3556_v33 = vpop.eup %3555  ;;  %v2958_v14 = vadd.f32 1.0, %v3554_v29 }
0x1370   :  { %v2960_v35 = vmul.f32 %v3556_v33, %v2957_v28  ;;  %vm2965_vm3 = vweird.f32 %v3556_v33 }
0x1371   :  { %3557 = vrcp.f32 %v2958_v14  ;;  %vm2966_vm13 = vmor %vm2964_vm4, %vm2965_vm3  ;;  %v2985_v13 = vand.u32 2147483648, %v2958_v14  ;;  %v2983_v36 = vand.u32 2147483647, %v2958_v14  ;;  %vm2979_vm0 = vweird.f32 %v2958_v14 }
0x1372   :  { %v2961_v18 = vsub.f32 1.0, %v2960_v35  ;;  %vm3095_vm4 = vcmask 64512  }
0x1373   :  { %v2986_v39 = vor.u32 1.1754944e-38, %v2985_v13  ;;  %vm2984_vm5 = vcmp.eq.f32.partialorder %v2983_v36, 8.507059e+37  ;;  %v3226_v36 = vld [vmem:[%s5677_s10 + $0x78] sm:$0xff] }
0x1374   :  { %v2962_v40 = vmul.f32 %v3556_v33, %v2961_v18  ;;  %3231 = vmatpush.msra.mxu3 %v3226_v36 }
0x1376   :  { %v2963_v17 = vadd.f32 %v3556_v33, %v2962_v40 }
0x1377   :  { %v3558_v24 = vpop.eup %3557 }
0x1378   :  { %v2967_v9 = vsel %vm2966_vm13, %v3556_v33, %v2963_v17  ;;  %v2975_v41 = vmul.f32 %v3558_v24, %v2958_v14  ;;  %vm2980_vm15 = vweird.f32 %v3558_v24  ;;  %vm3209_vm13 = vcmask 1040384  }
0x1379   :  { %v2972_v3 = vsel %vm2969_vm14, %v2971_v62, %v2967_v9  ;;  %vm2981_vm2 = vmor %vm2979_vm0, %vm2980_vm15  ;;  %vm3251_vm14 = vcmask 17408  }
0x137a   :  { %v2989_v15 = vmul.f32 %v2972_v3, %v2946_v0  ;;  %v2976_v23 = vsub.f32 1.0, %v2975_v41 }
0x137c   :  { %3023 = vmatmul.f32.vlgmr.msrb.gmra.mxu2 %v2989_v15  ;;  %v2977_v32 = vmul.f32 %v3558_v24, %v2976_v23 }
0x137e   :  { %v2978_v51 = vadd.f32 %v3558_v24, %v2977_v32 }
0x1380   :  { %v2982_v8 = vsel %vm2981_vm2, %v3558_v24, %v2978_v51  ;;  %v3225_v51 = vld [vmem:[%s5677_s10 + $0x70] sm:$0xff] }
0x1381   :  { %v2987_v11 = vsel %vm2984_vm5, %v2986_v39, %v2982_v8  ;;  %v3224_v39 = vld [vmem:[%s5677_s10 + $0x68] sm:$0xff]  ;;  %3232 = vmatpush.msra.mxu3 %v3225_v51  ;;  %v3223_v8 = vld [vmem:[%s5677_s10 + $0x60] sm:$0xff] }
0x1382   :  { %v2990_v16 = vmul.f32 %v2987_v11, %v2949_v20  ;;  %v3222_v11 = vld [vmem:[%s5677_s10 + $0x58] sm:$0xff] }
0x1383   :  { %3233 = vmatpush.msra.mxu3 %v3224_v39 }
0x1384   :  { %3026 = vmatmul.f32.gmra.mxu2 %v2990_v16  ;;  %v3221_v16 = vld [vmem:[%s5677_s10 + $0x50] sm:$0xff] }
0x1385   :  { %3234 = vmatpush.msra.mxu3 %v3223_v8 }
0x1387   :  { %3235 = vmatpush.msra.mxu3 %v3222_v11 }
0x1389   :  { %3236 = vmatpush.msra.mxu3 %v3221_v16 }
0x13ff   :  { %v3024_v4 = vpop.f32.mrf.mxu2 }
0x1400   :  { %v3031_v31 = vsel %vm3030_vm6, %v3024_v4, -inf }
0x1401   :  { %v3032_v42 = vrot.slane %v3031_v31, 4 }
0x1403   :  { %v3033_v58 = vmax.f32 %v3031_v31, %v3032_v42  ;;  %v3219_v31 = vld [vmem:[%s5677_s10 + $0x40] sm:$0xff]  ;;  %v3218_v42 = vld [vmem:[%s5677_s10 + $0x38] sm:$0xff] }
0x1405   :  { %v3034_v54 = vrot.slane %v3033_v58, 2 }
0x1407   :  { %v3035_v5 = vmax.f32 %v3033_v58, %v3034_v54  ;;  %v3027_v22 = vpop.f32.mrf.mxu2  ;;  %v3217_v58 = vld [vmem:[%s5677_s10 + $0x30] sm:$0xff]  ;;  %v3216_v54 = vld [vmem:[%s5677_s10 + $0x28] sm:$0xff] }
0x1408   :  { %v3119_v55 = vsel %vm3030_vm6, %v3027_v22, -inf }
0x1409   :  { %v3036_v53 = vrot.slane %v3035_v5, 1  ;;  %v3120_v50 = vrot.slane %v3119_v55, 4 }
0x140b   :  { %v3037_v63 = vmax.f32 %v3035_v5, %v3036_v53  ;;  %v3121_v6 = vmax.f32 %v3119_v55, %v3120_v50  ;;  %v3215_v5 = vld [vmem:[%s5677_s10 + $0x20] sm:$0xff]  ;;  %v3213_v55 = vld [vmem:[%s5677_s10 + $0x10] sm:$0xff] }
0x140d   :  { %v3038_v19 = vsub.f32 %v3024_v4, %v3037_v63  ;;  %v3122_v61 = vrot.slane %v3121_v6, 2  ;;  %v3220_v4 = vld [vmem:[%s5677_s10 + $0x48] sm:$0xff] }
0x140e   :  { %3237 = vmatpush.msra.mxu3 %v3220_v4  ;;  %v3212_v63 = vld [vmem:[%s5677_s10 + $0x8] sm:$0xff] }
0x140f   :  { %v3039_v38 = vmul.f32 1.442695, %v3038_v19  ;;  %v3123_v30 = vmax.f32 %v3121_v6, %v3122_v61  ;;  %v3211_v6 = vld [vmem:[%s5677_s10] sm:$0xff] }
0x1410   :  { %3238 = vmatpush.msra.mxu3 %v3219_v31 }
0x1411   :  { %3559 = vpow2.f32 %v3039_v38  ;;  %v3124_v25 = vrot.slane %v3123_v30, 1 }
0x1412   :  { %3239 = vmatpush.msra.mxu3 %v3218_v42 }
0x1413   :  { %v3125_v2 = vmax.f32 %v3123_v30, %v3124_v25  ;;  %v3358_v25 = vld [vmem:[#allocation12] ss:$0 sm:$0xff] }
0x1414   :  { %3240 = vmatpush.msra.mxu3 %v3217_v58 }
0x1415   :  { %v3126_v7 = vsub.f32 %v3027_v22, %v3125_v2  ;;  %v3214_v22 = vld [vmem:[%s5677_s10 + $0x18] sm:$0xff] }
0x1416   :  { %3241 = vmatpush.msra.mxu3 %v3216_v54 }
0x1417   :  { %v3560_v49 = vpop.eup %3559  ;;  %v3127_v27 = vmul.f32 1.442695, %v3126_v7 }
0x1418   :  { %v3041_v12 = vsel %vm3030_vm6, %v3560_v49, 0.0  ;;  %3242 = vmatpush.msra.mxu3 %v3215_v5 }
0x1419   :  { %v3042_v57 = vrot.slane %v3041_v12, 4  ;;  %3561 = vpow2.f32 %v3127_v27 }
0x141a   :  { %3243 = vmatpush.msra.mxu3 %v3214_v22 }
0x141b   :  { %v3043_v46 = vadd.f32 %v3042_v57, %v3041_v12 }
0x141c   :  { %3244 = vmatpush.msra.mxu3 %v3213_v55 }
0x141d   :  { %v3044_v10 = vrot.slane %v3043_v46, 2 }
0x141e   :  { %3245 = vmatpush.msra.mxu3 %v3212_v63 }
0x141f   :  { %v3562_v56 = vpop.eup %3561  ;;  %v3045_v60 = vadd.f32 %v3044_v10, %v3043_v46 }
0x1420   :  { %v3129_v43 = vsel %vm3030_vm6, %v3562_v56, 0.0  ;;  %3246 = vmatpush.msra.mxu3 %v3211_v6 }
0x1421   :  { %v3046_v21 = vrot.slane %v3045_v60, 1  ;;  %v3130_v52 = vrot.slane %v3129_v43, 4 }
0x1423   :  { %v3047_v37 = vadd.f32 %v3046_v21, %v3045_v60  ;;  %v3131_v1 = vadd.f32 %v3130_v52, %v3129_v43 }
0x1425   :  { %3563 = vrcp.f32 %v3047_v37  ;;  %v3132_v0 = vrot.slane %v3131_v1, 2  ;;  %v3059_v28 = vand.u32 2147483648, %v3047_v37  ;;  %v3057_v33 = vand.u32 2147483647, %v3047_v37 }
0x1426   :  { %vm3053_vm8 = vweird.f32 %v3047_v37 }
0x1427   :  { %v3133_v34 = vadd.f32 %v3132_v0, %v3131_v1  ;;  %v3060_v18 = vor.u32 1.1754944e-38, %v3059_v28  ;;  %vm3058_vm1 = vcmp.eq.f32.partialorder %v3057_v33, 8.507059e+37 }
0x1429   :  { %v3134_v59 = vrot.slane %v3133_v34, 1 }
0x142b   :  { %v3564_v47 = vpop.eup %3563  ;;  %v3135_v20 = vadd.f32 %v3134_v59, %v3133_v34 }
0x142c   :  { %v3049_v48 = vmul.f32 %v3564_v47, %v3047_v37  ;;  %vm3054_vm7 = vweird.f32 %v3564_v47 }
0x142d   :  { %3565 = vrcp.f32 %v3135_v20  ;;  %vm3055_vm9 = vmor %vm3053_vm8, %vm3054_vm7  ;;  %v3147_v62 = vand.u32 2147483648, %v3135_v20  ;;  %v3145_v41 = vand.u32 2147483647, %v3135_v20  ;;  %vm3141_vm11 = vweird.f32 %v3135_v20 }
0x142e   :  { %v3050_v26 = vsub.f32 1.0, %v3049_v48 }
0x142f   :  { %v3148_v15 = vor.u32 1.1754944e-38, %v3147_v62  ;;  %vm3146_vm3 = vcmp.eq.f32.partialorder %v3145_v41, 8.507059e+37 }
0x1430   :  { %v3051_v29 = vmul.f32 %v3564_v47, %v3050_v26 }
0x1432   :  { %v3052_v14 = vadd.f32 %v3564_v47, %v3051_v29 }
0x1433   :  { %v3566_v35 = vpop.eup %3565 }
0x1434   :  { %v3056_v45 = vsel %vm3055_vm9, %v3564_v47, %v3052_v14  ;;  %v3137_v40 = vmul.f32 %v3566_v35, %v3135_v20  ;;  %vm3142_vm10 = vweird.f32 %v3566_v35 }
0x1435   :  { %v3061_v44 = vsel %vm3058_vm1, %v3060_v18, %v3056_v45  ;;  %vm3143_vm12 = vmor %vm3141_vm11, %vm3142_vm10 }
0x1436   :  { %v3062_v17 = vmul.f32 %v3560_v49, %v3061_v44  ;;  %v3138_v24 = vsub.f32 1.0, %v3137_v40 }
0x1438   :  { %3063 = vxpose.xlu1.b32.start.end [1/1] (short) (narrow) %v3062_v17, 8  ;;  %v3139_v9 = vmul.f32 %v3566_v35, %v3138_v24 }
0x143a   :  { %v3140_v3 = vadd.f32 %v3566_v35, %v3139_v9 }
0x143c   :  { %v3144_v23 = vsel %vm3143_vm12, %v3566_v35, %v3140_v3 }
0x143d   :  { %v3149_v13 = vsel %vm3146_vm3, %v3148_v15, %v3144_v23 }
0x143e   :  { %v3150_v32 = vmul.f32 %v3562_v56, %v3149_v13 }
0x1440   :  { %3151 = vxpose.xlu2.b32.start.end [1/1] (short) (narrow) %v3150_v32, 8 }
0x14d9   :  { %v3167_v53 = vpop.trf.xlu2 }
0x14da   :  { %3318 = vmatmul.msk.f32.vlgmr.msrb.gmra.mxu0 %vm3095_vm4, %v3167_v53 }
0x14dc   :  { %v3079_v50 = vpop.trf.xlu1 }
0x14dd   :  { %3317 = vmatmul.msk.f32.vlgmr.msrb.gmra.mxu3 %vm3095_vm4, %v3079_v50 }
0x1557   :  { %v3203_v19 = vpop.f32.mrf.mxu0 }
0x1558   :  { %v3207_v61 = vrot.slane %v3203_v19, 7 }
0x1560   :  { %v3116_v38 = vpop.f32.mrf.mxu3 }
0x1561   :  { %v3210_v30 = vsel %vm3209_vm13, %v3116_v38, %v3207_v61 }
0x1562   :  { %3247 = vmatmul.f32.vlgmr.msra.gmra.mxu3 %v3210_v30 }
0x15e5   :  { %v3248_v2 = vpop.f32.mrf.mxu3 }
0x15e6   :  { %v3249_v7 = vadd.f32 %v3358_v25, %v3248_v2 }
0x15e8   :  { %3252 = vst.msk [vmem:[#allocation14] sm:$0x3] %vm3251_vm14, %v3249_v7 }
0x15e9   :  { %3263 = dma.vmem_to_hbm [thread:$0]  %s3259_s19, 32, %s3261_s21, [#allocation5]  }
0x15ea   :  { %3744 = dma.done.wait [#allocation5], 32  }
0x15eb   :  { %3745 = vsyncadd [#allocation5], 4294967264 }
0x15ec   :  { %3268 = vsyncpa [#allocation4], 1 }
0x15ed   :  { %3269 = vsyncpa [#allocation7], 1 }
0x15ee   :  { %3270 = vsyncpa [#allocation10], 1 }
0x15ef   :  { %3271 = vsyncpa [#allocation13], 1 }
0x15f0   :  { %3272 = vsyncpa [#allocation5], 1 }

</bundles_post_ra>
